<compile_context>
chip_gen: v7x
topology: tpu7x:2x2x1
jax: 0.10.0
libtpu: 0.0.40
codegen_flags: <defaults>
</compile_context>

<pallas_src>
import jax
import jax.numpy as jnp
from jax.experimental import pallas as pl
from jax.experimental.pallas import tpu as pltpu

LANE = 128


def _round_up(x, m):
    return (x + m - 1) // m * m


def _mlp_kernel(x_ref,
                w1_ref, b1_ref,
                w2_ref, b2_ref,
                w3_ref, b3_ref,
                w4_ref, b4_ref,
                out_ref):
    """One batch tile of the fused 4-layer MLP.

    Weights/biases live in constant-index VMEM blocks (fetched once, resident
    across grid steps); only the (TM, F_in) activation tile streams per step.
    Matmul accumulation is f32; bias-add / ReLU run in f32 on the VPU.
    Intermediate activations never touch HBM, so their narrow lane widths
    (64/32/16) cost nothing.
    """
    x = x_ref[...]

    h = jnp.dot(x, w1_ref[...], preferred_element_type=jnp.float32) + b1_ref[...]
    h = jnp.maximum(h, 0.0)

    h = jnp.dot(h.astype(w2_ref.dtype), w2_ref[...],
                preferred_element_type=jnp.float32) + b2_ref[...]
    h = jnp.maximum(h, 0.0)

    h = jnp.dot(h.astype(w3_ref.dtype), w3_ref[...],
                preferred_element_type=jnp.float32) + b3_ref[...]
    h = jnp.maximum(h, 0.0)

    out = jnp.dot(h.astype(w4_ref.dtype), w4_ref[...],
                  preferred_element_type=jnp.float32) + b4_ref[...]
    out_ref[...] = out.astype(out_ref.dtype)


def prepare_params(params, *, use_bf16=True):
    """Call-once weight preparation (hoisted out of the forward pass).

    * w1's input dim is padded to a 128 multiple only if needed (3072 already is),
      its output dim is kept at the TRUE width (no 64 -> 128 lane padding).
    * w2/w3 are kept at their true shapes.
    * only w4/b4's output dim is padded to 128 lanes so the HBM output store
      is unmasked.
    * matmul inputs optionally cast to bf16 (biases stay f32: they are added
      after the f32 accumulation).
    """
    mm_dtype = jnp.bfloat16 if use_bf16 else jnp.float32
    in_size = params["w1"].shape[0]
    f_in_pad = _round_up(in_size, LANE)
    n_classes = params["w4"].shape[1]
    c_pad = _round_up(n_classes, LANE)

    ws, bs = [], []
    for i in range(1, 5):
        w = params[f"w{i}"].astype(jnp.float32)
        b = params[f"b{i}"].reshape(1, -1).astype(jnp.float32)
        rows = f_in_pad if i == 1 else w.shape[0]
        cols = c_pad if i == 4 else w.shape[1]
        if (rows, cols) != w.shape:
            w_p = jnp.zeros((rows, cols), jnp.float32)
            w_p = w_p.at[: w.shape[0], : w.shape[1]].set(w)
        else:
            w_p = w
        if cols != b.shape[1]:
            b_p = jnp.zeros((1, cols), jnp.float32)
            b_p = b_p.at[:, : b.shape[1]].set(b)
        else:
            b_p = b
        ws.append(w_p.astype(mm_dtype))  # matmul inputs may be bf16
        bs.append(b_p)                   # bias stays f32 (post-accumulation add)

    # TODO(synk): on v7x, w1 could additionally be cast to fp8 (fp8 MXU path) to
    # halve the dominant weight transfer once accuracy is validated; not done here.
    return tuple(ws), tuple(bs), n_classes


def _choose_tile_m(n, block_m, row_align):
    """Batch tile size.

    * rounded to the sublane packing (8 rows f32 / 16 rows bf16) so the block
      shape always satisfies the (8,128) tiling rule,
    * split so the grid has >= 2 (preferably even) steps: v7x shards the
      'parallel' batch axis across its two TensorCores and the software
      pipeline needs a next x-tile to prefetch.
    For large batches sweep block_m in {256, 512, 1024}.
    """
    n_al = _round_up(max(n, 1), row_align)
    tm = min(_round_up(block_m, row_align), n_al)
    steps = pl.cdiv(n_al, tm)
    if steps < 2 and n_al >= 2 * row_align:
        tm = _round_up(pl.cdiv(n_al, 2), row_align)
        steps = pl.cdiv(n_al, tm)
    if steps > 1 and steps % 2 == 1:
        tm = _round_up(pl.cdiv(n_al, steps + 1), row_align)
        steps = pl.cdiv(n_al, tm)
    return tm, steps * tm


def base_model_forward(x_nchw, prepared, *, block_m=256):
    """Flatten NCHW input (== torch .view(-1, input_size)) and run the fused MLP.

    `prepared` comes from prepare_params() (weights padded/cast exactly once).
    """
    ws, bs, n_classes = prepared
    mm_dtype = ws[0].dtype
    row_align = 16 if mm_dtype == jnp.bfloat16 else 8

    n = x_nchw.shape[0]
    input_size = 1
    for d in x_nchw.shape[1:]:
        input_size *= d
    f_in_pad = ws[0].shape[0]
    c_pad = ws[3].shape[1]

    tm, n_pad = _choose_tile_m(n, block_m, row_align)
    grid = (n_pad // tm,)

    x = x_nchw.reshape(n, input_size)
    if n_pad == n and f_in_pad == input_size:
        # No materialized zero-pad copy: just a (free) reshape + dtype cast.
        x_p = x.astype(mm_dtype)
    else:
        x_p = jnp.zeros((n_pad, f_in_pad), mm_dtype)
        x_p = x_p.at[:n, :input_size].set(x.astype(mm_dtype))

    args = [x_p]
    for w, b in zip(ws, bs):
        args += [w, b]

    def build_and_call(single_buffer_weights):
        x_spec = pl.BlockSpec((tm, f_in_pad), lambda i: (i, 0))
        out_spec = pl.BlockSpec((tm, c_pad), lambda i: (i, 0))

        def const_spec(shape):
            # Same block index every grid step -> fetched once, stays VMEM-resident.
            if single_buffer_weights:
                # Constant blocks do not need the default double buffer.
                return pl.BlockSpec(shape, lambda i: (0, 0),
                                    pipeline_mode=pl.Buffered(1))
            return pl.BlockSpec(shape, lambda i: (0, 0))

        in_specs = [x_spec]
        for w, b in zip(ws, bs):
            in_specs += [const_spec(w.shape), const_spec(b.shape)]

        call = pl.pallas_call(
            _mlp_kernel,
            out_shape=jax.ShapeDtypeStruct((n_pad, c_pad), jnp.float32),
            grid=grid,
            in_specs=in_specs,
            out_specs=out_spec,
            compiler_params=pltpu.CompilerParams(
                dimension_semantics=("parallel",),
                # 32 MiB is ample at these sizes on every generation; keep
                # <= ~48 MiB on v7x (64 MiB physical) if block_m is scaled to 1024 f32.
                vmem_limit_bytes=32 * 1024 * 1024,
            ),
        )
        return call(*args)

    try:
        out_padded = build_and_call(True)
    except Exception:
        # Fallback for Pallas versions without pipeline_mode=pl.Buffered support;
        # constant weight blocks then just get the default double buffering.
        out_padded = build_and_call(False)

    # Slice back to the real batch / class count (stores inside were lane-dense).
    return out_padded[:n, :n_classes]


def init_params(key, input_size, hidden_dim, n_classes):
    """Deterministic init matching nn.Linear default U(-1/sqrt(fan_in), 1/sqrt(fan_in))."""
    dims = [input_size, hidden_dim * 2, hidden_dim, hidden_dim // 2, n_classes]
    params = {}
    keys = jax.random.split(key, 2 * (len(dims) - 1))
    for i in range(len(dims) - 1):
        fan_in, fan_out = dims[i], dims[i + 1]
        bound = 1.0 / (fan_in ** 0.5)
        params[f"w{i+1}"] = jax.random.uniform(
            keys[2 * i], (fan_in, fan_out), jnp.float32, -bound, bound)
        params[f"b{i+1}"] = jax.random.uniform(
            keys[2 * i + 1], (1, fan_out), jnp.float32, -bound, bound)
    return params


if __name__ == "__main__":
    # Shapes consistent with the module: images of size (3, 32, 32) ->
    # input_size = 3072, hidden_dim = 32, n_classes = 10, batch = 64
    # (parameters['batch_size']).
    batch, C, H, W = 64, 3, 32, 32
    input_size = C * H * W          # 3072 (already a multiple of 128)
    hidden_dim = 32
    n_classes = 10

    key = jax.random.PRNGKey(0)
    k_x, k_p = jax.random.split(key)
    x = jax.random.normal(k_x, (batch, C, H, W), jnp.float32)
    params = init_params(k_p, input_size, hidden_dim, n_classes)

    # Plain-JAX reference of the same math.
    xf = x.reshape(batch, input_size)
    ref = xf
    for i in range(1, 5):
        ref = ref @ params[f"w{i}"] + params[f"b{i}"]
        if i < 4:
            ref = jnp.maximum(ref, 0.0)

    # f32 path (numerically exact; default block_m auto-splits batch 64 into
    # two 32-row tiles -> 2 grid steps for the pipeline / both v7x TCs).
    prep_f32 = prepare_params(params, use_bf16=False)
    out = jax.block_until_ready(base_model_forward(x, prep_f32))
    assert out.shape == (batch, n_classes), out.shape
    assert jnp.allclose(out, ref, atol=1e-4, rtol=1e-4)

    # bf16 MXU path (default; halves x / w1 DMA bytes on v5e/v6e/v7x alike).
    prep_bf16 = prepare_params(params, use_bf16=True)
    out_bf16 = jax.block_until_ready(base_model_forward(x, prep_bf16))
    assert out_bf16.shape == (batch, n_classes), out_bf16.shape
    assert jnp.allclose(out_bf16, ref, atol=2e-1, rtol=2e-1)

    print("KERNEL_OK")
</pallas_src>

<mosaic_0001>
module attributes {stable_mosaic.version = 11 : i64} {
  func.func @_mlp_kernel(%arg0: i32, %arg1: memref<32x3072xf32, #tpu.memory_space<vmem>>, %arg2: memref<3072x64xf32, #tpu.memory_space<vmem>>, %arg3: memref<1x64xf32, #tpu.memory_space<vmem>>, %arg4: memref<64x32xf32, #tpu.memory_space<vmem>>, %arg5: memref<1x32xf32, #tpu.memory_space<vmem>>, %arg6: memref<32x16xf32, #tpu.memory_space<vmem>>, %arg7: memref<1x16xf32, #tpu.memory_space<vmem>>, %arg8: memref<16x128xf32, #tpu.memory_space<vmem>>, %arg9: memref<1x128xf32, #tpu.memory_space<vmem>>, %arg10: memref<32x128xf32, #tpu.memory_space<vmem>>) attributes {dimension_semantics = [#tpu.dimension_semantics<parallel>], iteration_bounds = array<i64: 2>, scalar_prefetch = 0 : i64, scratch_operands = 0 : i64, tpu.core_type = #tpu.core_type<tc>, window_params = [{transform_indices = @transform_0, window_bounds = array<i64: 32, 3072>}, {pipeline_mode = #tpu.pipeline_mode<synchronous>, transform_indices = @transform_1, window_bounds = array<i64: 3072, 64>}, {pipeline_mode = #tpu.pipeline_mode<synchronous>, transform_indices = @transform_2, window_bounds = array<i64: 1, 64>}, {pipeline_mode = #tpu.pipeline_mode<synchronous>, transform_indices = @transform_3, window_bounds = array<i64: 64, 32>}, {pipeline_mode = #tpu.pipeline_mode<synchronous>, transform_indices = @transform_4, window_bounds = array<i64: 1, 32>}, {pipeline_mode = #tpu.pipeline_mode<synchronous>, transform_indices = @transform_5, window_bounds = array<i64: 32, 16>}, {pipeline_mode = #tpu.pipeline_mode<synchronous>, transform_indices = @transform_6, window_bounds = array<i64: 1, 16>}, {pipeline_mode = #tpu.pipeline_mode<synchronous>, transform_indices = @transform_7, window_bounds = array<i64: 16, 128>}, {pipeline_mode = #tpu.pipeline_mode<synchronous>, transform_indices = @transform_8, window_bounds = array<i64: 1, 128>}, {transform_indices = @transform_9, window_bounds = array<i64: 32, 128>}]} {
    %c0 = arith.constant 0 : index
    %c0_0 = arith.constant 0 : index
    %0 = vector.load %arg1[%c0, %c0_0] : memref<32x3072xf32, #tpu.memory_space<vmem>>, vector<32x3072xf32>
    %c0_1 = arith.constant 0 : index
    %c0_2 = arith.constant 0 : index
    %1 = vector.load %arg2[%c0_1, %c0_2] : memref<3072x64xf32, #tpu.memory_space<vmem>>, vector<3072x64xf32>
    %cst = arith.constant dense<0.000000e+00> : vector<32x64xf32>
    %2 = tpu.matmul %0, %1, %cst {dimension_numbers = #tpu.dot_dimension_numbers<[1], [0], [0], [1], [0, 0, 1, 1], [], []>} : vector<32x3072xf32>, vector<3072x64xf32>, vector<32x64xf32> -> vector<32x64xf32>
    %c0_3 = arith.constant 0 : index
    %c0_4 = arith.constant 0 : index
    %3 = vector.load %arg3[%c0_3, %c0_4] : memref<1x64xf32, #tpu.memory_space<vmem>>, vector<1x64xf32>
    %4 = vector.broadcast %3 : vector<1x64xf32> to vector<32x64xf32>
    %5 = arith.addf %2, %4 : vector<32x64xf32>
    %cst_5 = arith.constant 0.000000e+00 : f32
    %6 = vector.broadcast %cst_5 : f32 to vector<32x64xf32>
    %7 = arith.maximumf %5, %6 : vector<32x64xf32>
    %c0_6 = arith.constant 0 : index
    %c0_7 = arith.constant 0 : index
    %8 = vector.load %arg4[%c0_6, %c0_7] : memref<64x32xf32, #tpu.memory_space<vmem>>, vector<64x32xf32>
    %cst_8 = arith.constant dense<0.000000e+00> : vector<32x32xf32>
    %9 = tpu.matmul %7, %8, %cst_8 {dimension_numbers = #tpu.dot_dimension_numbers<[1], [0], [0], [1], [0, 0, 1, 1], [], []>} : vector<32x64xf32>, vector<64x32xf32>, vector<32x32xf32> -> vector<32x32xf32>
    %c0_9 = arith.constant 0 : index
    %c0_10 = arith.constant 0 : index
    %10 = vector.load %arg5[%c0_9, %c0_10] : memref<1x32xf32, #tpu.memory_space<vmem>>, vector<1x32xf32>
    %11 = vector.broadcast %10 : vector<1x32xf32> to vector<32x32xf32>
    %12 = arith.addf %9, %11 : vector<32x32xf32>
    %cst_11 = arith.constant 0.000000e+00 : f32
    %13 = vector.broadcast %cst_11 : f32 to vector<32x32xf32>
    %14 = arith.maximumf %12, %13 : vector<32x32xf32>
    %c0_12 = arith.constant 0 : index
    %c0_13 = arith.constant 0 : index
    %15 = vector.load %arg6[%c0_12, %c0_13] : memref<32x16xf32, #tpu.memory_space<vmem>>, vector<32x16xf32>
    %cst_14 = arith.constant dense<0.000000e+00> : vector<32x16xf32>
    %16 = tpu.matmul %14, %15, %cst_14 {dimension_numbers = #tpu.dot_dimension_numbers<[1], [0], [0], [1], [0, 0, 1, 1], [], []>} : vector<32x32xf32>, vector<32x16xf32>, vector<32x16xf32> -> vector<32x16xf32>
    %c0_15 = arith.constant 0 : index
    %c0_16 = arith.constant 0 : index
    %17 = vector.load %arg7[%c0_15, %c0_16] : memref<1x16xf32, #tpu.memory_space<vmem>>, vector<1x16xf32>
    %18 = vector.broadcast %17 : vector<1x16xf32> to vector<32x16xf32>
    %19 = arith.addf %16, %18 : vector<32x16xf32>
    %cst_17 = arith.constant 0.000000e+00 : f32
    %20 = vector.broadcast %cst_17 : f32 to vector<32x16xf32>
    %21 = arith.maximumf %19, %20 : vector<32x16xf32>
    %c0_18 = arith.constant 0 : index
    %c0_19 = arith.constant 0 : index
    %22 = vector.load %arg8[%c0_18, %c0_19] : memref<16x128xf32, #tpu.memory_space<vmem>>, vector<16x128xf32>
    %cst_20 = arith.constant dense<0.000000e+00> : vector<32x128xf32>
    %23 = tpu.matmul %21, %22, %cst_20 {dimension_numbers = #tpu.dot_dimension_numbers<[1], [0], [0], [1], [0, 0, 1, 1], [], []>} : vector<32x16xf32>, vector<16x128xf32>, vector<32x128xf32> -> vector<32x128xf32>
    %c0_21 = arith.constant 0 : index
    %c0_22 = arith.constant 0 : index
    %24 = vector.load %arg9[%c0_21, %c0_22] : memref<1x128xf32, #tpu.memory_space<vmem>>, vector<1x128xf32>
    %25 = vector.broadcast %24 : vector<1x128xf32> to vector<32x128xf32>
    %26 = arith.addf %23, %25 : vector<32x128xf32>
    %c0_23 = arith.constant 0 : index
    %c0_24 = arith.constant 0 : index
    %27 = vector.load %arg10[%c0_23, %c0_24] : memref<32x128xf32, #tpu.memory_space<vmem>>, vector<32x128xf32>
    tpu.vector_store %arg10[%c0_23, %c0_24], %26 {strides = array<i32>} : memref<32x128xf32, #tpu.memory_space<vmem>>, vector<32x128xf32>,
    return
  }
  func.func @transform_0(%arg0: i32) -> (i32, i32) {
    %c0_i32 = arith.constant 0 : i32
    %c0_i32_0 = arith.constant 0 : i32
    return %arg0, %c0_i32 : i32, i32
  }
  func.func @transform_1(%arg0: i32) -> (i32, i32) {
    %c0_i32 = arith.constant 0 : i32
    %c0_i32_0 = arith.constant 0 : i32
    %c0_i32_1 = arith.constant 0 : i32
    return %c0_i32, %c0_i32_0 : i32, i32
  }
  func.func @transform_2(%arg0: i32) -> (i32, i32) {
    %c0_i32 = arith.constant 0 : i32
    %c0_i32_0 = arith.constant 0 : i32
    %c0_i32_1 = arith.constant 0 : i32
    return %c0_i32, %c0_i32_0 : i32, i32
  }
  func.func @transform_3(%arg0: i32) -> (i32, i32) {
    %c0_i32 = arith.constant 0 : i32
    %c0_i32_0 = arith.constant 0 : i32
    %c0_i32_1 = arith.constant 0 : i32
    return %c0_i32, %c0_i32_0 : i32, i32
  }
  func.func @transform_4(%arg0: i32) -> (i32, i32) {
    %c0_i32 = arith.constant 0 : i32
    %c0_i32_0 = arith.constant 0 : i32
    %c0_i32_1 = arith.constant 0 : i32
    return %c0_i32, %c0_i32_0 : i32, i32
  }
  func.func @transform_5(%arg0: i32) -> (i32, i32) {
    %c0_i32 = arith.constant 0 : i32
    %c0_i32_0 = arith.constant 0 : i32
    %c0_i32_1 = arith.constant 0 : i32
    return %c0_i32, %c0_i32_0 : i32, i32
  }
  func.func @transform_6(%arg0: i32) -> (i32, i32) {
    %c0_i32 = arith.constant 0 : i32
    %c0_i32_0 = arith.constant 0 : i32
    %c0_i32_1 = arith.constant 0 : i32
    return %c0_i32, %c0_i32_0 : i32, i32
  }
  func.func @transform_7(%arg0: i32) -> (i32, i32) {
    %c0_i32 = arith.constant 0 : i32
    %c0_i32_0 = arith.constant 0 : i32
    %c0_i32_1 = arith.constant 0 : i32
    return %c0_i32, %c0_i32_0 : i32, i32
  }
  func.func @transform_8(%arg0: i32) -> (i32, i32) {
    %c0_i32 = arith.constant 0 : i32
    %c0_i32_0 = arith.constant 0 : i32
    %c0_i32_1 = arith.constant 0 : i32
    return %c0_i32, %c0_i32_0 : i32, i32
  }
  func.func @transform_9(%arg0: i32) -> (i32, i32) {
    %c0_i32 = arith.constant 0 : i32
    %c0_i32_0 = arith.constant 0 : i32
    return %arg0, %c0_i32 : i32, i32
  }
}

module attributes {stable_mosaic.version = 11 : i64} {
  func.func @_mlp_kernel(%arg0: i32, %arg1: memref<32x3072xf32, #tpu.memory_space<vmem>>, %arg2: memref<3072x64xf32, #tpu.memory_space<vmem>>, %arg3: memref<1x64xf32, #tpu.memory_space<vmem>>, %arg4: memref<64x32xf32, #tpu.memory_space<vmem>>, %arg5: memref<1x32xf32, #tpu.memory_space<vmem>>, %arg6: memref<32x16xf32, #tpu.memory_space<vmem>>, %arg7: memref<1x16xf32, #tpu.memory_space<vmem>>, %arg8: memref<16x128xf32, #tpu.memory_space<vmem>>, %arg9: memref<1x128xf32, #tpu.memory_space<vmem>>, %arg10: memref<32x128xf32, #tpu.memory_space<vmem>>) attributes {dimension_semantics = [#tpu.dimension_semantics<parallel>], iteration_bounds = array<i64: 2>, scalar_prefetch = 0 : i64, scratch_operands = 0 : i64, tpu.core_type = #tpu.core_type<tc>, window_params = [{transform_indices = @transform_0, window_bounds = array<i64: 32, 3072>}, {pipeline_mode = #tpu.pipeline_mode<synchronous>, transform_indices = @transform_1, window_bounds = array<i64: 3072, 64>}, {pipeline_mode = #tpu.pipeline_mode<synchronous>, transform_indices = @transform_2, window_bounds = array<i64: 1, 64>}, {pipeline_mode = #tpu.pipeline_mode<synchronous>, transform_indices = @transform_3, window_bounds = array<i64: 64, 32>}, {pipeline_mode = #tpu.pipeline_mode<synchronous>, transform_indices = @transform_4, window_bounds = array<i64: 1, 32>}, {pipeline_mode = #tpu.pipeline_mode<synchronous>, transform_indices = @transform_5, window_bounds = array<i64: 32, 16>}, {pipeline_mode = #tpu.pipeline_mode<synchronous>, transform_indices = @transform_6, window_bounds = array<i64: 1, 16>}, {pipeline_mode = #tpu.pipeline_mode<synchronous>, transform_indices = @transform_7, window_bounds = array<i64: 16, 128>}, {pipeline_mode = #tpu.pipeline_mode<synchronous>, transform_indices = @transform_8, window_bounds = array<i64: 1, 128>}, {transform_indices = @transform_9, window_bounds = array<i64: 32, 128>}]} {
    %c0 = arith.constant 0 : index
    %c0_0 = arith.constant 0 : index
    %0 = vector.load %arg1[%c0, %c0_0] : memref<32x3072xf32, #tpu.memory_space<vmem>>, vector<32x3072xf32>
    %c0_1 = arith.constant 0 : index
    %c0_2 = arith.constant 0 : index
    %1 = vector.load %arg2[%c0_1, %c0_2] : memref<3072x64xf32, #tpu.memory_space<vmem>>, vector<3072x64xf32>
    %cst = arith.constant dense<0.000000e+00> : vector<32x64xf32>
    %2 = tpu.matmul %0, %1, %cst {dimension_numbers = #tpu.dot_dimension_numbers<[1], [0], [0], [1], [0, 0, 1, 1], [], []>} : vector<32x3072xf32>, vector<3072x64xf32>, vector<32x64xf32> -> vector<32x64xf32>
    %c0_3 = arith.constant 0 : index
    %c0_4 = arith.constant 0 : index
    %3 = vector.load %arg3[%c0_3, %c0_4] : memref<1x64xf32, #tpu.memory_space<vmem>>, vector<1x64xf32>
    %4 = vector.broadcast %3 : vector<1x64xf32> to vector<32x64xf32>
    %5 = arith.addf %2, %4 : vector<32x64xf32>
    %cst_5 = arith.constant 0.000000e+00 : f32
    %6 = vector.broadcast %cst_5 : f32 to vector<32x64xf32>
    %7 = arith.maximumf %5, %6 : vector<32x64xf32>
    %c0_6 = arith.constant 0 : index
    %c0_7 = arith.constant 0 : index
    %8 = vector.load %arg4[%c0_6, %c0_7] : memref<64x32xf32, #tpu.memory_space<vmem>>, vector<64x32xf32>
    %cst_8 = arith.constant dense<0.000000e+00> : vector<32x32xf32>
    %9 = tpu.matmul %7, %8, %cst_8 {dimension_numbers = #tpu.dot_dimension_numbers<[1], [0], [0], [1], [0, 0, 1, 1], [], []>} : vector<32x64xf32>, vector<64x32xf32>, vector<32x32xf32> -> vector<32x32xf32>
    %c0_9 = arith.constant 0 : index
    %c0_10 = arith.constant 0 : index
    %10 = vector.load %arg5[%c0_9, %c0_10] : memref<1x32xf32, #tpu.memory_space<vmem>>, vector<1x32xf32>
    %11 = vector.broadcast %10 : vector<1x32xf32> to vector<32x32xf32>
    %12 = arith.addf %9, %11 : vector<32x32xf32>
    %cst_11 = arith.constant 0.000000e+00 : f32
    %13 = vector.broadcast %cst_11 : f32 to vector<32x32xf32>
    %14 = arith.maximumf %12, %13 : vector<32x32xf32>
    %c0_12 = arith.constant 0 : index
    %c0_13 = arith.constant 0 : index
    %15 = vector.load %arg6[%c0_12, %c0_13] : memref<32x16xf32, #tpu.memory_space<vmem>>, vector<32x16xf32>
    %cst_14 = arith.constant dense<0.000000e+00> : vector<32x16xf32>
    %16 = tpu.matmul %14, %15, %cst_14 {dimension_numbers = #tpu.dot_dimension_numbers<[1], [0], [0], [1], [0, 0, 1, 1], [], []>} : vector<32x32xf32>, vector<32x16xf32>, vector<32x16xf32> -> vector<32x16xf32>
    %c0_15 = arith.constant 0 : index
    %c0_16 = arith.constant 0 : index
    %17 = vector.load %arg7[%c0_15, %c0_16] : memref<1x16xf32, #tpu.memory_space<vmem>>, vector<1x16xf32>
    %18 = vector.broadcast %17 : vector<1x16xf32> to vector<32x16xf32>
    %19 = arith.addf %16, %18 : vector<32x16xf32>
    %cst_17 = arith.constant 0.000000e+00 : f32
    %20 = vector.broadcast %cst_17 : f32 to vector<32x16xf32>
    %21 = arith.maximumf %19, %20 : vector<32x16xf32>
    %c0_18 = arith.constant 0 : index
    %c0_19 = arith.constant 0 : index
    %22 = vector.load %arg8[%c0_18, %c0_19] : memref<16x128xf32, #tpu.memory_space<vmem>>, vector<16x128xf32>
    %cst_20 = arith.constant dense<0.000000e+00> : vector<32x128xf32>
    %23 = tpu.matmul %21, %22, %cst_20 {dimension_numbers = #tpu.dot_dimension_numbers<[1], [0], [0], [1], [0, 0, 1, 1], [], []>} : vector<32x16xf32>, vector<16x128xf32>, vector<32x128xf32> -> vector<32x128xf32>
    %c0_21 = arith.constant 0 : index
    %c0_22 = arith.constant 0 : index
    %24 = vector.load %arg9[%c0_21, %c0_22] : memref<1x128xf32, #tpu.memory_space<vmem>>, vector<1x128xf32>
    %25 = vector.broadcast %24 : vector<1x128xf32> to vector<32x128xf32>
    %26 = arith.addf %23, %25 : vector<32x128xf32>
    %c0_23 = arith.constant 0 : index
    %c0_24 = arith.constant 0 : index
    %27 = vector.load %arg10[%c0_23, %c0_24] : memref<32x128xf32, #tpu.memory_space<vmem>>, vector<32x128xf32>
    tpu.vector_store %arg10[%c0_23, %c0_24], %26 {strides = array<i32>} : memref<32x128xf32, #tpu.memory_space<vmem>>, vector<32x128xf32>,
    return
  }
  func.func @transform_0(%arg0: i32) -> (i32, i32) {
    %c0_i32 = arith.constant 0 : i32
    %c0_i32_0 = arith.constant 0 : i32
    return %arg0, %c0_i32 : i32, i32
  }
  func.func @transform_1(%arg0: i32) -> (i32, i32) {
    %c0_i32 = arith.constant 0 : i32
    %c0_i32_0 = arith.constant 0 : i32
    %c0_i32_1 = arith.constant 0 : i32
    return %c0_i32, %c0_i32_0 : i32, i32
  }
  func.func @transform_2(%arg0: i32) -> (i32, i32) {
    %c0_i32 = arith.constant 0 : i32
    %c0_i32_0 = arith.constant 0 : i32
    %c0_i32_1 = arith.constant 0 : i32
    return %c0_i32, %c0_i32_0 : i32, i32
  }
  func.func @transform_3(%arg0: i32) -> (i32, i32) {
    %c0_i32 = arith.constant 0 : i32
    %c0_i32_0 = arith.constant 0 : i32
    %c0_i32_1 = arith.constant 0 : i32
    return %c0_i32, %c0_i32_0 : i32, i32
  }
  func.func @transform_4(%arg0: i32) -> (i32, i32) {
    %c0_i32 = arith.constant 0 : i32
    %c0_i32_0 = arith.constant 0 : i32
    %c0_i32_1 = arith.constant 0 : i32
    return %c0_i32, %c0_i32_0 : i32, i32
  }
  func.func @transform_5(%arg0: i32) -> (i32, i32) {
    %c0_i32 = arith.constant 0 : i32
    %c0_i32_0 = arith.constant 0 : i32
    %c0_i32_1 = arith.constant 0 : i32
    return %c0_i32, %c0_i32_0 : i32, i32
  }
  func.func @transform_6(%arg0: i32) -> (i32, i32) {
    %c0_i32 = arith.constant 0 : i32
    %c0_i32_0 = arith.constant 0 : i32
    %c0_i32_1 = arith.constant 0 : i32
    return %c0_i32, %c0_i32_0 : i32, i32
  }
  func.func @transform_7(%arg0: i32) -> (i32, i32) {
    %c0_i32 = arith.constant 0 : i32
    %c0_i32_0 = arith.constant 0 : i32
    %c0_i32_1 = arith.constant 0 : i32
    return %c0_i32, %c0_i32_0 : i32, i32
  }
  func.func @transform_8(%arg0: i32) -> (i32, i32) {
    %c0_i32 = arith.constant 0 : i32
    %c0_i32_0 = arith.constant 0 : i32
    %c0_i32_1 = arith.constant 0 : i32
    return %c0_i32, %c0_i32_0 : i32, i32
  }
  func.func @transform_9(%arg0: i32) -> (i32, i32) {
    %c0_i32 = arith.constant 0 : i32
    %c0_i32_0 = arith.constant 0 : i32
    return %arg0, %c0_i32 : i32, i32
  }
}

</mosaic_0001>

<bundles_post_ra>
// kernel: tpu_custom_call.1
= control target key start
LH: loop header
LB: loop body
LE: loop exit
PB: predicated region body
PF: predicated region fallthrough
CT: control target
= control target key end

     0   :  { %14 = vsyncpa [#allocation3], 0  ;;  %s4890_s0 = inlined_call_operand.vmem [shape: f32[64,3072], index: 0, kind: input, shape index: {}]   ;;  %s4891_s1 = inlined_call_operand.vmem [shape: f32[3072,64], index: 1, kind: input, shape index: {}]   ;;  %s4892_s2 = inlined_call_operand.vmem [shape: f32[1,64], index: 2, kind: input, shape index: {}]   ;;  %s4893_s3 = inlined_call_operand.vmem [shape: f32[64,32], index: 3, kind: input, shape index: {}]   ;;  %s4894_s4 = inlined_call_operand.vmem [shape: f32[1,32], index: 4, kind: input, shape index: {}]   ;;  %s4895_s5 = inlined_call_operand.vmem [shape: f32[32,16], index: 5, kind: input, shape index: {}]   ;;  %s4896_s6 = inlined_call_operand.vmem [shape: f32[1,16], index: 6, kind: input, shape index: {}]   ;;  %s4897_s7 = inlined_call_operand.vmem [shape: f32[16,128], index: 7, kind: input, shape index: {}]   ;;  %s4898_s8 = inlined_call_operand.vmem [shape: f32[1,128], index: 8, kind: input, shape index: {}]   ;;  %s4899_s9 = inlined_call_operand.hbm [shape: f32[64,128], index: 9, kind: output, shape index: {}]  }
   0x1   :  { %16 = vsyncpa [#allocation3 + $0x1], 0  ;;  %s3467_s30 = smov 0   ;;  %s3469_s10 = smov 0  }
   0x2   :  { %s3471_s11 = smov 0   ;;  %s3473_s12 = smov 0  }
   0x3 LB: > { %s3488_s13 = sadd.s32 4294967295, %s3412_s12   ;;  %s2265_s14 = sadd.s32 4294967294, %s3412_s12   ;;  %s3412_s12 = sphi %s3473_s12, %s4906_s12   ;;  %s3408_s11 = sphi %s3471_s11, %s4905_s11   ;;  %s3404_s10 = sphi %s3469_s10, %s4904_s10   ;;  %s3400_s30 = sphi %s3467_s30, %s4903_s30  }
   0x4   : > { %s3492_s15 = sadd.s32 1, %s3412_s12   ;;  %s223_s16 = sadd.s32 1, %s3408_s11 }
   0x5   : > { %s220_s17 = ssub.s32 %s3412_s12, %s3492_s15  ;;  %p233_p0 = scmp.ne.s32.totalorder %s3408_s11, %s3404_s10 }
   0x6   : > { %p221_p1 = scmp.eq.s32.totalorder %s220_s17, 0  ;;  %p234_p2 = scmp.eq.s32.totalorder %s3488_s13, 1 }
   0x7   : > { %p239_p3 = scmp.ne.s32.totalorder %s3404_s10, %s3400_s30  ;;  %p240_p4 = scmp.eq.s32.totalorder %s2265_s14, 1 }
   0x8   : > { %s3503_s18 = scalar_select %p221_p1, %s3408_s11, %s223_s16  }
   0x9   : > { %p3505_p5 = por %p234_p2, %p233_p0  ;;  %p3509_p6 = por %p240_p4, %p239_p3 }
   0xa   : > { %p2268_p7 = scmp.ge.s32.totalorder %s3412_s12, 1  ;;  %p292_p8 = scmp.lt.s32.totalorder %s3412_s12, 3 }
   0xc   : > { %p293_p9 = pnand %p2268_p7, %p292_p8 }
   0xd   : > { %v449_v0 = vld [vmem:[%s4891_s1 + $0x80] sm:$0xff] (!%p293_p9)  ;;  %v450_v1 = vld [vmem:[%s4891_s1 + $0x88] sm:$0xff] (!%p293_p9)  ;;  %v451_v11 = vld [vmem:[%s4891_s1 + $0x90] sm:$0xff] (!%p293_p9)  ;;  %s2270_s21 = sshll.u32 (!%p293_p9), %s3488_s13, 2  ;;  %vm1863_vm0 = vcmask (!%p293_p9), 523264   ;;  %vm1976_vm1 = vcmask (!%p293_p9), 261120  }
   0xe   : > { %296 = sbr.rel (%p293_p9) target bundleno = 1107 (0x453), region = 56  ;;  %v433_v2 = vld [vmem:[%s4891_s1] sm:$0xff] (!%p293_p9)  ;;  %v2894_v3 = vpack.c.bf16 (!%p293_p9), %v450_v1, %v449_v0  ;;  %v434_v4 = vld [vmem:[%s4891_s1 + $0x8] sm:$0xff] (!%p293_p9)  ;;  %v452_v13 = vld [vmem:[%s4891_s1 + $0x98] sm:$0xff] (!%p293_p9)  ;;  %p3581_p10 = scmp.lt.s32.totalorder (!%p293_p9), %s2270_s21, 7  ;;  %vm2087_vm2 = vcmask (!%p293_p9), 130048  }
   0xf   : > { %v481_v5 = vld [vmem:[%s4891_s1 + $0x180] sm:$0xff] (!%p293_p9)  ;;  %v482_v6 = vld [vmem:[%s4891_s1 + $0x188] sm:$0xff] (!%p293_p9)  ;;  %v2896_v7 = vpack.c.bf16 (!%p293_p9), %v434_v4, %v433_v2  ;;  %v435_v14 = vld [vmem:[%s4891_s1 + $0x10] sm:$0xff] (!%p293_p9)  ;;  %v2898_v16 = vpack.c.bf16 (!%p293_p9), %v452_v13, %v451_v11  ;;  %s326_s23 = sand.u32 (!%p293_p9), 1, %s3404_s10   ;;  %s2293_s27 = sshll.u32 (!%p293_p9), %s3488_s13, 9 }
  0x10   : > { %v2926_v8 = vpack.c.bf16 (!%p293_p9), %v482_v6, %v481_v5  ;;  %v465_v9 = vld [vmem:[%s4891_s1 + $0x100] sm:$0xff] (!%p293_p9)  ;;  %v466_v10 = vld [vmem:[%s4891_s1 + $0x108] sm:$0xff] (!%p293_p9)  ;;  %2895 = vmatprep.subr.bf16.mxu0 (!%p293_p9), %v2894_v3  ;;  %v436_v15 = vld [vmem:[%s4891_s1 + $0x18] sm:$0xff] (!%p293_p9)  ;;  %s2269_s24 = sshll.u32 (!%p293_p9), %s326_s23, 5  ;;  %s4847_s16 = scalar_lea.hbm (!%p293_p9), %s4899_s9, %s2293_s27 }
  0x11   : > { %v2928_v12 = vpack.c.bf16 (!%p293_p9), %v466_v10, %v465_v9  ;;  %2897 = vmatpush3.bf16.msra.mxu0 (!%p293_p9), %v2896_v7  ;;  %v2900_v17 = vpack.c.bf16 (!%p293_p9), %v436_v15, %v435_v14  ;;  %v483_v18 = vld [vmem:[%s4891_s1 + $0x190] sm:$0xff] (!%p293_p9)  ;;  %v484_v19 = vld [vmem:[%s4891_s1 + $0x198] sm:$0xff] (!%p293_p9)  ;;  %v453_v23 = vld [vmem:[%s4891_s1 + $0xa0] sm:$0xff] (!%p293_p9)  ;;  %s4849_s17 = scalar_lea.sflag (!%p293_p9), [#allocation3], %s326_s23  ;;  %s3414_s13 = smov (!%p293_p9), [#allocation2]  }
  0x12   : > { %2927 = vmatprep.subr.bf16.mxu1 (!%p293_p9), %v2926_v8  ;;  %v467_v20 = vld [vmem:[%s4891_s1 + $0x110] sm:$0xff] (!%p293_p9)  ;;  %v2930_v21 = vpack.c.bf16 (!%p293_p9), %v484_v19, %v483_v18  ;;  %v468_v22 = vld [vmem:[%s4891_s1 + $0x118] sm:$0xff] (!%p293_p9)  ;;  %v454_v24 = vld [vmem:[%s4891_s1 + $0xa8] sm:$0xff] (!%p293_p9)  ;;  %2899 = vmatprep.subr.bf16.mxu0 (!%p293_p9), %v2898_v16 }
  0x13   : > { %2929 = vmatpush3.bf16.msra.mxu1 (!%p293_p9), %v2928_v12  ;;  %v2932_v25 = vpack.c.bf16 (!%p293_p9), %v468_v22, %v467_v20  ;;  %v2902_v26 = vpack.c.bf16 (!%p293_p9), %v454_v24, %v453_v23  ;;  %v437_v27 = vld [vmem:[%s4891_s1 + $0x20] sm:$0xff] (!%p293_p9)  ;;  %v438_v28 = vld [vmem:[%s4891_s1 + $0x28] sm:$0xff] (!%p293_p9)  ;;  %v455_v35 = vld [vmem:[%s4891_s1 + $0xb0] sm:$0xff] (!%p293_p9) }
  0x14   : > { %v485_v29 = vld [vmem:[%s4891_s1 + $0x1a0] sm:$0xff] (!%p293_p9)  ;;  %2931 = vmatprep.subr.bf16.mxu1 (!%p293_p9), %v2930_v21  ;;  %v486_v30 = vld [vmem:[%s4891_s1 + $0x1a8] sm:$0xff] (!%p293_p9)  ;;  %v2904_v33 = vpack.c.bf16 (!%p293_p9), %v438_v28, %v437_v27  ;;  %v456_v36 = vld [vmem:[%s4891_s1 + $0xb8] sm:$0xff] (!%p293_p9) }
  0x15   : > { %v469_v31 = vld [vmem:[%s4891_s1 + $0x120] sm:$0xff]  ;;  %v470_v32 = vld [vmem:[%s4891_s1 + $0x128] sm:$0xff]  ;;  %2901 = vmatpush3.bf16.msra.mxu0 %v2900_v17  ;;  %v2934_v34 = vpack.c.bf16 %v486_v30, %v485_v29  ;;  %v439_v37 = vld [vmem:[%s4891_s1 + $0x30] sm:$0xff]  ;;  %v2906_v39 = vpack.c.bf16 %v456_v36, %v455_v35  ;;  %s4908_s21 = smov (!%p3581_p10, %s2270_s21), 7 }
  0x16   : > { %2903 = vmatprep.subr.bf16.mxu0 %v2902_v26  ;;  %v2936_v38 = vpack.c.bf16 %v470_v32, %v469_v31  ;;  %v440_v40 = vld [vmem:[%s4891_s1 + $0x38] sm:$0xff]  ;;  %v487_v41 = vld [vmem:[%s4891_s1 + $0x1b0] sm:$0xff]  ;;  %v457_v46 = vld [vmem:[%s4891_s1 + $0xc0] sm:$0xff]  ;;  %s3308_s14 = smul.u32 192, %s4908_s21 }
  0x17   : > { %2933 = vmatpush3.bf16.msra.mxu1 %v2932_v25  ;;  %v488_v42 = vld [vmem:[%s4891_s1 + $0x1b8] sm:$0xff]  ;;  %v471_v44 = vld [vmem:[%s4891_s1 + $0x130] sm:$0xff]  ;;  %v458_v47 = vld [vmem:[%s4891_s1 + $0xc8] sm:$0xff]  ;;  %v2908_v48 = vpack.c.bf16 %v440_v40, %v439_v37 }
  0x18   : > { %2935 = vmatprep.subr.bf16.mxu1 %v2934_v34  ;;  %v2938_v43 = vpack.c.bf16 %v488_v42, %v487_v41  ;;  %v472_v45 = vld [vmem:[%s4891_s1 + $0x138] sm:$0xff]  ;;  %v489_v49 = vld [vmem:[%s4891_s1 + $0x1c0] sm:$0xff]  ;;  %v490_v50 = vld [vmem:[%s4891_s1 + $0x1c8] sm:$0xff]  ;;  %v2910_v52 = vpack.c.bf16 %v458_v47, %v457_v46  ;;  %s3682_s21 = scalar_lea.vmem %s4890_s0, %s3308_s14 }
  0x19   : > { %2905 = vmatpush3.bf16.msra.mxu0 %v2904_v33  ;;  %v2940_v51 = vpack.c.bf16 %v472_v45, %v471_v44  ;;  %v441_v53 = vld [vmem:[%s4891_s1 + $0x40] sm:$0xff]  ;;  %v442_v54 = vld [vmem:[%s4891_s1 + $0x48] sm:$0xff]  ;;  %v2942_v56 = vpack.c.bf16 %v490_v50, %v489_v49  ;;  %v459_v58 = vld [vmem:[%s4891_s1 + $0xd0] sm:$0xff] }
  0x1a   : > { %2907 = vmatprep.subr.bf16.mxu0 %v2906_v39  ;;  %v473_v55 = vld [vmem:[%s4891_s1 + $0x140] sm:$0xff]  ;;  %v474_v57 = vld [vmem:[%s4891_s1 + $0x148] sm:$0xff]  ;;  %v460_v59 = vld [vmem:[%s4891_s1 + $0xd8] sm:$0xff]  ;;  %v2912_v62 = vpack.c.bf16 %v442_v54, %v441_v53 }
  0x1b   : > { %2937 = vmatpush3.bf16.msra.mxu1 %v2936_v38  ;;  %v491_v60 = vld [vmem:[%s4891_s1 + $0x1d0] sm:$0xff]  ;;  %v492_v61 = vld [vmem:[%s4891_s1 + $0x1d8] sm:$0xff]  ;;  %v2944_v63 = vpack.c.bf16 %v474_v57, %v473_v55  ;;  %v2914_v0 = vpack.c.bf16 %v460_v59, %v459_v58  ;;  %v461_v6 = vld [vmem:[%s4891_s1 + $0xe0] sm:$0xff] }
  0x1c   : > { %2939 = vmatprep.subr.bf16.mxu1 %v2938_v43  ;;  %v443_v1 = vld [vmem:[%s4891_s1 + $0x50] sm:$0xff]  ;;  %v444_v2 = vld [vmem:[%s4891_s1 + $0x58] sm:$0xff]  ;;  %v2946_v4 = vpack.c.bf16 %v492_v61, %v491_v60  ;;  %v462_v7 = vld [vmem:[%s4891_s1 + $0xe8] sm:$0xff] }
  0x1d   : > { %2909 = vmatpush3.bf16.msra.mxu0 %v2908_v48  ;;  %v475_v3 = vld [vmem:[%s4891_s1 + $0x150] sm:$0xff]  ;;  %v476_v5 = vld [vmem:[%s4891_s1 + $0x158] sm:$0xff]  ;;  %v493_v8 = vld [vmem:[%s4891_s1 + $0x1e0] sm:$0xff]  ;;  %v2916_v10 = vpack.c.bf16 %v444_v2, %v443_v1  ;;  %v2918_v14 = vpack.c.bf16 %v462_v7, %v461_v6 }
  0x1e   : > { %2911 = vmatprep.subr.bf16.mxu0 %v2910_v52  ;;  %v494_v9 = vld [vmem:[%s4891_s1 + $0x1e8] sm:$0xff]  ;;  %v445_v11 = vld [vmem:[%s4891_s1 + $0x60] sm:$0xff]  ;;  %v2948_v13 = vpack.c.bf16 %v476_v5, %v475_v3  ;;  %v463_v19 = vld [vmem:[%s4891_s1 + $0xf0] sm:$0xff] }
  0x1f   : > { %2941 = vmatpush3.bf16.msra.mxu1 %v2940_v51  ;;  %v446_v12 = vld [vmem:[%s4891_s1 + $0x68] sm:$0xff]  ;;  %v477_v15 = vld [vmem:[%s4891_s1 + $0x160] sm:$0xff]  ;;  %v2950_v18 = vpack.c.bf16 %v494_v9, %v493_v8  ;;  %v464_v20 = vld [vmem:[%s4891_s1 + $0xf8] sm:$0xff] }
  0x20   : > { %2943 = vmatprep.subr.bf16.mxu1 %v2942_v56  ;;  %v478_v16 = vld [vmem:[%s4891_s1 + $0x168] sm:$0xff]  ;;  %v340_v21 = vld [vmem:[%s3682_s21 + $0x18] sm:$0xff]  ;;  %v495_v22 = vld [vmem:[%s4891_s1 + $0x1f0] sm:$0xff]  ;;  %v2920_v24 = vpack.c.bf16 %v446_v12, %v445_v11  ;;  %v2922_v26 = vpack.c.bf16 %v464_v20, %v463_v19 }
  0x21   : > { %2913 = vmatpush3.bf16.msra.mxu0 %v2912_v62  ;;  %v338_v17 = vld [vmem:[%s3682_s21 + $0x8] sm:$0xff]  ;;  %v496_v23 = vld [vmem:[%s4891_s1 + $0x1f8] sm:$0xff]  ;;  %973 = vmatprep.mubr.f32.mxu1 %v340_v21  ;;  %v2952_v25 = vpack.c.bf16 %v478_v16, %v477_v15  ;;  %v447_v27 = vld [vmem:[%s4891_s1 + $0x70] sm:$0xff] }
  0x22   : > { %2915 = vmatprep.subr.bf16.mxu0 %v2914_v0  ;;  %888 = vmatprep.mubr.f32.mxu0 %v338_v17  ;;  %v448_v28 = vld [vmem:[%s4891_s1 + $0x78] sm:$0xff]  ;;  %v479_v29 = vld [vmem:[%s4891_s1 + $0x170] sm:$0xff]  ;;  %v2954_v30 = vpack.c.bf16 %v496_v23, %v495_v22  ;;  %v513_v32 = vld [vmem:[%s4891_s1 + $0x280] sm:$0xff] }
  0x23   : > { %2945 = vmatpush3.bf16.msra.mxu1 %v2944_v63  ;;  %v480_v31 = vld [vmem:[%s4891_s1 + $0x178] sm:$0xff]  ;;  %v514_v33 = vld [vmem:[%s4891_s1 + $0x288] sm:$0xff]  ;;  %v545_v34 = vld [vmem:[%s4891_s1 + $0x380] sm:$0xff]  ;;  %v2924_v36 = vpack.c.bf16 %v448_v28, %v447_v27 }
  0x24   : > { %2947 = vmatprep.subr.bf16.mxu1 %v2946_v4  ;;  %v546_v35 = vld [vmem:[%s4891_s1 + $0x388] sm:$0xff]  ;;  %v2956_v37 = vpack.c.bf16 %v480_v31, %v479_v29  ;;  %v2958_v38 = vpack.c.bf16 %v514_v33, %v513_v32  ;;  %v497_v39 = vld [vmem:[%s4891_s1 + $0x200] sm:$0xff]  ;;  %v515_v44 = vld [vmem:[%s4891_s1 + $0x290] sm:$0xff] }
  0x25   : > { %2917 = vmatpush3.bf16.msra.mxu0 %v2916_v10  ;;  %v498_v40 = vld [vmem:[%s4891_s1 + $0x208] sm:$0xff]  ;;  %v529_v41 = vld [vmem:[%s4891_s1 + $0x300] sm:$0xff]  ;;  %v2990_v42 = vpack.c.bf16 %v546_v35, %v545_v34  ;;  %v516_v45 = vld [vmem:[%s4891_s1 + $0x298] sm:$0xff] }
  0x26   : > { %2919 = vmatprep.subr.bf16.mxu0 %v2918_v14  ;;  %v530_v43 = vld [vmem:[%s4891_s1 + $0x308] sm:$0xff]  ;;  %v547_v46 = vld [vmem:[%s4891_s1 + $0x390] sm:$0xff]  ;;  %v548_v47 = vld [vmem:[%s4891_s1 + $0x398] sm:$0xff]  ;;  %v2960_v49 = vpack.c.bf16 %v498_v40, %v497_v39  ;;  %v2962_v52 = vpack.c.bf16 %v516_v45, %v515_v44 }
  0x27   : > { %2949 = vmatpush3.bf16.msra.mxu1 %v2948_v13  ;;  %v337_v48 = vld [vmem:[%s3682_s21] sm:$0xff]  ;;  %v339_v50 = vld [vmem:[%s3682_s21 + $0x10] sm:$0xff]  ;;  %v2992_v51 = vpack.c.bf16 %v530_v43, %v529_v41  ;;  %v500_v54 = vld [vmem:[%s4891_s1 + $0x218] sm:$0xff]  ;;  %v2994_v56 = vpack.c.bf16 %v548_v47, %v547_v46 }
  0x28   : > { %2951 = vmatprep.subr.bf16.mxu1 %v2950_v18  ;;  %v499_v53 = vld [vmem:[%s4891_s1 + $0x210] sm:$0xff]  ;;  %v532_v57 = vld [vmem:[%s4891_s1 + $0x318] sm:$0xff]  ;;  %v517_v58 = vld [vmem:[%s4891_s1 + $0x2a0] sm:$0xff] }
  0x29   : > { %2921 = vmatpush3.bf16.msra.mxu0 %v2920_v24  ;;  %v531_v55 = vld [vmem:[%s4891_s1 + $0x310] sm:$0xff]  ;;  %v518_v59 = vld [vmem:[%s4891_s1 + $0x2a8] sm:$0xff]  ;;  %v549_v60 = vld [vmem:[%s4891_s1 + $0x3a0] sm:$0xff]  ;;  %v2964_v62 = vpack.c.bf16 %v500_v54, %v499_v53 }
  0x2a   : > { %2923 = vmatprep.subr.bf16.mxu0 %v2922_v26  ;;  %v550_v61 = vld [vmem:[%s4891_s1 + $0x3a8] sm:$0xff]  ;;  %v501_v63 = vld [vmem:[%s4891_s1 + $0x220] sm:$0xff]  ;;  %v2996_v2 = vpack.c.bf16 %v532_v57, %v531_v55  ;;  %v2966_v3 = vpack.c.bf16 %v518_v59, %v517_v58  ;;  %v364_v6 = vld [vmem:[%s3682_s21 + $0xd8] sm:$0xff] }
  0x2b   : > { %2953 = vmatpush3.bf16.msra.mxu1 %v2952_v25  ;;  %v362_v0 = vld [vmem:[%s3682_s21 + $0xc8] sm:$0xff]  ;;  %v361_v1 = vld [vmem:[%s3682_s21 + $0xc0] sm:$0xff]  ;;  %v2998_v7 = vpack.c.bf16 %v550_v61, %v549_v60  ;;  %v519_v9 = vld [vmem:[%s4891_s1 + $0x2b0] sm:$0xff] }
  0x2c   : > { %2955 = vmatprep.subr.bf16.mxu1 %v2954_v30  ;;  %v502_v4 = vld [vmem:[%s4891_s1 + $0x228] sm:$0xff]  ;;  %v533_v5 = vld [vmem:[%s4891_s1 + $0x320] sm:$0xff]  ;;  %v520_v10 = vld [vmem:[%s4891_s1 + $0x2b8] sm:$0xff] }
  0x2d   : > { %2925 = vmatpush3.bf16.msra.mxu0 %v2924_v36  ;;  %v534_v8 = vld [vmem:[%s4891_s1 + $0x328] sm:$0xff]  ;;  %v551_v11 = vld [vmem:[%s4891_s1 + $0x3b0] sm:$0xff]  ;;  %v552_v12 = vld [vmem:[%s4891_s1 + $0x3b8] sm:$0xff]  ;;  %v2968_v14 = vpack.c.bf16 %v502_v4, %v501_v63  ;;  %v2970_v19 = vpack.c.bf16 %v520_v10, %v519_v9 }
  0x2e   : > { %2959 = vmatprep.subr.bf16.mxu0 %v2958_v38  ;;  %v363_v13 = vld [vmem:[%s3682_s21 + $0xd0] sm:$0xff]  ;;  %v386_v16 = vld [vmem:[%s3682_s21 + $0x188] sm:$0xff]  ;;  %v385_v17 = vld [vmem:[%s3682_s21 + $0x180] sm:$0xff]  ;;  %v3000_v18 = vpack.c.bf16 %v534_v8, %v533_v5  ;;  %v3002_v23 = vpack.c.bf16 %v552_v12, %v551_v11 }
  0x2f   : > { %2957 = vmatpush3.bf16.msra.mxu1 %v2956_v37  ;;  %v503_v15 = vld [vmem:[%s4891_s1 + $0x230] sm:$0xff]  ;;  %v504_v20 = vld [vmem:[%s4891_s1 + $0x238] sm:$0xff]  ;;  %v521_v25 = vld [vmem:[%s4891_s1 + $0x2c0] sm:$0xff] }
  0x30   : > { %2991 = vmatprep.subr.bf16.mxu1 %v2990_v42  ;;  %889 = vmatmul.mubr.f32.vlgmr.msra.gmra.mrb[0].mxu0 %v337_v48  ;;  %v535_v21 = vld [vmem:[%s4891_s1 + $0x330] sm:$0xff]  ;;  %v388_v22 = vld [vmem:[%s3682_s21 + $0x198] sm:$0xff]  ;;  %v522_v26 = vld [vmem:[%s4891_s1 + $0x2c8] sm:$0xff]  ;;  %v2972_v30 = vpack.c.bf16 %v504_v20, %v503_v15 }
  0x31   : > { %2961 = vmatpush3.bf16.msra.mxu0 %v2960_v49  ;;  %893 = vmatprep.mubr.f32.mxu0 %v362_v0  ;;  %v536_v24 = vld [vmem:[%s4891_s1 + $0x338] sm:$0xff]  ;;  %v553_v27 = vld [vmem:[%s4891_s1 + $0x3c0] sm:$0xff]  ;;  %v554_v28 = vld [vmem:[%s4891_s1 + $0x3c8] sm:$0xff]  ;;  %v2974_v35 = vpack.c.bf16 %v522_v26, %v521_v25 }
  0x32   : > { %974 = vmatmul.mubr.f32.vlgmr.msra.gmra.mrb[0].mxu1 %v339_v50  ;;  %2963 = vmatprep.subr.bf16.mxu0 %v2962_v52  ;;  %v387_v29 = vld [vmem:[%s3682_s21 + $0x190] sm:$0xff]  ;;  %v505_v31 = vld [vmem:[%s4891_s1 + $0x240] sm:$0xff]  ;;  %v410_v32 = vld [vmem:[%s3682_s21 + $0x248] sm:$0xff]  ;;  %v3004_v34 = vpack.c.bf16 %v536_v24, %v535_v21  ;;  %v3006_v39 = vpack.c.bf16 %v554_v28, %v553_v27 }
  0x33   : > { %2993 = vmatpush3.bf16.msra.mxu1 %v2992_v51  ;;  %978 = vmatprep.mubr.f32.mxu1 %v364_v6  ;;  %v409_v33 = vld [vmem:[%s3682_s21 + $0x240] sm:$0xff]  ;;  %v506_v36 = vld [vmem:[%s4891_s1 + $0x248] sm:$0xff]  ;;  %v412_v38 = vld [vmem:[%s3682_s21 + $0x258] sm:$0xff] }
  0x34   : > { %2995 = vmatprep.subr.bf16.mxu1 %v2994_v56  ;;  %894 = vmatmul.mubr.f32.gmra.mrb[2].mxu0 %v361_v1  ;;  %v537_v37 = vld [vmem:[%s4891_s1 + $0x340] sm:$0xff]  ;;  %v538_v40 = vld [vmem:[%s4891_s1 + $0x348] sm:$0xff]  ;;  %v523_v41 = vld [vmem:[%s4891_s1 + $0x2d0] sm:$0xff]  ;;  %v2976_v46 = vpack.c.bf16 %v506_v36, %v505_v31 }
  0x35   : > { %2965 = vmatpush3.bf16.msra.mxu0 %v2964_v62  ;;  %898 = vmatprep.mubr.f32.mxu0 %v386_v16  ;;  %v524_v42 = vld [vmem:[%s4891_s1 + $0x2d8] sm:$0xff]  ;;  %v555_v43 = vld [vmem:[%s4891_s1 + $0x3d0] sm:$0xff]  ;;  %v342_v48 = vld [vmem:[%s3682_s21 + $0x28] sm:$0xff]  ;;  %v3008_v49 = vpack.c.bf16 %v538_v40, %v537_v37 }
  0x36   : > { %979 = vmatmul.mubr.f32.gmra.mrb[2].mxu1 %v363_v13  ;;  %2967 = vmatprep.subr.bf16.mxu0 %v2966_v3  ;;  %v556_v44 = vld [vmem:[%s4891_s1 + $0x3d8] sm:$0xff]  ;;  %v411_v45 = vld [vmem:[%s3682_s21 + $0x250] sm:$0xff]  ;;  %v2978_v50 = vpack.c.bf16 %v524_v42, %v523_v41  ;;  %v525_v56 = vld [vmem:[%s4891_s1 + $0x2e0] sm:$0xff] }
  0x37   : > { %2997 = vmatpush3.bf16.msra.mxu1 %v2996_v2  ;;  %983 = vmatprep.mubr.f32.mxu1 %v388_v22  ;;  %v507_v47 = vld [vmem:[%s4891_s1 + $0x250] sm:$0xff]  ;;  %v508_v51 = vld [vmem:[%s4891_s1 + $0x258] sm:$0xff]  ;;  %v3010_v54 = vpack.c.bf16 %v556_v44, %v555_v43  ;;  %v526_v57 = vld [vmem:[%s4891_s1 + $0x2e8] sm:$0xff] }
  0x38   : > { %2999 = vmatprep.subr.bf16.mxu1 %v2998_v7  ;;  %899 = vmatmul.mubr.f32.gmra.mrb[4].mxu0 %v385_v17  ;;  %v539_v52 = vld [vmem:[%s4891_s1 + $0x350] sm:$0xff]  ;;  %v344_v53 = vld [vmem:[%s3682_s21 + $0x38] sm:$0xff]  ;;  %v557_v58 = vld [vmem:[%s4891_s1 + $0x3e0] sm:$0xff]  ;;  %v2980_v60 = vpack.c.bf16 %v508_v51, %v507_v47  ;;  %v2982_v62 = vpack.c.bf16 %v526_v57, %v525_v56 }
  0x39   : > { %2969 = vmatpush3.bf16.msra.mxu0 %v2968_v14  ;;  %903 = vmatprep.mubr.f32.mxu0 %v410_v32  ;;  %v540_v55 = vld [vmem:[%s4891_s1 + $0x358] sm:$0xff]  ;;  %v558_v59 = vld [vmem:[%s4891_s1 + $0x3e8] sm:$0xff]  ;;  %v509_v63 = vld [vmem:[%s4891_s1 + $0x260] sm:$0xff] }
  0x3a   : > { %984 = vmatmul.mubr.f32.gmra.mrb[4].mxu1 %v387_v29  ;;  %2971 = vmatprep.subr.bf16.mxu0 %v2970_v19  ;;  %v3012_v61 = vpack.c.bf16 %v540_v55, %v539_v52  ;;  %v510_v0 = vld [vmem:[%s4891_s1 + $0x268] sm:$0xff]  ;;  %v541_v1 = vld [vmem:[%s4891_s1 + $0x360] sm:$0xff]  ;;  %v3014_v2 = vpack.c.bf16 %v558_v59, %v557_v58  ;;  %v527_v4 = vld [vmem:[%s4891_s1 + $0x2f0] sm:$0xff] }
  0x3b   : > { %3001 = vmatpush3.bf16.msra.mxu1 %v3000_v18  ;;  %988 = vmatprep.mubr.f32.mxu1 %v412_v38  ;;  %v542_v3 = vld [vmem:[%s4891_s1 + $0x368] sm:$0xff]  ;;  %v528_v5 = vld [vmem:[%s4891_s1 + $0x2f8] sm:$0xff]  ;;  %v559_v6 = vld [vmem:[%s4891_s1 + $0x3f0] sm:$0xff]  ;;  %v2984_v8 = vpack.c.bf16 %v510_v0, %v509_v63 }
  0x3c   : > { %3003 = vmatprep.subr.bf16.mxu1 %v3002_v23  ;;  %904 = vmatmul.mubr.f32.gmra.mrb[6].mxu0 %v409_v33  ;;  %v560_v7 = vld [vmem:[%s4891_s1 + $0x3f8] sm:$0xff]  ;;  %v3016_v9 = vpack.c.bf16 %v542_v3, %v541_v1  ;;  %v2986_v10 = vpack.c.bf16 %v528_v5, %v527_v4  ;;  %v511_v11 = vld [vmem:[%s4891_s1 + $0x270] sm:$0xff]  ;;  %v577_v16 = vld [vmem:[%s4891_s1 + $0x480] sm:$0xff] }
  0x3d   : > { %2973 = vmatpush3.bf16.msra.mxu0 %v2972_v30  ;;  %1058 = vmatprep.mubr.f32.mxu0 %v342_v48  ;;  %v512_v12 = vld [vmem:[%s4891_s1 + $0x278] sm:$0xff]  ;;  %v543_v13 = vld [vmem:[%s4891_s1 + $0x370] sm:$0xff]  ;;  %v3018_v14 = vpack.c.bf16 %v560_v7, %v559_v6  ;;  %v578_v17 = vld [vmem:[%s4891_s1 + $0x488] sm:$0xff] }
  0x3e   : > { %989 = vmatmul.mubr.f32.gmra.mrb[6].mxu1 %v411_v45  ;;  %2975 = vmatprep.subr.bf16.mxu0 %v2974_v35  ;;  %v544_v15 = vld [vmem:[%s4891_s1 + $0x378] sm:$0xff]  ;;  %v609_v18 = vld [vmem:[%s4891_s1 + $0x580] sm:$0xff]  ;;  %v610_v19 = vld [vmem:[%s4891_s1 + $0x588] sm:$0xff]  ;;  %v2988_v20 = vpack.c.bf16 %v512_v12, %v511_v11  ;;  %v3022_v22 = vpack.c.bf16 %v578_v17, %v577_v16 }
  0x3f   : > { %3005 = vmatpush3.bf16.msra.mxu1 %v3004_v34  ;;  %1143 = vmatprep.mubr.f32.mxu1 %v344_v53  ;;  %v3020_v21 = vpack.c.bf16 %v544_v15, %v543_v13  ;;  %v561_v23 = vld [vmem:[%s4891_s1 + $0x400] sm:$0xff]  ;;  %v562_v24 = vld [vmem:[%s4891_s1 + $0x408] sm:$0xff]  ;;  %v3054_v25 = vpack.c.bf16 %v610_v19, %v609_v18  ;;  %v579_v29 = vld [vmem:[%s4891_s1 + $0x490] sm:$0xff] }
  0x40   : > { %3007 = vmatprep.subr.bf16.mxu1 %v3006_v39  ;;  %v593_v26 = vld [vmem:[%s4891_s1 + $0x500] sm:$0xff]  ;;  %v594_v27 = vld [vmem:[%s4891_s1 + $0x508] sm:$0xff]  ;;  %v580_v30 = vld [vmem:[%s4891_s1 + $0x498] sm:$0xff]  ;;  %v3024_v31 = vpack.c.bf16 %v562_v24, %v561_v23 }
  0x41   : > { %2977 = vmatpush3.bf16.msra.mxu0 %v2976_v46  ;;  %v341_v28 = vld [vmem:[%s3682_s21 + $0x20] sm:$0xff]  ;;  %v343_v32 = vld [vmem:[%s3682_s21 + $0x30] sm:$0xff]  ;;  %v612_v34 = vld [vmem:[%s4891_s1 + $0x598] sm:$0xff]  ;;  %v3056_v35 = vpack.c.bf16 %v594_v27, %v593_v26  ;;  %v3026_v40 = vpack.c.bf16 %v580_v30, %v579_v29 }
  0x42   : > { %2979 = vmatprep.subr.bf16.mxu0 %v2978_v50  ;;  %v611_v33 = vld [vmem:[%s4891_s1 + $0x590] sm:$0xff]  ;;  %v366_v36 = vld [vmem:[%s3682_s21 + $0xe8] sm:$0xff]  ;;  %v564_v38 = vld [vmem:[%s4891_s1 + $0x418] sm:$0xff] }
  0x43   : > { %3009 = vmatpush3.bf16.msra.mxu1 %v3008_v49  ;;  %v563_v37 = vld [vmem:[%s4891_s1 + $0x410] sm:$0xff]  ;;  %v365_v39 = vld [vmem:[%s3682_s21 + $0xe0] sm:$0xff]  ;;  %v596_v42 = vld [vmem:[%s4891_s1 + $0x518] sm:$0xff]  ;;  %v3058_v44 = vpack.c.bf16 %v612_v34, %v611_v33 }
  0x44   : > { %3011 = vmatprep.subr.bf16.mxu1 %v3010_v54  ;;  %v595_v41 = vld [vmem:[%s4891_s1 + $0x510] sm:$0xff]  ;;  %v368_v43 = vld [vmem:[%s3682_s21 + $0xf8] sm:$0xff]  ;;  %v581_v45 = vld [vmem:[%s4891_s1 + $0x4a0] sm:$0xff]  ;;  %v3028_v47 = vpack.c.bf16 %v564_v38, %v563_v37 }
  0x45   : > { %2981 = vmatpush3.bf16.msra.mxu0 %v2980_v60  ;;  %v582_v46 = vld [vmem:[%s4891_s1 + $0x4a8] sm:$0xff]  ;;  %v367_v48 = vld [vmem:[%s3682_s21 + $0xf0] sm:$0xff]  ;;  %v613_v49 = vld [vmem:[%s4891_s1 + $0x5a0] sm:$0xff]  ;;  %v3060_v51 = vpack.c.bf16 %v596_v42, %v595_v41 }
  0x46   : > { %2983 = vmatprep.subr.bf16.mxu0 %v2982_v62  ;;  %v614_v50 = vld [vmem:[%s4891_s1 + $0x5a8] sm:$0xff]  ;;  %v565_v53 = vld [vmem:[%s4891_s1 + $0x420] sm:$0xff]  ;;  %v3030_v56 = vpack.c.bf16 %v582_v46, %v581_v45  ;;  %v392_v57 = vld [vmem:[%s3682_s21 + $0x1b8] sm:$0xff] }
  0x47   : > { %3013 = vmatpush3.bf16.msra.mxu1 %v3012_v61  ;;  %v390_v52 = vld [vmem:[%s3682_s21 + $0x1a8] sm:$0xff]  ;;  %v389_v55 = vld [vmem:[%s3682_s21 + $0x1a0] sm:$0xff]  ;;  %v3062_v60 = vpack.c.bf16 %v614_v50, %v613_v49  ;;  %v391_v61 = vld [vmem:[%s3682_s21 + $0x1b0] sm:$0xff] }
  0x48   : > { %3015 = vmatprep.subr.bf16.mxu1 %v3014_v2  ;;  %v566_v54 = vld [vmem:[%s4891_s1 + $0x428] sm:$0xff]  ;;  %v597_v58 = vld [vmem:[%s4891_s1 + $0x520] sm:$0xff]  ;;  %v583_v62 = vld [vmem:[%s4891_s1 + $0x4b0] sm:$0xff] }
  0x49   : > { %2985 = vmatpush3.bf16.msra.mxu0 %v2984_v8  ;;  %v598_v59 = vld [vmem:[%s4891_s1 + $0x528] sm:$0xff]  ;;  %v584_v63 = vld [vmem:[%s4891_s1 + $0x4b8] sm:$0xff]  ;;  %v3032_v0 = vpack.c.bf16 %v566_v54, %v565_v53  ;;  %v615_v2 = vld [vmem:[%s4891_s1 + $0x5b0] sm:$0xff] }
  0x4a   : > { %2987 = vmatprep.subr.bf16.mxu0 %v2986_v10  ;;  %v414_v1 = vld [vmem:[%s3682_s21 + $0x268] sm:$0xff]  ;;  %v616_v3 = vld [vmem:[%s4891_s1 + $0x5b8] sm:$0xff]  ;;  %v3064_v4 = vpack.c.bf16 %v598_v59, %v597_v58  ;;  %v567_v5 = vld [vmem:[%s4891_s1 + $0x430] sm:$0xff]  ;;  %v3034_v8 = vpack.c.bf16 %v584_v63, %v583_v62 }
  0x4b   : > { %3017 = vmatpush3.bf16.msra.mxu1 %v3016_v9  ;;  %v568_v6 = vld [vmem:[%s4891_s1 + $0x438] sm:$0xff]  ;;  %v599_v7 = vld [vmem:[%s4891_s1 + $0x530] sm:$0xff]  ;;  %v585_v10 = vld [vmem:[%s4891_s1 + $0x4c0] sm:$0xff]  ;;  %v3066_v13 = vpack.c.bf16 %v616_v3, %v615_v2 }
  0x4c   : > { %3019 = vmatprep.subr.bf16.mxu1 %v3018_v14  ;;  %v600_v9 = vld [vmem:[%s4891_s1 + $0x538] sm:$0xff]  ;;  %v586_v11 = vld [vmem:[%s4891_s1 + $0x4c8] sm:$0xff]  ;;  %v617_v14 = vld [vmem:[%s4891_s1 + $0x5c0] sm:$0xff]  ;;  %v3036_v17 = vpack.c.bf16 %v568_v6, %v567_v5 }
  0x4d   : > { %2989 = vmatpush3.bf16.msra.mxu0 %v2988_v20  ;;  %v416_v12 = vld [vmem:[%s3682_s21 + $0x278] sm:$0xff]  ;;  %v618_v15 = vld [vmem:[%s4891_s1 + $0x5c8] sm:$0xff]  ;;  %v413_v16 = vld [vmem:[%s3682_s21 + $0x260] sm:$0xff]  ;;  %v3068_v19 = vpack.c.bf16 %v600_v9, %v599_v7  ;;  %v3038_v20 = vpack.c.bf16 %v586_v11, %v585_v10 }
  0x4e   : > { %3023 = vmatprep.subr.bf16.mxu0 %v3022_v22  ;;  %v415_v18 = vld [vmem:[%s3682_s21 + $0x270] sm:$0xff]  ;;  %v570_v22 = vld [vmem:[%s4891_s1 + $0x448] sm:$0xff]  ;;  %v601_v23 = vld [vmem:[%s4891_s1 + $0x540] sm:$0xff]  ;;  %v3070_v24 = vpack.c.bf16 %v618_v15, %v617_v14 }
  0x4f   : > { %3021 = vmatpush3.bf16.msra.mxu1 %v3020_v21  ;;  %v569_v21 = vld [vmem:[%s4891_s1 + $0x440] sm:$0xff]  ;;  %v587_v26 = vld [vmem:[%s4891_s1 + $0x4d0] sm:$0xff]  ;;  %v588_v27 = vld [vmem:[%s4891_s1 + $0x4d8] sm:$0xff] }
  0x50   : > { %3055 = vmatprep.subr.bf16.mxu1 %v3054_v25  ;;  %1059 = vmatmul.mubr.f32.vlgmr.msra.gmra.mrb[8].mxu0 %v341_v28  ;;  %v602_v25 = vld [vmem:[%s4891_s1 + $0x548] sm:$0xff]  ;;  %v619_v28 = vld [vmem:[%s4891_s1 + $0x5d0] sm:$0xff]  ;;  %v620_v29 = vld [vmem:[%s4891_s1 + $0x5d8] sm:$0xff]  ;;  %v3042_v34 = vpack.c.bf16 %v588_v27, %v587_v26 }
  0x51   : > { %3025 = vmatpush3.bf16.msra.mxu0 %v3024_v31  ;;  %1063 = vmatprep.mubr.f32.mxu0 %v366_v36  ;;  %v346_v30 = vld [vmem:[%s3682_s21 + $0x48] sm:$0xff]  ;;  %v3040_v31 = vpack.c.bf16 %v570_v22, %v569_v21  ;;  %v3072_v33 = vpack.c.bf16 %v602_v25, %v601_v23  ;;  %v572_v36 = vld [vmem:[%s4891_s1 + $0x458] sm:$0xff]  ;;  %v603_v37 = vld [vmem:[%s4891_s1 + $0x550] sm:$0xff]  ;;  %v3074_v38 = vpack.c.bf16 %v620_v29, %v619_v28 }
  0x52   : > { %1144 = vmatmul.mubr.f32.vlgmr.msra.gmra.mrb[8].mxu1 %v343_v32  ;;  %3027 = vmatprep.subr.bf16.mxu0 %v3026_v40  ;;  %v348_v32 = vld [vmem:[%s3682_s21 + $0x58] sm:$0xff]  ;;  %v589_v40 = vld [vmem:[%s4891_s1 + $0x4e0] sm:$0xff]  ;;  %v590_v41 = vld [vmem:[%s4891_s1 + $0x4e8] sm:$0xff] }
  0x53   : > { %3057 = vmatpush3.bf16.msra.mxu1 %v3056_v35  ;;  %1148 = vmatprep.mubr.f32.mxu1 %v368_v43  ;;  %v571_v35 = vld [vmem:[%s4891_s1 + $0x450] sm:$0xff]  ;;  %v621_v42 = vld [vmem:[%s4891_s1 + $0x5e0] sm:$0xff]  ;;  %v622_v43 = vld [vmem:[%s4891_s1 + $0x5e8] sm:$0xff]  ;;  %v3046_v46 = vpack.c.bf16 %v590_v41, %v589_v40 }
  0x54   : > { %1064 = vmatmul.mubr.f32.gmra.mrb[10].mxu0 %v365_v39  ;;  %3059 = vmatprep.subr.bf16.mxu1 %v3058_v44  ;;  %v604_v39 = vld [vmem:[%s4891_s1 + $0x558] sm:$0xff]  ;;  %v3044_v44 = vpack.c.bf16 %v572_v36, %v571_v35  ;;  %v605_v49 = vld [vmem:[%s4891_s1 + $0x560] sm:$0xff]  ;;  %v3078_v50 = vpack.c.bf16 %v622_v43, %v621_v42  ;;  %v623_v54 = vld [vmem:[%s4891_s1 + $0x5f0] sm:$0xff] }
  0x55   : > { %3029 = vmatpush3.bf16.msra.mxu0 %v3028_v47  ;;  %1068 = vmatprep.mubr.f32.mxu0 %v390_v52  ;;  %v3076_v45 = vpack.c.bf16 %v604_v39, %v603_v37  ;;  %v573_v47 = vld [vmem:[%s4891_s1 + $0x460] sm:$0xff]  ;;  %v591_v52 = vld [vmem:[%s4891_s1 + $0x4f0] sm:$0xff]  ;;  %v592_v53 = vld [vmem:[%s4891_s1 + $0x4f8] sm:$0xff] }
  0x56   : > { %1149 = vmatmul.mubr.f32.gmra.mrb[10].mxu1 %v367_v48  ;;  %3031 = vmatprep.subr.bf16.mxu0 %v3030_v56  ;;  %v574_v48 = vld [vmem:[%s4891_s1 + $0x468] sm:$0xff]  ;;  %v3050_v58 = vpack.c.bf16 %v592_v53, %v591_v52  ;;  %v575_v59 = vld [vmem:[%s4891_s1 + $0x470] sm:$0xff]  ;;  %v608_v63 = vld [vmem:[%s4891_s1 + $0x578] sm:$0xff] }
  0x57   : > { %3061 = vmatpush3.bf16.msra.mxu1 %v3060_v51  ;;  %1153 = vmatprep.mubr.f32.mxu1 %v392_v57  ;;  %v606_v51 = vld [vmem:[%s4891_s1 + $0x568] sm:$0xff]  ;;  %v3048_v56 = vpack.c.bf16 %v574_v48, %v573_v47  ;;  %v673_v2 = vld [vmem:[%s4891_s1 + $0x780] sm:$0xff]  ;;  %v644_v14 = vld [vmem:[%s4891_s1 + $0x698] sm:$0xff] }
  0x58   : > { %1069 = vmatmul.mubr.f32.gmra.mrb[12].mxu0 %v389_v55  ;;  %3063 = vmatprep.subr.bf16.mxu1 %v3062_v60  ;;  %v624_v55 = vld [vmem:[%s4891_s1 + $0x5f8] sm:$0xff]  ;;  %v3080_v57 = vpack.c.bf16 %v606_v51, %v605_v49  ;;  %v674_v3 = vld [vmem:[%s4891_s1 + $0x788] sm:$0xff]  ;;  %v625_v7 = vld [vmem:[%s4891_s1 + $0x600] sm:$0xff] }
  0x59   : > { %3033 = vmatpush3.bf16.msra.mxu0 %v3032_v0  ;;  %1073 = vmatprep.mubr.f32.mxu0 %v414_v1  ;;  %v576_v60 = vld [vmem:[%s4891_s1 + $0x478] sm:$0xff]  ;;  %v3082_v62 = vpack.c.bf16 %v624_v55, %v623_v54  ;;  %v641_v0 = vld [vmem:[%s4891_s1 + $0x680] sm:$0xff]  ;;  %v642_v1 = vld [vmem:[%s4891_s1 + $0x688] sm:$0xff]  ;;  %v3118_v9 = vpack.c.bf16 %v674_v3, %v673_v2 }
  0x5a   : > { %1154 = vmatmul.mubr.f32.gmra.mrb[12].mxu1 %v391_v61  ;;  %3035 = vmatprep.subr.bf16.mxu0 %v3034_v8  ;;  %v607_v61 = vld [vmem:[%s4891_s1 + $0x570] sm:$0xff]  ;;  %v3086_v6 = vpack.c.bf16 %v642_v1, %v641_v0  ;;  %v626_v8 = vld [vmem:[%s4891_s1 + $0x608] sm:$0xff]  ;;  %v657_v10 = vld [vmem:[%s4891_s1 + $0x700] sm:$0xff] }
  0x5b   : > { %3065 = vmatpush3.bf16.msra.mxu1 %v3064_v4  ;;  %1158 = vmatprep.mubr.f32.mxu1 %v416_v12  ;;  %v3052_v4 = vpack.c.bf16 %v576_v60, %v575_v59  ;;  %v3084_v5 = vpack.c.bf16 %v608_v63, %v607_v61  ;;  %v658_v11 = vld [vmem:[%s4891_s1 + $0x708] sm:$0xff]  ;;  %v345_v12 = vld [vmem:[%s3682_s21 + $0x40] sm:$0xff]  ;;  %v3088_v15 = vpack.c.bf16 %v626_v8, %v625_v7  ;;  %v627_v21 = vld [vmem:[%s4891_s1 + $0x610] sm:$0xff] }
  0x5c   : > { %1074 = vmatmul.mubr.f32.gmra.mrb[14].mxu0 %v413_v16  ;;  %3067 = vmatprep.subr.bf16.mxu1 %v3066_v13  ;;  %v643_v13 = vld [vmem:[%s4891_s1 + $0x690] sm:$0xff]  ;;  %v628_v22 = vld [vmem:[%s4891_s1 + $0x618] sm:$0xff]  ;;  %v369_v23 = vld [vmem:[%s3682_s21 + $0x100] sm:$0xff] }
  0x5d   : > { %3037 = vmatpush3.bf16.msra.mxu0 %v3036_v17  ;;  %1228 = vmatprep.mubr.f32.mxu0 %v346_v30  ;;  %v347_v16 = vld [vmem:[%s3682_s21 + $0x50] sm:$0xff]  ;;  %v660_v26 = vld [vmem:[%s4891_s1 + $0x718] sm:$0xff]  ;;  %v645_v29 = vld [vmem:[%s4891_s1 + $0x6a0] sm:$0xff] }
  0x5e   : > { %1159 = vmatmul.mubr.f32.gmra.mrb[14].mxu1 %v415_v18  ;;  %3039 = vmatprep.subr.bf16.mxu0 %v3038_v20  ;;  %v675_v17 = vld [vmem:[%s4891_s1 + $0x790] sm:$0xff]  ;;  %v676_v18 = vld [vmem:[%s4891_s1 + $0x798] sm:$0xff]  ;;  %v370_v20 = vld [vmem:[%s3682_s21 + $0x108] sm:$0xff] }
  0x5f   : > { %3069 = vmatpush3.bf16.msra.mxu1 %v3068_v19  ;;  %1313 = vmatprep.mubr.f32.mxu1 %v348_v32  ;;  %v3120_v19 = vpack.c.bf16 %v658_v11, %v657_v10  ;;  %v659_v25 = vld [vmem:[%s4891_s1 + $0x710] sm:$0xff]  ;;  %v372_v27 = vld [vmem:[%s3682_s21 + $0x118] sm:$0xff]  ;;  %v3122_v28 = vpack.c.bf16 %v676_v18, %v675_v17  ;;  %v646_v30 = vld [vmem:[%s4891_s1 + $0x6a8] sm:$0xff] }
  0x60   : > { %3071 = vmatprep.subr.bf16.mxu1 %v3070_v24  ;;  %v3090_v24 = vpack.c.bf16 %v644_v14, %v643_v13  ;;  %v371_v32 = vld [vmem:[%s3682_s21 + $0x110] sm:$0xff]  ;;  %v3124_v35 = vpack.c.bf16 %v660_v26, %v659_v25  ;;  %v394_v36 = vld [vmem:[%s3682_s21 + $0x1c8] sm:$0xff]  ;;  %v629_v37 = vld [vmem:[%s4891_s1 + $0x620] sm:$0xff]  ;;  %v3094_v40 = vpack.c.bf16 %v646_v30, %v645_v29 }
  0x61   : > { %3041 = vmatpush3.bf16.msra.mxu0 %v3040_v31  ;;  %v3092_v31 = vpack.c.bf16 %v628_v22, %v627_v21  ;;  %v393_v39 = vld [vmem:[%s3682_s21 + $0x1c0] sm:$0xff]  ;;  %v396_v41 = vld [vmem:[%s3682_s21 + $0x1d8] sm:$0xff]  ;;  %v662_v43 = vld [vmem:[%s4891_s1 + $0x728] sm:$0xff] }
  0x62   : > { %3043 = vmatprep.subr.bf16.mxu0 %v3042_v34  ;;  %v678_v34 = vld [vmem:[%s4891_s1 + $0x7a8] sm:$0xff]  ;;  %v661_v42 = vld [vmem:[%s4891_s1 + $0x720] sm:$0xff]  ;;  %v648_v47 = vld [vmem:[%s4891_s1 + $0x6b8] sm:$0xff] }
  0x63   : > { %3073 = vmatpush3.bf16.msra.mxu1 %v3072_v33  ;;  %v677_v33 = vld [vmem:[%s4891_s1 + $0x7a0] sm:$0xff]  ;;  %v418_v49 = vld [vmem:[%s3682_s21 + $0x288] sm:$0xff]  ;;  %v680_v51 = vld [vmem:[%s4891_s1 + $0x7b8] sm:$0xff]  ;;  %v3128_v52 = vpack.c.bf16 %v662_v43, %v661_v42 }
  0x64   : > { %3075 = vmatprep.subr.bf16.mxu1 %v3074_v38  ;;  %v630_v38 = vld [vmem:[%s4891_s1 + $0x628] sm:$0xff]  ;;  %v631_v53 = vld [vmem:[%s4891_s1 + $0x630] sm:$0xff]  ;;  %v632_v54 = vld [vmem:[%s4891_s1 + $0x638] sm:$0xff] }
  0x65   : > { %3045 = vmatpush3.bf16.msra.mxu0 %v3044_v44  ;;  %v3126_v44 = vpack.c.bf16 %v678_v34, %v677_v33  ;;  %v3096_v48 = vpack.c.bf16 %v630_v38, %v629_v37  ;;  %v663_v55 = vld [vmem:[%s4891_s1 + $0x730] sm:$0xff]  ;;  %v650_v59 = vld [vmem:[%s4891_s1 + $0x6c8] sm:$0xff]  ;;  %v420_v60 = vld [vmem:[%s3682_s21 + $0x298] sm:$0xff]  ;;  %v3100_v1 = vpack.c.bf16 %v632_v54, %v631_v53 }
  0x66   : > { %3047 = vmatprep.subr.bf16.mxu0 %v3046_v46  ;;  %v647_v46 = vld [vmem:[%s4891_s1 + $0x6b0] sm:$0xff]  ;;  %v682_v63 = vld [vmem:[%s4891_s1 + $0x7c8] sm:$0xff]  ;;  %v417_v0 = vld [vmem:[%s3682_s21 + $0x280] sm:$0xff] }
  0x67   : > { %3077 = vmatpush3.bf16.msra.mxu1 %v3076_v45  ;;  %v395_v45 = vld [vmem:[%s3682_s21 + $0x1d0] sm:$0xff]  ;;  %v665_v7 = vld [vmem:[%s4891_s1 + $0x740] sm:$0xff]  ;;  %v652_v11 = vld [vmem:[%s4891_s1 + $0x6d8] sm:$0xff] }
  0x68   : > { %3079 = vmatprep.subr.bf16.mxu1 %v3078_v50  ;;  %v679_v50 = vld [vmem:[%s4891_s1 + $0x7b0] sm:$0xff]  ;;  %v684_v13 = vld [vmem:[%s4891_s1 + $0x7d8] sm:$0xff]  ;;  %v350_v14 = vld [vmem:[%s3682_s21 + $0x68] sm:$0xff] }
  0x69   : > { %3049 = vmatpush3.bf16.msra.mxu0 %v3048_v56  ;;  %v3098_v56 = vpack.c.bf16 %v648_v47, %v647_v46  ;;  %v3130_v61 = vpack.c.bf16 %v680_v51, %v679_v50  ;;  %v419_v2 = vld [vmem:[%s3682_s21 + $0x290] sm:$0xff]  ;;  %v654_v25 = vld [vmem:[%s4891_s1 + $0x6e8] sm:$0xff]  ;;  %v685_v26 = vld [vmem:[%s4891_s1 + $0x7e0] sm:$0xff] }
  0x6a   : > { %3051 = vmatprep.subr.bf16.mxu0 %v3050_v58  ;;  %v649_v58 = vld [vmem:[%s4891_s1 + $0x6c0] sm:$0xff]  ;;  %v651_v10 = vld [vmem:[%s4891_s1 + $0x6d0] sm:$0xff]  ;;  %v656_v37 = vld [vmem:[%s4891_s1 + $0x6f8] sm:$0xff] }
  0x6b   : > { %3081 = vmatpush3.bf16.msra.mxu1 %v3080_v57  ;;  %v664_v57 = vld [vmem:[%s4891_s1 + $0x738] sm:$0xff]  ;;  %v3106_v18 = vpack.c.bf16 %v652_v11, %v651_v10  ;;  %v667_v21 = vld [vmem:[%s4891_s1 + $0x750] sm:$0xff]  ;;  %v669_v33 = vld [vmem:[%s4891_s1 + $0x760] sm:$0xff] }
  0x6c   : > { %3083 = vmatprep.subr.bf16.mxu1 %v3082_v62  ;;  %v681_v62 = vld [vmem:[%s4891_s1 + $0x7c0] sm:$0xff]  ;;  %v3132_v3 = vpack.c.bf16 %v664_v57, %v663_v55  ;;  %v687_v38 = vld [vmem:[%s4891_s1 + $0x7f0] sm:$0xff]  ;;  %v672_v47 = vld [vmem:[%s4891_s1 + $0x778] sm:$0xff] }
  0x6d   : > { %3053 = vmatpush3.bf16.msra.mxu0 %v3052_v4  ;;  %v3102_v4 = vpack.c.bf16 %v650_v59, %v649_v58  ;;  %v3134_v8 = vpack.c.bf16 %v682_v63, %v681_v62  ;;  %v639_v43 = vld [vmem:[%s4891_s1 + $0x670] sm:$0xff]  ;;  %v737_v50 = vld [vmem:[%s4891_s1 + $0x980] sm:$0xff]  ;;  %v738_v51 = vld [vmem:[%s4891_s1 + $0x988] sm:$0xff] }
  0x6e   : > { %3087 = vmatprep.subr.bf16.mxu0 %v3086_v6  ;;  %v634_v6 = vld [vmem:[%s4891_s1 + $0x648] sm:$0xff]  ;;  %v689_v55 = vld [vmem:[%s4891_s1 + $0x800] sm:$0xff]  ;;  %v3182_v57 = vpack.c.bf16 %v738_v51, %v737_v50  ;;  %v708_v62 = vld [vmem:[%s4891_s1 + $0x898] sm:$0xff] }
  0x6f   : > { %3085 = vmatpush3.bf16.msra.mxu1 %v3084_v5  ;;  %v633_v5 = vld [vmem:[%s4891_s1 + $0x640] sm:$0xff]  ;;  %v722_v59 = vld [vmem:[%s4891_s1 + $0x908] sm:$0xff]  ;;  %v724_v10 = vld [vmem:[%s4891_s1 + $0x918] sm:$0xff] }
  0x70   : > { %3119 = vmatprep.subr.bf16.mxu1 %v3118_v9  ;;  %1229 = vmatmul.mubr.f32.vlgmr.msra.gmra.mrb[16].mxu0 %v345_v12  ;;  %v666_v9 = vld [vmem:[%s4891_s1 + $0x748] sm:$0xff]  ;;  %v683_v12 = vld [vmem:[%s4891_s1 + $0x7d0] sm:$0xff]  ;;  %v721_v58 = vld [vmem:[%s4891_s1 + $0x900] sm:$0xff] }
  0x71   : > { %3089 = vmatpush3.bf16.msra.mxu0 %v3088_v15  ;;  %1233 = vmatprep.mubr.f32.mxu0 %v370_v20  ;;  %v3104_v15 = vpack.c.bf16 %v634_v6, %v633_v5  ;;  %v3136_v17 = vpack.c.bf16 %v666_v9, %v665_v7  ;;  %v636_v20 = vld [vmem:[%s4891_s1 + $0x658] sm:$0xff]  ;;  %v3138_v22 = vpack.c.bf16 %v684_v13, %v683_v12  ;;  %v691_v5 = vld [vmem:[%s4891_s1 + $0x810] sm:$0xff]  ;;  %v373_v7 = vld [vmem:[%s3682_s21 + $0x120] sm:$0xff] }
  0x72   : > { %1314 = vmatmul.mubr.f32.vlgmr.msra.gmra.mrb[16].mxu1 %v347_v16  ;;  %3091 = vmatprep.subr.bf16.mxu0 %v3090_v24  ;;  %v352_v16 = vld [vmem:[%s3682_s21 + $0x78] sm:$0xff]  ;;  %v653_v24 = vld [vmem:[%s4891_s1 + $0x6e0] sm:$0xff]  ;;  %v723_v9 = vld [vmem:[%s4891_s1 + $0x910] sm:$0xff] }
  0x73   : > { %3121 = vmatpush3.bf16.msra.mxu1 %v3120_v19  ;;  %1318 = vmatprep.mubr.f32.mxu1 %v372_v27  ;;  %v635_v19 = vld [vmem:[%s4891_s1 + $0x650] sm:$0xff]  ;;  %v686_v27 = vld [vmem:[%s4891_s1 + $0x7e8] sm:$0xff]  ;;  %v3110_v30 = vpack.c.bf16 %v654_v25, %v653_v24  ;;  %v692_v6 = vld [vmem:[%s4891_s1 + $0x818] sm:$0xff] }
  0x74   : > { %1234 = vmatmul.mubr.f32.gmra.mrb[18].mxu0 %v369_v23  ;;  %3123 = vmatprep.subr.bf16.mxu1 %v3122_v28  ;;  %v668_v23 = vld [vmem:[%s4891_s1 + $0x758] sm:$0xff]  ;;  %v3108_v28 = vpack.c.bf16 %v636_v20, %v635_v19  ;;  %v3142_v34 = vpack.c.bf16 %v686_v27, %v685_v26  ;;  %v709_v13 = vld [vmem:[%s4891_s1 + $0x8a0] sm:$0xff]  ;;  %v3188_v19 = vpack.c.bf16 %v724_v10, %v723_v9  ;;  %v398_v20 = vld [vmem:[%s3682_s21 + $0x1e8] sm:$0xff] }
  0x75   : > { %3093 = vmatpush3.bf16.msra.mxu0 %v3092_v31  ;;  %1238 = vmatprep.mubr.f32.mxu0 %v394_v36  ;;  %v3140_v29 = vpack.c.bf16 %v668_v23, %v667_v21  ;;  %v637_v31 = vld [vmem:[%s4891_s1 + $0x660] sm:$0xff]  ;;  %v655_v36 = vld [vmem:[%s4891_s1 + $0x6f0] sm:$0xff]  ;;  %v376_v11 = vld [vmem:[%s3682_s21 + $0x138] sm:$0xff] }
  0x76   : > { %1319 = vmatmul.mubr.f32.gmra.mrb[18].mxu1 %v371_v32  ;;  %3095 = vmatprep.subr.bf16.mxu0 %v3094_v40  ;;  %v638_v32 = vld [vmem:[%s4891_s1 + $0x668] sm:$0xff]  ;;  %v3114_v42 = vpack.c.bf16 %v656_v37, %v655_v36  ;;  %v693_v21 = vld [vmem:[%s4891_s1 + $0x820] sm:$0xff]  ;;  %v400_v25 = vld [vmem:[%s3682_s21 + $0x1f8] sm:$0xff] }
  0x77   : > { %3125 = vmatpush3.bf16.msra.mxu1 %v3124_v35  ;;  %1323 = vmatprep.mubr.f32.mxu1 %v396_v41  ;;  %v670_v35 = vld [vmem:[%s4891_s1 + $0x768] sm:$0xff]  ;;  %v3112_v40 = vpack.c.bf16 %v638_v32, %v637_v31  ;;  %v397_v23 = vld [vmem:[%s3682_s21 + $0x1e0] sm:$0xff]  ;;  %v712_v31 = vld [vmem:[%s4891_s1 + $0x8b8] sm:$0xff] }
  0x78   : > { %1239 = vmatmul.mubr.f32.gmra.mrb[20].mxu0 %v393_v39  ;;  %3127 = vmatprep.subr.bf16.mxu1 %v3126_v44  ;;  %v688_v39 = vld [vmem:[%s4891_s1 + $0x7f8] sm:$0xff]  ;;  %v3144_v41 = vpack.c.bf16 %v670_v35, %v669_v33  ;;  %v725_v26 = vld [vmem:[%s4891_s1 + $0x920] sm:$0xff]  ;;  %v726_v27 = vld [vmem:[%s4891_s1 + $0x928] sm:$0xff] }
  0x79   : > { %3097 = vmatpush3.bf16.msra.mxu0 %v3096_v48  ;;  %1243 = vmatprep.mubr.f32.mxu0 %v418_v49  ;;  %v640_v44 = vld [vmem:[%s4891_s1 + $0x678] sm:$0xff]  ;;  %v3146_v46 = vpack.c.bf16 %v688_v39, %v687_v38  ;;  %v705_v48 = vld [vmem:[%s4891_s1 + $0x880] sm:$0xff]  ;;  %v706_v49 = vld [vmem:[%s4891_s1 + $0x888] sm:$0xff]  ;;  %v3192_v36 = vpack.c.bf16 %v726_v27, %v725_v26 }
  0x7a   : > { %1324 = vmatmul.mubr.f32.gmra.mrb[20].mxu1 %v395_v45  ;;  %3099 = vmatprep.subr.bf16.mxu0 %v3098_v56  ;;  %v671_v45 = vld [vmem:[%s4891_s1 + $0x770] sm:$0xff]  ;;  %v3150_v54 = vpack.c.bf16 %v706_v49, %v705_v48  ;;  %v690_v56 = vld [vmem:[%s4891_s1 + $0x808] sm:$0xff]  ;;  %v744_v35 = vld [vmem:[%s4891_s1 + $0x9b8] sm:$0xff] }
  0x7b   : > { %3129 = vmatpush3.bf16.msra.mxu1 %v3128_v52  ;;  %1328 = vmatprep.mubr.f32.mxu1 %v420_v60  ;;  %v3116_v52 = vpack.c.bf16 %v640_v44, %v639_v43  ;;  %v3148_v53 = vpack.c.bf16 %v672_v47, %v671_v45  ;;  %v349_v60 = vld [vmem:[%s3682_s21 + $0x60] sm:$0xff]  ;;  %v3152_v63 = vpack.c.bf16 %v690_v56, %v689_v55  ;;  %v422_v33 = vld [vmem:[%s3682_s21 + $0x2a8] sm:$0xff]  ;;  %v695_v37 = vld [vmem:[%s4891_s1 + $0x830] sm:$0xff] }
  0x7c   : > { %1244 = vmatmul.mubr.f32.gmra.mrb[22].mxu0 %v417_v0  ;;  %3131 = vmatprep.subr.bf16.mxu1 %v3130_v61  ;;  %v707_v61 = vld [vmem:[%s4891_s1 + $0x890] sm:$0xff]  ;;  %v696_v38 = vld [vmem:[%s4891_s1 + $0x838] sm:$0xff]  ;;  %v714_v43 = vld [vmem:[%s4891_s1 + $0x8c8] sm:$0xff] }
  0x7d   : > { %3101 = vmatpush3.bf16.msra.mxu0 %v3100_v1  ;;  %1398 = vmatprep.mubr.f32.mxu0 %v350_v14  ;;  %v351_v0 = vld [vmem:[%s3682_s21 + $0x70] sm:$0xff]  ;;  %v710_v14 = vld [vmem:[%s4891_s1 + $0x8a8] sm:$0xff]  ;;  %v424_v44 = vld [vmem:[%s3682_s21 + $0x2b8] sm:$0xff]  ;;  %v3164_v49 = vpack.c.bf16 %v696_v38, %v695_v37 }
  0x7e   : > { %1329 = vmatmul.mubr.f32.gmra.mrb[22].mxu1 %v419_v2  ;;  %3103 = vmatprep.subr.bf16.mxu0 %v3102_v4  ;;  %v739_v1 = vld [vmem:[%s4891_s1 + $0x990] sm:$0xff]  ;;  %v740_v2 = vld [vmem:[%s4891_s1 + $0x998] sm:$0xff]  ;;  %v374_v4 = vld [vmem:[%s3682_s21 + $0x128] sm:$0xff]  ;;  %v3158_v24 = vpack.c.bf16 %v710_v14, %v709_v13 }
  0x7f   : > { %3133 = vmatpush3.bf16.msra.mxu1 %v3132_v3  ;;  %1483 = vmatprep.mubr.f32.mxu1 %v352_v16  ;;  %v3184_v3 = vpack.c.bf16 %v722_v59, %v721_v58  ;;  %v3186_v12 = vpack.c.bf16 %v740_v2, %v739_v1  ;;  %v375_v16 = vld [vmem:[%s3682_s21 + $0x130] sm:$0xff]  ;;  %v746_v47 = vld [vmem:[%s4891_s1 + $0x9c8] sm:$0xff]  ;;  %v421_v48 = vld [vmem:[%s3682_s21 + $0x2a0] sm:$0xff] }
  0x80   : > { %3135 = vmatprep.subr.bf16.mxu1 %v3134_v8  ;;  %v3154_v8 = vpack.c.bf16 %v708_v62, %v707_v61  ;;  %v727_v39 = vld [vmem:[%s4891_s1 + $0x930] sm:$0xff]  ;;  %v729_v55 = vld [vmem:[%s4891_s1 + $0x940] sm:$0xff]  ;;  %v716_v59 = vld [vmem:[%s4891_s1 + $0x8d8] sm:$0xff] }
  0x81   : > { %3105 = vmatpush3.bf16.msra.mxu0 %v3104_v15  ;;  %v3156_v15 = vpack.c.bf16 %v692_v6, %v691_v5  ;;  %v423_v50 = vld [vmem:[%s3682_s21 + $0x2b0] sm:$0xff]  ;;  %v748_v61 = vld [vmem:[%s4891_s1 + $0x9d8] sm:$0xff]  ;;  %v354_v62 = vld [vmem:[%s3682_s21 + $0x88] sm:$0xff] }
  0x82   : > { %3107 = vmatprep.subr.bf16.mxu0 %v3106_v18  ;;  %v742_v18 = vld [vmem:[%s4891_s1 + $0x9a8] sm:$0xff]  ;;  %v715_v58 = vld [vmem:[%s4891_s1 + $0x8d0] sm:$0xff]  ;;  %v749_v10 = vld [vmem:[%s4891_s1 + $0x9e0] sm:$0xff] }
  0x83   : > { %3137 = vmatpush3.bf16.msra.mxu1 %v3136_v17  ;;  %v741_v17 = vld [vmem:[%s4891_s1 + $0x9a0] sm:$0xff]  ;;  %v3170_v2 = vpack.c.bf16 %v716_v59, %v715_v58  ;;  %v731_v5 = vld [vmem:[%s4891_s1 + $0x950] sm:$0xff]  ;;  %v718_v9 = vld [vmem:[%s4891_s1 + $0x8e8] sm:$0xff] }
  0x84   : > { %3139 = vmatprep.subr.bf16.mxu1 %v3138_v22  ;;  %v694_v22 = vld [vmem:[%s4891_s1 + $0x828] sm:$0xff]  ;;  %v703_v27 = vld [vmem:[%s4891_s1 + $0x870] sm:$0xff]  ;;  %v788_v58 = vld [vmem:[%s4891_s1 + $0xb18] sm:$0xff] }
  0x85   : > { %3109 = vmatpush3.bf16.msra.mxu0 %v3108_v28  ;;  %v3190_v28 = vpack.c.bf16 %v742_v18, %v741_v17  ;;  %v3160_v32 = vpack.c.bf16 %v694_v22, %v693_v21  ;;  %v733_v17 = vld [vmem:[%s4891_s1 + $0x960] sm:$0xff]  ;;  %v720_v21 = vld [vmem:[%s4891_s1 + $0x8f8] sm:$0xff]  ;;  %v751_v22 = vld [vmem:[%s4891_s1 + $0x9f0] sm:$0xff] }
  0x86   : > { %3111 = vmatprep.subr.bf16.mxu0 %v3110_v30  ;;  %v711_v30 = vld [vmem:[%s4891_s1 + $0x8b0] sm:$0xff]  ;;  %v380_v59 = vld [vmem:[%s3682_s21 + $0x158] sm:$0xff] }
  0x87   : > { %3141 = vmatpush3.bf16.msra.mxu1 %v3140_v29  ;;  %v399_v29 = vld [vmem:[%s3682_s21 + $0x1f0] sm:$0xff] }
  0x88   : > { %3143 = vmatprep.subr.bf16.mxu1 %v3142_v34  ;;  %v743_v34 = vld [vmem:[%s4891_s1 + $0x9b0] sm:$0xff] }
  0x89   : > { %3113 = vmatpush3.bf16.msra.mxu0 %v3112_v40  ;;  %v3162_v40 = vpack.c.bf16 %v712_v31, %v711_v30  ;;  %v3194_v45 = vpack.c.bf16 %v744_v35, %v743_v34  ;;  %v736_v31 = vld [vmem:[%s4891_s1 + $0x978] sm:$0xff]  ;;  %v801_v34 = vld [vmem:[%s4891_s1 + $0xb80] sm:$0xff]  ;;  %v802_v35 = vld [vmem:[%s4891_s1 + $0xb88] sm:$0xff] }
  0x8a   : > { %3115 = vmatprep.subr.bf16.mxu0 %v3114_v42  ;;  %v713_v42 = vld [vmem:[%s4891_s1 + $0x8c0] sm:$0xff] }
  0x8b   : > { %3145 = vmatpush3.bf16.msra.mxu1 %v3144_v41  ;;  %v728_v41 = vld [vmem:[%s4891_s1 + $0x938] sm:$0xff] }
  0x8c   : > { %3147 = vmatprep.subr.bf16.mxu1 %v3146_v46  ;;  %v745_v46 = vld [vmem:[%s4891_s1 + $0x9c0] sm:$0xff]  ;;  %v3196_v51 = vpack.c.bf16 %v728_v41, %v727_v39  ;;  %v3246_v41 = vpack.c.bf16 %v802_v35, %v801_v34  ;;  %v427_v34 = vld [vmem:[%s3682_s21 + $0x2d0] sm:$0xff] }
  0x8d   : > { %3117 = vmatpush3.bf16.msra.mxu0 %v3116_v52  ;;  %v3166_v52 = vpack.c.bf16 %v714_v43, %v713_v42  ;;  %v3198_v56 = vpack.c.bf16 %v746_v47, %v745_v46  ;;  %v753_v39 = vld [vmem:[%s4891_s1 + $0xa00] sm:$0xff]  ;;  %v786_v43 = vld [vmem:[%s4891_s1 + $0xb08] sm:$0xff]  ;;  %v772_v46 = vld [vmem:[%s4891_s1 + $0xa98] sm:$0xff] }
  0x8e   : > { %3151 = vmatprep.subr.bf16.mxu0 %v3150_v54  ;;  %v698_v54 = vld [vmem:[%s4891_s1 + $0x848] sm:$0xff]  ;;  %v785_v42 = vld [vmem:[%s4891_s1 + $0xb00] sm:$0xff] }
  0x8f   : > { %3149 = vmatpush3.bf16.msra.mxu1 %v3148_v53  ;;  %v697_v53 = vld [vmem:[%s4891_s1 + $0x840] sm:$0xff] }
  0x90   : > { %3183 = vmatprep.subr.bf16.mxu1 %v3182_v57  ;;  %1399 = vmatmul.mubr.f32.vlgmr.msra.gmra.mrb[24].mxu0 %v349_v60  ;;  %v730_v57 = vld [vmem:[%s4891_s1 + $0x948] sm:$0xff]  ;;  %v747_v60 = vld [vmem:[%s4891_s1 + $0x9d0] sm:$0xff] }
  0x91   : > { %3153 = vmatpush3.bf16.msra.mxu0 %v3152_v63  ;;  %1403 = vmatprep.mubr.f32.mxu0 %v374_v4  ;;  %v3168_v63 = vpack.c.bf16 %v698_v54, %v697_v53  ;;  %v3200_v1 = vpack.c.bf16 %v730_v57, %v729_v55  ;;  %v700_v4 = vld [vmem:[%s4891_s1 + $0x858] sm:$0xff]  ;;  %v3202_v6 = vpack.c.bf16 %v748_v61, %v747_v60  ;;  %v755_v53 = vld [vmem:[%s4891_s1 + $0xa10] sm:$0xff]  ;;  %v377_v55 = vld [vmem:[%s3682_s21 + $0x140] sm:$0xff] }
  0x92   : > { %1484 = vmatmul.mubr.f32.vlgmr.msra.gmra.mrb[24].mxu1 %v351_v0  ;;  %3155 = vmatprep.subr.bf16.mxu0 %v3154_v8  ;;  %v356_v0 = vld [vmem:[%s3682_s21 + $0x98] sm:$0xff]  ;;  %v717_v8 = vld [vmem:[%s4891_s1 + $0x8e0] sm:$0xff]  ;;  %v787_v57 = vld [vmem:[%s4891_s1 + $0xb10] sm:$0xff] }
  0x93   : > { %3185 = vmatpush3.bf16.msra.mxu1 %v3184_v3  ;;  %1488 = vmatprep.mubr.f32.mxu1 %v376_v11  ;;  %v699_v3 = vld [vmem:[%s4891_s1 + $0x850] sm:$0xff]  ;;  %v750_v11 = vld [vmem:[%s4891_s1 + $0x9e8] sm:$0xff]  ;;  %v3174_v14 = vpack.c.bf16 %v718_v9, %v717_v8  ;;  %v756_v54 = vld [vmem:[%s4891_s1 + $0xa18] sm:$0xff] }
  0x94   : > { %1404 = vmatmul.mubr.f32.gmra.mrb[26].mxu0 %v373_v7  ;;  %3187 = vmatprep.subr.bf16.mxu1 %v3186_v12  ;;  %v732_v7 = vld [vmem:[%s4891_s1 + $0x958] sm:$0xff]  ;;  %v3172_v12 = vpack.c.bf16 %v700_v4, %v699_v3  ;;  %v3206_v18 = vpack.c.bf16 %v750_v11, %v749_v10  ;;  %v773_v61 = vld [vmem:[%s4891_s1 + $0xaa0] sm:$0xff]  ;;  %v3252_v3 = vpack.c.bf16 %v788_v58, %v787_v57  ;;  %v402_v4 = vld [vmem:[%s3682_s21 + $0x208] sm:$0xff] }
  0x95   : > { %3157 = vmatpush3.bf16.msra.mxu0 %v3156_v15  ;;  %1408 = vmatprep.mubr.f32.mxu0 %v398_v20  ;;  %v3204_v13 = vpack.c.bf16 %v732_v7, %v731_v5  ;;  %v701_v15 = vld [vmem:[%s4891_s1 + $0x860] sm:$0xff]  ;;  %v719_v20 = vld [vmem:[%s4891_s1 + $0x8f0] sm:$0xff]  ;;  %v404_v9 = vld [vmem:[%s3682_s21 + $0x218] sm:$0xff] }
  0x96   : > { %1489 = vmatmul.mubr.f32.gmra.mrb[26].mxu1 %v375_v16  ;;  %3159 = vmatprep.subr.bf16.mxu0 %v3158_v24  ;;  %v702_v16 = vld [vmem:[%s4891_s1 + $0x868] sm:$0xff]  ;;  %v3178_v26 = vpack.c.bf16 %v720_v21, %v719_v20  ;;  %v757_v5 = vld [vmem:[%s4891_s1 + $0xa20] sm:$0xff]  ;;  %v759_v21 = vld [vmem:[%s4891_s1 + $0xa30] sm:$0xff] }
  0x97   : > { %3189 = vmatpush3.bf16.msra.mxu1 %v3188_v19  ;;  %1493 = vmatprep.mubr.f32.mxu1 %v400_v25  ;;  %v734_v19 = vld [vmem:[%s4891_s1 + $0x968] sm:$0xff]  ;;  %v3176_v24 = vpack.c.bf16 %v702_v16, %v701_v15  ;;  %v401_v7 = vld [vmem:[%s3682_s21 + $0x200] sm:$0xff]  ;;  %v776_v15 = vld [vmem:[%s4891_s1 + $0xab8] sm:$0xff] }
  0x98   : > { %1409 = vmatmul.mubr.f32.gmra.mrb[28].mxu0 %v397_v23  ;;  %3191 = vmatprep.subr.bf16.mxu1 %v3190_v28  ;;  %v752_v23 = vld [vmem:[%s4891_s1 + $0x9f8] sm:$0xff]  ;;  %v3208_v25 = vpack.c.bf16 %v734_v19, %v733_v17  ;;  %v789_v10 = vld [vmem:[%s4891_s1 + $0xb20] sm:$0xff]  ;;  %v790_v11 = vld [vmem:[%s4891_s1 + $0xb28] sm:$0xff] }
  0x99   : > { %3161 = vmatpush3.bf16.msra.mxu0 %v3160_v32  ;;  %1413 = vmatprep.mubr.f32.mxu0 %v422_v33  ;;  %v704_v28 = vld [vmem:[%s4891_s1 + $0x878] sm:$0xff]  ;;  %v3210_v30 = vpack.c.bf16 %v752_v23, %v751_v22  ;;  %v769_v32 = vld [vmem:[%s4891_s1 + $0xa80] sm:$0xff]  ;;  %v770_v33 = vld [vmem:[%s4891_s1 + $0xa88] sm:$0xff]  ;;  %v3256_v20 = vpack.c.bf16 %v790_v11, %v789_v10 }
  0x9a   : > { %1494 = vmatmul.mubr.f32.gmra.mrb[28].mxu1 %v399_v29  ;;  %3163 = vmatprep.subr.bf16.mxu0 %v3162_v40  ;;  %v735_v29 = vld [vmem:[%s4891_s1 + $0x970] sm:$0xff]  ;;  %v3214_v38 = vpack.c.bf16 %v770_v33, %v769_v32  ;;  %v754_v40 = vld [vmem:[%s4891_s1 + $0xa08] sm:$0xff]  ;;  %v808_v19 = vld [vmem:[%s4891_s1 + $0xbb8] sm:$0xff] }
  0x9b   : > { %3193 = vmatpush3.bf16.msra.mxu1 %v3192_v36  ;;  %1498 = vmatprep.mubr.f32.mxu1 %v424_v44  ;;  %v3180_v36 = vpack.c.bf16 %v704_v28, %v703_v27  ;;  %v3212_v37 = vpack.c.bf16 %v736_v31, %v735_v29  ;;  %v353_v44 = vld [vmem:[%s3682_s21 + $0x80] sm:$0xff]  ;;  %v3216_v47 = vpack.c.bf16 %v754_v40, %v753_v39  ;;  %v426_v17 = vld [vmem:[%s3682_s21 + $0x2c8] sm:$0xff]  ;;  %v760_v22 = vld [vmem:[%s4891_s1 + $0xa38] sm:$0xff] }
  0x9c   : > { %1414 = vmatmul.mubr.f32.gmra.mrb[30].mxu0 %v421_v48  ;;  %3195 = vmatprep.subr.bf16.mxu1 %v3194_v45  ;;  %v771_v45 = vld [vmem:[%s4891_s1 + $0xa90] sm:$0xff]  ;;  %v778_v27 = vld [vmem:[%s4891_s1 + $0xac8] sm:$0xff]  ;;  %v428_v28 = vld [vmem:[%s3682_s21 + $0x2d8] sm:$0xff]  ;;  %v3228_v33 = vpack.c.bf16 %v760_v22, %v759_v21 }
  0x9d   : > { %3165 = vmatpush3.bf16.msra.mxu0 %v3164_v49  ;;  %1568 = vmatprep.mubr.f32.mxu0 %v354_v62  ;;  %v355_v48 = vld [vmem:[%s3682_s21 + $0x90] sm:$0xff]  ;;  %v774_v62 = vld [vmem:[%s4891_s1 + $0xaa8] sm:$0xff]  ;;  %v425_v32 = vld [vmem:[%s3682_s21 + $0x2c0] sm:$0xff] }
  0x9e   : > { %1499 = vmatmul.mubr.f32.gmra.mrb[30].mxu1 %v423_v50  ;;  %3167 = vmatprep.subr.bf16.mxu0 %v3166_v52  ;;  %v803_v49 = vld [vmem:[%s4891_s1 + $0xb90] sm:$0xff]  ;;  %v804_v50 = vld [vmem:[%s4891_s1 + $0xb98] sm:$0xff]  ;;  %v378_v52 = vld [vmem:[%s3682_s21 + $0x148] sm:$0xff]  ;;  %v3222_v8 = vpack.c.bf16 %v774_v62, %v773_v61 }
  0x9f   : > { %3197 = vmatpush3.bf16.msra.mxu1 %v3196_v51  ;;  %1653 = vmatprep.mubr.f32.mxu1 %v356_v0  ;;  %v3248_v51 = vpack.c.bf16 %v786_v43, %v785_v42  ;;  %v3250_v60 = vpack.c.bf16 %v804_v50, %v803_v49  ;;  %v379_v0 = vld [vmem:[%s3682_s21 + $0x150] sm:$0xff]  ;;  %v810_v31 = vld [vmem:[%s4891_s1 + $0xbc8] sm:$0xff]  ;;  %v793_v39 = vld [vmem:[%s4891_s1 + $0xb40] sm:$0xff] }
  0xa0   : > { %3199 = vmatprep.subr.bf16.mxu1 %v3198_v56  ;;  %v3218_v56 = vpack.c.bf16 %v772_v46, %v771_v45  ;;  %v791_v23 = vld [vmem:[%s4891_s1 + $0xb30] sm:$0xff]  ;;  %v780_v43 = vld [vmem:[%s4891_s1 + $0xad8] sm:$0xff]  ;;  %v358_v46 = vld [vmem:[%s3682_s21 + $0xa8] sm:$0xff] }
  0xa1   : > { %3169 = vmatpush3.bf16.msra.mxu0 %v3168_v63  ;;  %v3220_v63 = vpack.c.bf16 %v756_v54, %v755_v53  ;;  %v779_v42 = vld [vmem:[%s4891_s1 + $0xad0] sm:$0xff]  ;;  %v812_v45 = vld [vmem:[%s4891_s1 + $0xbd8] sm:$0xff]  ;;  %v782_v57 = vld [vmem:[%s4891_s1 + $0xae8] sm:$0xff] }
  0xa2   : > { %3171 = vmatprep.subr.bf16.mxu0 %v3170_v2  ;;  %v806_v2 = vld [vmem:[%s4891_s1 + $0xba8] sm:$0xff]  ;;  %v3234_v50 = vpack.c.bf16 %v780_v43, %v779_v42  ;;  %v795_v53 = vld [vmem:[%s4891_s1 + $0xb50] sm:$0xff]  ;;  %v813_v58 = vld [vmem:[%s4891_s1 + $0xbe0] sm:$0xff] }
  0xa3   : > { %3201 = vmatpush3.bf16.msra.mxu1 %v3200_v1  ;;  %v805_v1 = vld [vmem:[%s4891_s1 + $0xba0] sm:$0xff]  ;;  %v767_v11 = vld [vmem:[%s4891_s1 + $0xa70] sm:$0xff]  ;;  %v384_v21 = vld [vmem:[%s3682_s21 + $0x178] sm:$0xff] }
  0xa4   : > { %3203 = vmatprep.subr.bf16.mxu1 %v3202_v6  ;;  %v758_v6 = vld [vmem:[%s4891_s1 + $0xa28] sm:$0xff]  ;;  %v381_v22 = vld [vmem:[%s3682_s21 + $0x160] sm:$0xff] }
  0xa5   : > { %3173 = vmatpush3.bf16.msra.mxu0 %v3172_v12  ;;  %v3254_v12 = vpack.c.bf16 %v806_v2, %v805_v1  ;;  %v3224_v16 = vpack.c.bf16 %v758_v6, %v757_v5  ;;  %v797_v1 = vld [vmem:[%s4891_s1 + $0xb60] sm:$0xff]  ;;  %v784_v5 = vld [vmem:[%s4891_s1 + $0xaf8] sm:$0xff]  ;;  %v815_v6 = vld [vmem:[%s4891_s1 + $0xbf0] sm:$0xff] }
  0xa6   : > { %3175 = vmatprep.subr.bf16.mxu0 %v3174_v14  ;;  %v775_v14 = vld [vmem:[%s4891_s1 + $0xab0] sm:$0xff] }
  0xa7   : > { %3205 = vmatpush3.bf16.msra.mxu1 %v3204_v13  ;;  %v403_v13 = vld [vmem:[%s3682_s21 + $0x210] sm:$0xff] }
  0xa8   : > { %3207 = vmatprep.subr.bf16.mxu1 %v3206_v18  ;;  %v807_v18 = vld [vmem:[%s4891_s1 + $0xbb0] sm:$0xff] }
  0xa9   : > { %3177 = vmatpush3.bf16.msra.mxu0 %v3176_v24  ;;  %v3226_v24 = vpack.c.bf16 %v776_v15, %v775_v14  ;;  %v3258_v29 = vpack.c.bf16 %v808_v19, %v807_v18  ;;  %v799_v14 = vld [vmem:[%s4891_s1 + $0xb70] sm:$0xff]  ;;  %v800_v15 = vld [vmem:[%s4891_s1 + $0xb78] sm:$0xff]  ;;  %v357_v18 = vld [vmem:[%s3682_s21 + $0xa0] sm:$0xff] }
  0xaa   : > { %3179 = vmatprep.subr.bf16.mxu0 %v3178_v26  ;;  %v777_v26 = vld [vmem:[%s4891_s1 + $0xac0] sm:$0xff]  ;;  %v359_v19 = vld [vmem:[%s3682_s21 + $0xb0] sm:$0xff] }
  0xab   : > { %3209 = vmatpush3.bf16.msra.mxu1 %v3208_v25  ;;  %v792_v25 = vld [vmem:[%s4891_s1 + $0xb38] sm:$0xff] }
  0xac   : > { %3211 = vmatprep.subr.bf16.mxu1 %v3210_v30  ;;  %v809_v30 = vld [vmem:[%s4891_s1 + $0xbc0] sm:$0xff]  ;;  %v3260_v35 = vpack.c.bf16 %v792_v25, %v791_v23  ;;  %v383_v23 = vld [vmem:[%s3682_s21 + $0x170] sm:$0xff]  ;;  %v408_v25 = vld [vmem:[%s3682_s21 + $0x238] sm:$0xff] }
  0xad   : > { %3181 = vmatpush3.bf16.msra.mxu0 %v3180_v36  ;;  %v3230_v36 = vpack.c.bf16 %v778_v27, %v777_v26  ;;  %v3262_v40 = vpack.c.bf16 %v810_v31, %v809_v30  ;;  %v405_v26 = vld [vmem:[%s3682_s21 + $0x220] sm:$0xff]  ;;  %v407_v27 = vld [vmem:[%s3682_s21 + $0x230] sm:$0xff] }
  0xae   : > { %3215 = vmatprep.subr.bf16.mxu0 %v3214_v38  ;;  %v762_v38 = vld [vmem:[%s4891_s1 + $0xa48] sm:$0xff]  ;;  %v429_v30 = vld [vmem:[%s3682_s21 + $0x2e0] sm:$0xff]  ;;  %v431_v31 = vld [vmem:[%s3682_s21 + $0x2f0] sm:$0xff] }
  0xaf   : > { %3213 = vmatpush3.bf16.msra.mxu1 %v3212_v37  ;;  %v761_v37 = vld [vmem:[%s4891_s1 + $0xa40] sm:$0xff] }
  0xb0   : > { %3247 = vmatprep.subr.bf16.mxu1 %v3246_v41  ;;  %1569 = vmatmul.mubr.f32.vlgmr.msra.gmra.mrb[32].mxu0 %v353_v44  ;;  %v794_v41 = vld [vmem:[%s4891_s1 + $0xb48] sm:$0xff]  ;;  %v811_v44 = vld [vmem:[%s4891_s1 + $0xbd0] sm:$0xff] }
  0xb1   : > { %3217 = vmatpush3.bf16.msra.mxu0 %v3216_v47  ;;  %1573 = vmatprep.mubr.f32.mxu0 %v378_v52  ;;  %v3232_v47 = vpack.c.bf16 %v762_v38, %v761_v37  ;;  %v3264_v49 = vpack.c.bf16 %v794_v41, %v793_v39  ;;  %v764_v52 = vld [vmem:[%s4891_s1 + $0xa58] sm:$0xff]  ;;  %v3266_v54 = vpack.c.bf16 %v812_v45, %v811_v44 }
  0xb2   : > { %1654 = vmatmul.mubr.f32.vlgmr.msra.gmra.mrb[32].mxu1 %v355_v48  ;;  %3219 = vmatprep.subr.bf16.mxu0 %v3218_v56  ;;  %v360_v48 = vld [vmem:[%s3682_s21 + $0xb8] sm:$0xff]  ;;  %v781_v56 = vld [vmem:[%s4891_s1 + $0xae0] sm:$0xff] }
  0xb3   : > { %3249 = vmatpush3.bf16.msra.mxu1 %v3248_v51  ;;  %1658 = vmatprep.mubr.f32.mxu1 %v380_v59  ;;  %v763_v51 = vld [vmem:[%s4891_s1 + $0xa50] sm:$0xff]  ;;  %v814_v59 = vld [vmem:[%s4891_s1 + $0xbe8] sm:$0xff]  ;;  %v3238_v62 = vpack.c.bf16 %v782_v57, %v781_v56 }
  0xb4   : > { %1574 = vmatmul.mubr.f32.gmra.mrb[34].mxu0 %v377_v55  ;;  %3251 = vmatprep.subr.bf16.mxu1 %v3250_v60  ;;  %v796_v55 = vld [vmem:[%s4891_s1 + $0xb58] sm:$0xff]  ;;  %v3236_v60 = vpack.c.bf16 %v764_v52, %v763_v51  ;;  %v3270_v2 = vpack.c.bf16 %v814_v59, %v813_v58 }
  0xb5   : > { %3221 = vmatpush3.bf16.msra.mxu0 %v3220_v63  ;;  %1578 = vmatprep.mubr.f32.mxu0 %v402_v4  ;;  %v3268_v61 = vpack.c.bf16 %v796_v55, %v795_v53  ;;  %v765_v63 = vld [vmem:[%s4891_s1 + $0xa60] sm:$0xff]  ;;  %v783_v4 = vld [vmem:[%s4891_s1 + $0xaf0] sm:$0xff] }
  0xb6   : > { %1659 = vmatmul.mubr.f32.gmra.mrb[34].mxu1 %v379_v0  ;;  %3223 = vmatprep.subr.bf16.mxu0 %v3222_v8  ;;  %v766_v0 = vld [vmem:[%s4891_s1 + $0xa68] sm:$0xff]  ;;  %v3242_v10 = vpack.c.bf16 %v784_v5, %v783_v4  ;;  %v1850_v4 = vld [vmem:[%s4893_s3 + $0x10] sm:$0xff]  ;;  %v1851_v5 = vld [vmem:[%s4893_s3 + $0x18] sm:$0xff] }
  0xb7   : > { %3253 = vmatpush3.bf16.msra.mxu1 %v3252_v3  ;;  %1663 = vmatprep.mubr.f32.mxu1 %v404_v9  ;;  %v798_v3 = vld [vmem:[%s4891_s1 + $0xb68] sm:$0xff]  ;;  %v3240_v8 = vpack.c.bf16 %v766_v0, %v765_v63 }
  0xb8   : > { %1579 = vmatmul.mubr.f32.gmra.mrb[36].mxu0 %v401_v7  ;;  %3255 = vmatprep.subr.bf16.mxu1 %v3254_v12  ;;  %v816_v7 = vld [vmem:[%s4891_s1 + $0xbf8] sm:$0xff]  ;;  %v3272_v9 = vpack.c.bf16 %v798_v3, %v797_v1  ;;  %v1848_v1 = vld [vmem:[%s4893_s3] sm:$0xff] }
  0xb9   : > { %3225 = vmatpush3.bf16.msra.mxu0 %v3224_v16  ;;  %1583 = vmatprep.mubr.f32.mxu0 %v426_v17  ;;  %v768_v12 = vld [vmem:[%s4891_s1 + $0xa78] sm:$0xff]  ;;  %v3276_v17 = vpack.c.bf16 %v800_v15, %v799_v14  ;;  %v1853_v14 = vld [vmem:[%s4893_s3 + $0x28] sm:$0xff] }
  0xba   : > { %1664 = vmatmul.mubr.f32.gmra.mrb[36].mxu1 %v403_v13  ;;  %3227 = vmatprep.subr.bf16.mxu0 %v3226_v24  ;;  %v3274_v13 = vpack.c.bf16 %v816_v7, %v815_v6  ;;  %v3244_v16 = vpack.c.bf16 %v768_v12, %v767_v11  ;;  %v406_v24 = vld [vmem:[%s3682_s21 + $0x228] sm:$0xff]  ;;  %v3282_v7 = vpack.c.bf16 %v1851_v5, %v1850_v4 }
  0xbb   : > { %3257 = vmatpush3.bf16.msra.mxu1 %v3256_v20  ;;  %1668 = vmatprep.mubr.f32.mxu1 %v428_v28  ;;  %v382_v20 = vld [vmem:[%s3682_s21 + $0x168] sm:$0xff] }
  0xbc   : > { %1584 = vmatmul.mubr.f32.gmra.mrb[38].mxu0 %v425_v32  ;;  %3259 = vmatprep.subr.bf16.mxu1 %v3258_v29  ;;  %v430_v28 = vld [vmem:[%s3682_s21 + $0x2e8] sm:$0xff]  ;;  %v432_v29 = vld [vmem:[%s3682_s21 + $0x2f8] sm:$0xff]  ;;  %s328_s21 = scalar_lea.vmem [#allocation2], %s2269_s24  ;;  %s3354_s24 = sshll.u32 %s3414_s13, 4  ;;  %s3355_s24 = int_to_ptr.vmem [resolvable:$false] %s3354_s24 }
  0xbd   : > { %3229 = vmatpush3.bf16.msra.mxu0 %v3228_v33  ;;  %1738 = vmatprep.mubr.f32.mxu0 %v358_v46  ;;  %v2272_v33 = vld [vmem:[%s4892_s2] ss:$0 sm:$0xff]  ;;  %s2203_s26 = sshll.u32 %s328_s21, 4  ;;  %s3356_s14 = scalar_lea.vmem %s3355_s24, 1024  ;;  %s4842_s26 = int_to_ptr.vmem [resolvable:$true] %s2203_s26 }
  0xbe   : > { %1669 = vmatmul.mubr.f32.gmra.mrb[38].mxu1 %v427_v34  ;;  %3231 = vmatprep.subr.bf16.mxu0 %v3230_v36  ;;  %s3350_s22 = scalar_lea.vmem %s4842_s26, 512  ;;  %p3357_p0 = scmp.lt.s32.totalorder %s4842_s26, %s3355_s24 }
  0xbf   : > { %3261 = vmatpush3.bf16.msra.mxu1 %v3260_v35  ;;  %1823 = vmatprep.mubr.f32.mxu1 %v360_v48  ;;  %p3351_p11 = scmp.ne.s32.totalorder %s4842_s26, %s3350_s22  ;;  %p3358_p1 = scmp.lt.s32.totalorder %s3356_s14, %s3350_s22 }
  0xc0   : > { %3263 = vmatprep.subr.bf16.mxu1 %v3262_v40 }
  0xc1   : > { %3233 = vmatpush3.bf16.msra.mxu0 %v3232_v47  ;;  %p3352_p12 = pnand %p3351_p11, %p3505_p5  ;;  %p3359_p2 = por %p3358_p1, %p3357_p0 }
  0xc2   : > { %3235 = vmatprep.subr.bf16.mxu0 %v3234_v50 }
  0xc3   : > { %3265 = vmatpush3.bf16.msra.mxu1 %v3264_v49  ;;  %p3353_p13 = pneg %p3352_p12 }
  0xc4   : > { %3267 = vmatprep.subr.bf16.mxu1 %v3266_v54 }
  0xc5   : > { %3237 = vmatpush3.bf16.msra.mxu0 %v3236_v60  ;;  %p3360_p3 = pnand %p3359_p2, %p3353_p13 }
  0xc6   : > { %3239 = vmatprep.subr.bf16.mxu0 %v3238_v62 }
  0xc7   : > { %3269 = vmatpush3.bf16.msra.mxu1 %v3268_v61 }
  0xc8   : > { %3271 = vmatprep.subr.bf16.mxu1 %v3270_v2  ;;  %v1849_v2 = vld [vmem:[%s4893_s3 + $0x8] sm:$0xff] }
  0xc9   : > { %3241 = vmatpush3.bf16.msra.mxu0 %v3240_v8  ;;  %v3278_v3 = vpack.c.bf16 %v1849_v2, %v1848_v1 }
  0xca   : > { %3243 = vmatprep.subr.bf16.mxu0 %v3242_v10 }
  0xcb   : > { %3273 = vmatpush3.bf16.msra.mxu1 %v3272_v9 }
  0xcc   : > { %3275 = vmatprep.subr.bf16.mxu1 %v3274_v13  ;;  %v1852_v13 = vld [vmem:[%s4893_s3 + $0x20] sm:$0xff] }
  0xcd   : > { %3245 = vmatpush3.bf16.msra.mxu0 %v3244_v16 }
  0xce   : > { %3279 = vmatprep.subr.bf16.mxu0 %v3278_v3 }
  0xcf   : > { %3277 = vmatpush3.bf16.msra.mxu1 %v3276_v17  ;;  %v3286_v17 = vpack.c.bf16 %v1853_v14, %v1852_v13 }
  0xd0   : > { %1739 = vmatmul.mubr.f32.vlgmr.msra.gmra.mrb[40].mxu0 %v357_v18 }
  0xd1   : > { %1743 = vmatprep.mubr.f32.mxu0 %v382_v20  ;;  %3281 = vmatpush3.bf16.msra.mxu0 %v3278_v3 }
  0xd2   : > { %1824 = vmatmul.mubr.f32.vlgmr.msra.gmra.mrb[40].mxu1 %v359_v19  ;;  %3283 = vmatprep.subr.bf16.mxu0 %v3282_v7 }
  0xd3   : > { %1828 = vmatprep.mubr.f32.mxu1 %v384_v21 }
  0xd4   : > { %1744 = vmatmul.mubr.f32.gmra.mrb[42].mxu0 %v381_v22 }
  0xd5   : > { %1748 = vmatprep.mubr.f32.mxu0 %v406_v24  ;;  %3285 = vmatpush3.bf16.msra.mxu0 %v3282_v7  ;;  %v1854_v24 = vld [vmem:[%s4893_s3 + $0x30] sm:$0xff] }
  0xd6   : > { %1829 = vmatmul.mubr.f32.gmra.mrb[42].mxu1 %v383_v23  ;;  %3287 = vmatprep.subr.bf16.mxu0 %v3286_v17 }
  0xd7   : > { %1833 = vmatprep.mubr.f32.mxu1 %v408_v25  ;;  %v1855_v25 = vld [vmem:[%s4893_s3 + $0x38] sm:$0xff] }
  0xd8   : > { %1749 = vmatmul.mubr.f32.gmra.mrb[44].mxu0 %v405_v26 }
  0xd9   : > { %1753 = vmatprep.mubr.f32.mxu0 %v430_v28  ;;  %3289 = vmatpush3.bf16.msra.mxu0 %v3286_v17  ;;  %v3290_v28 = vpack.c.bf16 %v1855_v25, %v1854_v24 }
  0xda   : > { %1834 = vmatmul.mubr.f32.gmra.mrb[44].mxu1 %v407_v27 }
  0xdb   : > { %1838 = vmatprep.mubr.f32.mxu1 %v432_v29  ;;  %3291 = vmatprep.subr.bf16.mxu0 %v3290_v28 }
  0xdc   : > { %1754 = vmatmul.mubr.f32.gmra.mrb[46].mxu0 %v429_v30 }
  0xdd   : > { %3293 = vmatpush3.bf16.msra.mxu0 %v3290_v28 }
  0xde   : > { %1839 = vmatmul.mubr.f32.gmra.mrb[46].mxu1 %v431_v31 }
 0x103   : > { %v2326_v32 = vpop.f32.mrb[0].mxu0 }
 0x104   : > { %v2327_v34 = vpop.f32.mrb[1].mxu0 }
 0x105   : > { %v2370_v35 = vpop.f32.mrb[0].mxu1  ;;  %v2328_v36 = vadd.f32 %v2327_v34, %v2326_v32 }
 0x106   : > { %v2371_v37 = vpop.f32.mrb[1].mxu1 }
 0x107   : > { %v2372_v38 = vadd.f32 %v2371_v37, %v2370_v35  ;;  %v891_v39 = vadd.f32 %v2328_v36, %v2272_v33  ;;  %v2329_v40 = vpop.f32.mrb[2].mxu0 }
 0x108   : > { %v2330_v41 = vpop.f32.mrb[3].mxu0 }
 0x109   : > { %v2373_v42 = vpop.f32.mrb[2].mxu1  ;;  %v976_v43 = vadd.f32 %v2372_v38, %v891_v39  ;;  %v2331_v44 = vadd.f32 %v2330_v41, %v2329_v40 }
 0x10a   : > { %v2374_v45 = vpop.f32.mrb[3].mxu1 }
 0x10b   : > { %v2375_v46 = vadd.f32 %v2374_v45, %v2373_v42  ;;  %v896_v47 = vadd.f32 %v2331_v44, %v2272_v33  ;;  %v2332_v48 = vpop.f32.mrb[4].mxu0  ;;  %v1965_v45 = vld [vmem:[%s4895_s5] sm:$0xff] }
 0x10c   : > { %v2333_v49 = vpop.f32.mrb[5].mxu0 }
 0x10d   : > { %v2376_v50 = vpop.f32.mrb[4].mxu1  ;;  %v981_v51 = vadd.f32 %v2375_v46, %v896_v47  ;;  %v2334_v52 = vadd.f32 %v2333_v49, %v2332_v48  ;;  %v1966_v46 = vld [vmem:[%s4895_s5 + $0x8] sm:$0xff] }
 0x10e   : > { %v2377_v53 = vpop.f32.mrb[5].mxu1  ;;  %v3294_v47 = vpack.c.bf16 %v1966_v46, %v1965_v45 }
 0x10f   : > { %v2378_v54 = vadd.f32 %v2377_v53, %v2376_v50  ;;  %v901_v55 = vadd.f32 %v2334_v52, %v2272_v33  ;;  %v2335_v56 = vpop.f32.mrb[6].mxu0 }
 0x110   : > { %v2336_v57 = vpop.f32.mrb[7].mxu0  ;;  %3295 = vmatprep.subr.bf16.mxu1 %v3294_v47 }
 0x111   : > { %v2379_v58 = vpop.f32.mrb[6].mxu1  ;;  %v986_v59 = vadd.f32 %v2378_v54, %v901_v55  ;;  %v2337_v60 = vadd.f32 %v2336_v57, %v2335_v56  ;;  %3297 = vmatpush3.bf16.msra.mxu1 %v3294_v47 }
 0x112   : > { %v2380_v61 = vpop.f32.mrb[7].mxu1 }
 0x113   : > { %v2381_v62 = vadd.f32 %v2380_v61, %v2379_v58  ;;  %v906_v63 = vadd.f32 %v2337_v60, %v2272_v33 }
 0x115   : > { %v991_v0 = vadd.f32 %v2381_v62, %v906_v63 }
 0x123   : > { %v2414_v6 = vpop.f32.mrb[8].mxu0 }
 0x124   : > { %v2415_v8 = vpop.f32.mrb[9].mxu0 }
 0x125   : > { %v2458_v9 = vpop.f32.mrb[8].mxu1  ;;  %v2416_v10 = vadd.f32 %v2415_v8, %v2414_v6 }
 0x126   : > { %v2459_v11 = vpop.f32.mrb[9].mxu1 }
 0x127   : > { %v2460_v12 = vadd.f32 %v2459_v11, %v2458_v9  ;;  %v1061_v15 = vadd.f32 %v2416_v10, %v976_v43  ;;  %v2417_v16 = vpop.f32.mrb[10].mxu0 }
 0x128   : > { %v2418_v18 = vpop.f32.mrb[11].mxu0 }
 0x129   : > { %v2461_v19 = vpop.f32.mrb[10].mxu1  ;;  %v1146_v20 = vadd.f32 %v2460_v12, %v1061_v15  ;;  %v2419_v21 = vadd.f32 %v2418_v18, %v2417_v16 }
 0x12a   : > { %v2462_v22 = vpop.f32.mrb[11].mxu1 }
 0x12b   : > { %v2463_v23 = vadd.f32 %v2462_v22, %v2461_v19  ;;  %v1066_v26 = vadd.f32 %v2419_v21, %v981_v51  ;;  %v2420_v27 = vpop.f32.mrb[12].mxu0 }
 0x12c   : > { %v2421_v29 = vpop.f32.mrb[13].mxu0 }
 0x12d   : > { %v2464_v30 = vpop.f32.mrb[12].mxu1  ;;  %v1151_v31 = vadd.f32 %v2463_v23, %v1066_v26  ;;  %v2422_v32 = vadd.f32 %v2421_v29, %v2420_v27 }
 0x12e   : > { %v2465_v33 = vpop.f32.mrb[13].mxu1 }
 0x12f   : > { %v2466_v34 = vadd.f32 %v2465_v33, %v2464_v30  ;;  %v1071_v35 = vadd.f32 %v2422_v32, %v986_v59  ;;  %v2423_v36 = vpop.f32.mrb[14].mxu0 }
 0x130   : > { %v2424_v37 = vpop.f32.mrb[15].mxu0 }
 0x131   : > { %v2467_v38 = vpop.f32.mrb[14].mxu1  ;;  %v1156_v39 = vadd.f32 %v2466_v34, %v1071_v35  ;;  %v2425_v40 = vadd.f32 %v2424_v37, %v2423_v36 }
 0x132   : > { %v2468_v41 = vpop.f32.mrb[15].mxu1 }
 0x133   : > { %v2469_v42 = vadd.f32 %v2468_v41, %v2467_v38  ;;  %v1076_v43 = vadd.f32 %v2425_v40, %v991_v0 }
 0x135   : > { %v1161_v44 = vadd.f32 %v2469_v42, %v1076_v43 }
 0x143   : > { %v2502_v48 = vpop.f32.mrb[16].mxu0 }
 0x144   : > { %v2503_v49 = vpop.f32.mrb[17].mxu0 }
 0x145   : > { %v2546_v50 = vpop.f32.mrb[16].mxu1  ;;  %v2504_v51 = vadd.f32 %v2503_v49, %v2502_v48 }
 0x146   : > { %v2547_v52 = vpop.f32.mrb[17].mxu1 }
 0x147   : > { %v2548_v53 = vadd.f32 %v2547_v52, %v2546_v50  ;;  %v1231_v54 = vadd.f32 %v2504_v51, %v1146_v20  ;;  %v2505_v55 = vpop.f32.mrb[18].mxu0 }
 0x148   : > { %v2506_v56 = vpop.f32.mrb[19].mxu0 }
 0x149   : > { %v2549_v57 = vpop.f32.mrb[18].mxu1  ;;  %v1316_v58 = vadd.f32 %v2548_v53, %v1231_v54  ;;  %v2507_v59 = vadd.f32 %v2506_v56, %v2505_v55 }
 0x14a   : > { %v2550_v60 = vpop.f32.mrb[19].mxu1 }
 0x14b   : > { %v2551_v61 = vadd.f32 %v2550_v60, %v2549_v57  ;;  %v1236_v62 = vadd.f32 %v2507_v59, %v1151_v31  ;;  %v2508_v63 = vpop.f32.mrb[20].mxu0 }
 0x14c   : > { %v2509_v0 = vpop.f32.mrb[21].mxu0 }
 0x14d   : > { %v2552_v1 = vpop.f32.mrb[20].mxu1  ;;  %v1321_v2 = vadd.f32 %v2551_v61, %v1236_v62  ;;  %v2510_v3 = vadd.f32 %v2509_v0, %v2508_v63 }
 0x14e   : > { %v2553_v4 = vpop.f32.mrb[21].mxu1 }
 0x14f   : > { %v2554_v5 = vadd.f32 %v2553_v4, %v2552_v1  ;;  %v1241_v6 = vadd.f32 %v2510_v3, %v1156_v39  ;;  %v2511_v7 = vpop.f32.mrb[22].mxu0 }
 0x150   : > { %v2512_v8 = vpop.f32.mrb[23].mxu0 }
 0x151   : > { %v2555_v9 = vpop.f32.mrb[22].mxu1  ;;  %v1326_v10 = vadd.f32 %v2554_v5, %v1241_v6  ;;  %v2513_v11 = vadd.f32 %v2512_v8, %v2511_v7 }
 0x152   : > { %v2556_v12 = vpop.f32.mrb[23].mxu1 }
 0x153   : > { %v2557_v13 = vadd.f32 %v2556_v12, %v2555_v9  ;;  %v1246_v14 = vadd.f32 %v2513_v11, %v1161_v44 }
 0x155   : > { %v1331_v15 = vadd.f32 %v2557_v13, %v1246_v14 }
 0x163   : > { %v2590_v16 = vpop.f32.mrb[24].mxu0 }
 0x164   : > { %v2591_v17 = vpop.f32.mrb[25].mxu0 }
 0x165   : > { %v2634_v18 = vpop.f32.mrb[24].mxu1  ;;  %v2592_v19 = vadd.f32 %v2591_v17, %v2590_v16 }
 0x166   : > { %v2635_v20 = vpop.f32.mrb[25].mxu1 }
 0x167   : > { %v2636_v21 = vadd.f32 %v2635_v20, %v2634_v18  ;;  %v1401_v22 = vadd.f32 %v2592_v19, %v1316_v58  ;;  %v2593_v23 = vpop.f32.mrb[26].mxu0 }
 0x168   : > { %v2594_v24 = vpop.f32.mrb[27].mxu0 }
 0x169   : > { %v2637_v25 = vpop.f32.mrb[26].mxu1  ;;  %v1486_v26 = vadd.f32 %v2636_v21, %v1401_v22  ;;  %v2595_v27 = vadd.f32 %v2594_v24, %v2593_v23 }
 0x16a   : > { %v2638_v28 = vpop.f32.mrb[27].mxu1 }
 0x16b   : > { %v2639_v29 = vadd.f32 %v2638_v28, %v2637_v25  ;;  %v1406_v30 = vadd.f32 %v2595_v27, %v1321_v2  ;;  %v2596_v31 = vpop.f32.mrb[28].mxu0 }
 0x16c   : > { %v2597_v32 = vpop.f32.mrb[29].mxu0 }
 0x16d   : > { %v2640_v33 = vpop.f32.mrb[28].mxu1  ;;  %v1491_v34 = vadd.f32 %v2639_v29, %v1406_v30  ;;  %v2598_v35 = vadd.f32 %v2597_v32, %v2596_v31 }
 0x16e   : > { %v2641_v36 = vpop.f32.mrb[29].mxu1 }
 0x16f   : > { %v2642_v37 = vadd.f32 %v2641_v36, %v2640_v33  ;;  %v1411_v38 = vadd.f32 %v2598_v35, %v1326_v10  ;;  %v2599_v39 = vpop.f32.mrb[30].mxu0 }
 0x170   : > { %v2600_v40 = vpop.f32.mrb[31].mxu0 }
 0x171   : > { %v2643_v41 = vpop.f32.mrb[30].mxu1  ;;  %v1496_v42 = vadd.f32 %v2642_v37, %v1411_v38  ;;  %v2601_v43 = vadd.f32 %v2600_v40, %v2599_v39 }
 0x172   : > { %v2644_v44 = vpop.f32.mrb[31].mxu1 }
 0x173   : > { %v2645_v45 = vadd.f32 %v2644_v44, %v2643_v41  ;;  %v1416_v46 = vadd.f32 %v2601_v43, %v1331_v15 }
 0x175   : > { %v1501_v47 = vadd.f32 %v2645_v45, %v1416_v46 }
 0x183   : > { %v2678_v48 = vpop.f32.mrb[32].mxu0 }
 0x184   : > { %v2679_v49 = vpop.f32.mrb[33].mxu0 }
 0x185   : > { %v2722_v50 = vpop.f32.mrb[32].mxu1  ;;  %v2680_v51 = vadd.f32 %v2679_v49, %v2678_v48 }
 0x186   : > { %v2723_v52 = vpop.f32.mrb[33].mxu1 }
 0x187   : > { %v2724_v53 = vadd.f32 %v2723_v52, %v2722_v50  ;;  %v1571_v54 = vadd.f32 %v2680_v51, %v1486_v26  ;;  %v2681_v55 = vpop.f32.mrb[34].mxu0  ;;  %v1967_v52 = vld [vmem:[%s4895_s5 + $0x10] sm:$0xff] }
 0x188   : > { %v2682_v56 = vpop.f32.mrb[35].mxu0 }
 0x189   : > { %v2725_v57 = vpop.f32.mrb[34].mxu1  ;;  %v1656_v58 = vadd.f32 %v2724_v53, %v1571_v54  ;;  %v2683_v59 = vadd.f32 %v2682_v56, %v2681_v55  ;;  %v1968_v53 = vld [vmem:[%s4895_s5 + $0x18] sm:$0xff]  ;;  %v2273_v55 = vld [vmem:[%s4894_s4] ss:$0 sm:$0xff] }
 0x18a   : > { %v2726_v60 = vpop.f32.mrb[35].mxu1  ;;  %v3298_v54 = vpack.c.bf16 %v1968_v53, %v1967_v52 }
 0x18b   : > { %v2727_v61 = vadd.f32 %v2726_v60, %v2725_v57  ;;  %v1576_v62 = vadd.f32 %v2683_v59, %v1491_v34  ;;  %v2684_v63 = vpop.f32.mrb[36].mxu0 }
 0x18c   : > { %v2685_v0 = vpop.f32.mrb[37].mxu0  ;;  %3299 = vmatprep.subr.bf16.mxu1 %v3298_v54 }
 0x18d   : > { %v2728_v1 = vpop.f32.mrb[36].mxu1  ;;  %v1661_v2 = vadd.f32 %v2727_v61, %v1576_v62  ;;  %v2686_v3 = vadd.f32 %v2685_v0, %v2684_v63  ;;  %3301 = vmatpush3.bf16.msra.mxu1 %v3298_v54 }
 0x18e   : > { %v2729_v4 = vpop.f32.mrb[37].mxu1 }
 0x18f   : > { %v2730_v5 = vadd.f32 %v2729_v4, %v2728_v1  ;;  %v1581_v6 = vadd.f32 %v2686_v3, %v1496_v42  ;;  %v2687_v7 = vpop.f32.mrb[38].mxu0  ;;  %v2078_v4 = vld [vmem:[%s4897_s7] sm:$0xff] }
 0x190   : > { %v2688_v8 = vpop.f32.mrb[39].mxu0 }
 0x191   : > { %v2731_v9 = vpop.f32.mrb[38].mxu1  ;;  %v1666_v10 = vadd.f32 %v2730_v5, %v1581_v6  ;;  %v2689_v11 = vadd.f32 %v2688_v8, %v2687_v7  ;;  %v2079_v5 = vld [vmem:[%s4897_s7 + $0x8] sm:$0xff]  ;;  %v2278_v7 = vld [vmem:[%s4896_s6] ss:$0 sm:$0xff] }
 0x192   : > { %v2732_v12 = vpop.f32.mrb[39].mxu1  ;;  %v3302_v6 = vpack.c.bf16 %v2079_v5, %v2078_v4 }
 0x193   : > { %v2733_v13 = vadd.f32 %v2732_v12, %v2731_v9  ;;  %v1586_v14 = vadd.f32 %v2689_v11, %v1501_v47 }
 0x194   : > { %3303 = vmatprep.subr.bf16.mxu0 %v3302_v6  ;;  %3306 = vmatprep.subr.bf16.mxu1 %v3302_v6 }
 0x195   : > { %v1671_v15 = vadd.f32 %v2733_v13, %v1586_v14 }
 0x1a3   : > { %v2766_v16 = vpop.f32.mrb[40].mxu0 }
 0x1a4   : > { %v2767_v17 = vpop.f32.mrb[41].mxu0 }
 0x1a5   : > { %v2810_v18 = vpop.f32.mrb[40].mxu1  ;;  %v2768_v19 = vadd.f32 %v2767_v17, %v2766_v16 }
 0x1a6   : > { %v2811_v20 = vpop.f32.mrb[41].mxu1 }
 0x1a7   : > { %v2812_v21 = vadd.f32 %v2811_v20, %v2810_v18  ;;  %v1741_v22 = vadd.f32 %v2768_v19, %v1656_v58  ;;  %v2769_v23 = vpop.f32.mrb[42].mxu0  ;;  %v2283_v20 = vld [vmem:[%s4898_s8] ss:$0 sm:$0xff] }
 0x1a8   : > { %v2770_v24 = vpop.f32.mrb[43].mxu0 }
 0x1a9   : > { %v2813_v25 = vpop.f32.mrb[42].mxu1  ;;  %v1826_v26 = vadd.f32 %v2812_v21, %v1741_v22  ;;  %v2771_v27 = vadd.f32 %v2770_v24, %v2769_v23 }
 0x1aa   : > { %v2814_v28 = vpop.f32.mrb[43].mxu1 }
 0x1ab   : > { %v2815_v29 = vadd.f32 %v2814_v28, %v2813_v25  ;;  %v1844_v30 = vmax.f32 %v1826_v26, 0.0  ;;  %v1746_v31 = vadd.f32 %v2771_v27, %v1661_v2  ;;  %v2772_v32 = vpop.f32.mrb[44].mxu0 }
 0x1ac   : > { %v2773_v33 = vpop.f32.mrb[45].mxu0 }
 0x1ad   : > { %v2816_v34 = vpop.f32.mrb[44].mxu1  ;;  %v1831_v35 = vadd.f32 %v2815_v29, %v1746_v31  ;;  %v2774_v36 = vadd.f32 %v2773_v33, %v2772_v32  ;;  %2864 = vmatprep.mubr.msk.f32.mxu0 %vm1863_vm0, %v1844_v30 }
 0x1ae   : > { %v2817_v37 = vpop.f32.mrb[45].mxu1 }
 0x1af   : > { %v2818_v38 = vadd.f32 %v2817_v37, %v2816_v34  ;;  %v1845_v39 = vmax.f32 %v1831_v35, 0.0  ;;  %v1751_v40 = vadd.f32 %v2774_v36, %v1666_v10  ;;  %v2775_v41 = vpop.f32.mrb[46].mxu0 }
 0x1b0   : > { %v2776_v42 = vpop.f32.mrb[47].mxu0 }
 0x1b1   : > { %v2819_v43 = vpop.f32.mrb[46].mxu1  ;;  %v1836_v44 = vadd.f32 %v2818_v38, %v1751_v40  ;;  %v2777_v45 = vadd.f32 %v2776_v42, %v2775_v41  ;;  %2865 = vmatmul.mubr.msk.f32.vlgmr.msra.gmra.mrb[48].mxu0 %vm1863_vm0, %v1845_v39 }
 0x1b2   : > { %v2820_v46 = vpop.f32.mrb[47].mxu1  ;;  %3305 = vmatpush3.bf16.msra.mxu0 %v3302_v6 }
 0x1b3   : > { %v2821_v47 = vadd.f32 %v2820_v46, %v2819_v43  ;;  %v1846_v48 = vmax.f32 %v1836_v44, 0.0  ;;  %v1756_v49 = vadd.f32 %v2777_v45, %v1671_v15 }
 0x1b5   : > { %v1841_v50 = vadd.f32 %v2821_v47, %v1756_v49  ;;  %2867 = vmatprep.mubr.msk.f32.mxu0 %vm1863_vm0, %v1846_v48 }
 0x1b7   : > { %v1847_v51 = vmax.f32 %v1841_v50, 0.0 }
 0x1b9   : > { %2868 = vmatmul.mubr.msk.f32.gmra.mrb[50].mxu0 %vm1863_vm0, %v1847_v51 }
 0x284   : > { %v2866_v56 = vpop.f32.mrb[48].mxu0 }
 0x285   : > { %v1948_v57 = vadd.f32 %v2866_v56, %v2273_v55  ;;  %v1942_v58 = vpop.f32.mrb[49].mxu0 }
 0x286   : > { %v1943_v59 = vadd.f32 %v2273_v55, %v1942_v58 }
 0x287   : > { %v1962_v61 = vmax.f32 %v1948_v57, 0.0 }
 0x288   : > { %v1961_v60 = vmax.f32 %v1943_v59, 0.0 }
 0x28a   : > { %2878 = vmatprep.mubr.msk.f32.mxu1 %vm1976_vm1, %v1961_v60 }
 0x28b   : > { %2879 = vmatmul.mubr.msk.f32.vlgmr.msra.gmra.mrb[48].mxu1 %vm1976_vm1, %v1962_v61 }
 0x28c   : > { %v2869_v62 = vpop.f32.mrb[50].mxu0  ;;  %3307 = vmatpush3.bf16.msra.mxu1 %v3302_v6 }
 0x28d   : > { %v1958_v63 = vadd.f32 %v2869_v62, %v2273_v55  ;;  %v1952_v0 = vpop.f32.mrb[51].mxu0 }
 0x28e   : > { %v1953_v1 = vadd.f32 %v2273_v55, %v1952_v0 }
 0x28f   : > { %v1964_v3 = vmax.f32 %v1958_v63, 0.0 }
 0x290   : > { %v1963_v2 = vmax.f32 %v1953_v1, 0.0 }
 0x292   : > { %2881 = vmatprep.mubr.msk.f32.mxu1 %vm1976_vm1, %v1963_v2 }
 0x293   : > { %2882 = vmatmul.mubr.msk.f32.gmra.mrb[50].mxu1 %vm1976_vm1, %v1964_v3 }
 0x35e   : > { %v2880_v8 = vpop.f32.mrb[48].mxu1 }
 0x35f   : > { %v2061_v9 = vadd.f32 %v2880_v8, %v2278_v7  ;;  %v2055_v10 = vpop.f32.mrb[49].mxu1 }
 0x360   : > { %v2056_v11 = vadd.f32 %v2278_v7, %v2055_v10 }
 0x361   : > { %v2075_v13 = vmax.f32 %v2061_v9, 0.0 }
 0x362   : > { %v2074_v12 = vmax.f32 %v2056_v11, 0.0 }
 0x364   : > { %2888 = vmatprep.mubr.msk.f32.mxu0 %vm2087_vm2, %v2074_v12 }
 0x365   : > { %2889 = vmatmul.mubr.msk.f32.vlgmr.msra.gmra.mrb[52].mxu0 %vm2087_vm2, %v2075_v13 }
 0x366   : > { %v2883_v14 = vpop.f32.mrb[50].mxu1 }
 0x367   : > { %v2071_v15 = vadd.f32 %v2883_v14, %v2278_v7  ;;  %v2065_v16 = vpop.f32.mrb[51].mxu1 }
 0x368   : > { %v2066_v17 = vadd.f32 %v2278_v7, %v2065_v16 }
 0x369   : > { %v2077_v19 = vmax.f32 %v2071_v15, 0.0 }
 0x36a   : > { %v2076_v18 = vmax.f32 %v2066_v17, 0.0 }
 0x36c   : > { %2891 = vmatprep.mubr.msk.f32.mxu1 %vm2087_vm2, %v2076_v18 }
 0x36d   : > { %2892 = vmatmul.mubr.msk.f32.vlgmr.msra.gmra.mrb[52].mxu1 %vm2087_vm2, %v2077_v19 }
 0x438   : > { %v2890_v21 = vpop.f32.mrb[52].mxu0 }
 0x439   : > { %v2172_v22 = vadd.f32 %v2890_v21, %v2283_v20  ;;  %v2166_v23 = vpop.f32.mrb[53].mxu0 }
 0x43a   : > { %v2167_v24 = vadd.f32 %v2283_v20, %v2166_v23 }
 0x43b   : > { %2186 = vst [vmem:[%s328_s21 + $0x8] sm:$0xff] %v2172_v22 }
 0x43c   : > { %2185 = vst [vmem:[%s328_s21] sm:$0xff] %v2167_v24 }
 0x440   : > { %v2893_v25 = vpop.f32.mrb[52].mxu1 }
 0x441   : > { %v2182_v26 = vadd.f32 %v2893_v25, %v2283_v20  ;;  %v2176_v27 = vpop.f32.mrb[53].mxu1 }
 0x442   : > { %v2177_v28 = vadd.f32 %v2283_v20, %v2176_v27 }
 0x443   : > { %2188 = vst [vmem:[%s328_s21 + $0x18] sm:$0xff] %v2182_v26 }
 0x444   : > { %2187 = vst [vmem:[%s328_s21 + $0x10] sm:$0xff] %v2177_v28 }
 0x445   : > { %3363 = shalt.err (!%p3360_p3)
}
 0x446   : > { %s3364_s23 = scalar_lea.hbm %s4847_s16, 512  ;;  %s3368_s27 = scalar_lea.hbm %s4899_s9, 1024 }
 0x447   : > { %p3365_p4 = scmp.ne.s32.totalorder %s4847_s16, %s3364_s23  ;;  %p3369_p9 = scmp.lt.u32.totalorder %s4847_s16, %s4899_s9 }
 0x448   : > { %p3370_p10 = scmp.lt.u32.totalorder %s3368_s27, %s3364_s23  ;;  %p3372_p12 = scmp.lt.u32.totalorder %s3364_s23, %s4847_s16 }
 0x449   : > { %p3366_p7 = pnand %p3365_p4, %p3505_p5 }
 0x44a   : > { %p3371_p11 = por %p3370_p10, %p3369_p9 }
 0x44b   : > { %p3367_p8 = pneg %p3366_p7 }
 0x44c   : > { %p3373_p13 = por %p3372_p12, %p3371_p11 }
 0x44e   : > { %p3374_p0 = pnand %p3373_p13, %p3367_p8 }
 0x450   : > { %3377 = shalt.err (!%p3374_p0)
}
 0x451   : > { %s3415_s22 = smov 128   ;;  %s3416_s13 = smov 8  }
 0x452   : > { %3309 = dma.vmem_to_hbm [thread:$0]  (%p3505_p5), %s4842_s26, 512, %s4847_s16, %s4849_s17, %s3415_s22, %s3415_s22, %s3416_s13  }
 0x453 PF: > { %p3315_p1 = scmp.ge.s32.totalorder %s3412_s12, 2  ;;  %s2218_s24 = sand.u32 1, %s3400_s30  }
 0x454   : > { %s2219_s14 = scalar_lea.sflag [#allocation3], %s2218_s24 }
 0x455   : > { %p3312_p2 = pnand %p3315_p1, %p3509_p6 }
 0x457   : > { %3395 = dma.done.wait (!%p3312_p2), %s2219_s14, 512  }
 0x458   : > { %3397 = vsyncadd (!%p3312_p2), %s2219_s14, 4294966784  ;;  %p19_p3 = scmp.ge.s32.totalorder %s3492_s15, 4   ;;  %s4903_s30 = smov %s3404_s10 }
 0x459   : > { %s4904_s10 = smov %s3408_s11  ;;  %s4905_s11 = smov %s3503_s18 }
 0x45a   : > { %s4906_s12 = smov %s3492_s15  ;;  %21 = sbr.rel (!%p19_p3) target bundleno = 3 (0x3), region = 91 }
 0x461   :  { %2224 = vsyncpa [#allocation3], 1 }
 0x462   :  { %2226 = vsyncpa [#allocation3 + $0x1], 1 }

// kernel: tpu_custom_call.1
= control target key start
LH: loop header
LB: loop body
LE: loop exit
PB: predicated region body
PF: predicated region fallthrough
CT: control target
= control target key end

     0   :  { %14 = vsyncpa [#allocation3], 0  ;;  %s4890_s0 = inlined_call_operand.vmem [shape: f32[64,3072], index: 0, kind: input, shape index: {}]   ;;  %s4891_s1 = inlined_call_operand.vmem [shape: f32[3072,64], index: 1, kind: input, shape index: {}]   ;;  %s4892_s2 = inlined_call_operand.vmem [shape: f32[1,64], index: 2, kind: input, shape index: {}]   ;;  %s4893_s3 = inlined_call_operand.vmem [shape: f32[64,32], index: 3, kind: input, shape index: {}]   ;;  %s4894_s4 = inlined_call_operand.vmem [shape: f32[1,32], index: 4, kind: input, shape index: {}]   ;;  %s4895_s5 = inlined_call_operand.vmem [shape: f32[32,16], index: 5, kind: input, shape index: {}]   ;;  %s4896_s6 = inlined_call_operand.vmem [shape: f32[1,16], index: 6, kind: input, shape index: {}]   ;;  %s4897_s7 = inlined_call_operand.vmem [shape: f32[16,128], index: 7, kind: input, shape index: {}]   ;;  %s4898_s8 = inlined_call_operand.vmem [shape: f32[1,128], index: 8, kind: input, shape index: {}]   ;;  %s4899_s9 = inlined_call_operand.hbm [shape: f32[64,128], index: 9, kind: output, shape index: {}]  }
   0x1   :  { %16 = vsyncpa [#allocation3 + $0x1], 0  ;;  %s3467_s30 = smov 0   ;;  %s3469_s10 = smov 0  }
   0x2   :  { %s3471_s11 = smov 0   ;;  %s3473_s12 = smov 0  }
   0x3 LB: > { %s3488_s13 = sadd.s32 4294967295, %s3412_s12   ;;  %s2265_s14 = sadd.s32 4294967294, %s3412_s12   ;;  %s3412_s12 = sphi %s3473_s12, %s4906_s12   ;;  %s3408_s11 = sphi %s3471_s11, %s4905_s11   ;;  %s3404_s10 = sphi %s3469_s10, %s4904_s10   ;;  %s3400_s30 = sphi %s3467_s30, %s4903_s30  }
   0x4   : > { %s3492_s15 = sadd.s32 1, %s3412_s12   ;;  %s223_s16 = sadd.s32 1, %s3408_s11 }
   0x5   : > { %s220_s17 = ssub.s32 %s3412_s12, %s3492_s15  ;;  %p233_p0 = scmp.ne.s32.totalorder %s3408_s11, %s3404_s10 }
   0x6   : > { %p221_p1 = scmp.eq.s32.totalorder %s220_s17, 0  ;;  %p234_p2 = scmp.eq.s32.totalorder %s3488_s13, 1 }
   0x7   : > { %p239_p3 = scmp.ne.s32.totalorder %s3404_s10, %s3400_s30  ;;  %p240_p4 = scmp.eq.s32.totalorder %s2265_s14, 1 }
   0x8   : > { %s3503_s18 = scalar_select %p221_p1, %s3408_s11, %s223_s16  }
   0x9   : > { %p3505_p5 = por %p234_p2, %p233_p0  ;;  %p3509_p6 = por %p240_p4, %p239_p3 }
   0xa   : > { %p2268_p7 = scmp.ge.s32.totalorder %s3412_s12, 1  ;;  %p292_p8 = scmp.lt.s32.totalorder %s3412_s12, 3 }
   0xc   : > { %p293_p9 = pnand %p2268_p7, %p292_p8 }
   0xd   : > { %v449_v0 = vld [vmem:[%s4891_s1 + $0x80] sm:$0xff] (!%p293_p9)  ;;  %v450_v1 = vld [vmem:[%s4891_s1 + $0x88] sm:$0xff] (!%p293_p9)  ;;  %v451_v11 = vld [vmem:[%s4891_s1 + $0x90] sm:$0xff] (!%p293_p9)  ;;  %s2270_s21 = sshll.u32 (!%p293_p9), %s3488_s13, 2  ;;  %vm1863_vm0 = vcmask (!%p293_p9), 523264   ;;  %vm1976_vm1 = vcmask (!%p293_p9), 261120  }
   0xe   : > { %296 = sbr.rel (%p293_p9) target bundleno = 1107 (0x453), region = 56  ;;  %v433_v2 = vld [vmem:[%s4891_s1] sm:$0xff] (!%p293_p9)  ;;  %v2894_v3 = vpack.c.bf16 (!%p293_p9), %v450_v1, %v449_v0  ;;  %v434_v4 = vld [vmem:[%s4891_s1 + $0x8] sm:$0xff] (!%p293_p9)  ;;  %v452_v13 = vld [vmem:[%s4891_s1 + $0x98] sm:$0xff] (!%p293_p9)  ;;  %p3581_p10 = scmp.lt.s32.totalorder (!%p293_p9), %s2270_s21, 7  ;;  %vm2087_vm2 = vcmask (!%p293_p9), 130048  }
   0xf   : > { %v481_v5 = vld [vmem:[%s4891_s1 + $0x180] sm:$0xff] (!%p293_p9)  ;;  %v482_v6 = vld [vmem:[%s4891_s1 + $0x188] sm:$0xff] (!%p293_p9)  ;;  %v2896_v7 = vpack.c.bf16 (!%p293_p9), %v434_v4, %v433_v2  ;;  %v435_v14 = vld [vmem:[%s4891_s1 + $0x10] sm:$0xff] (!%p293_p9)  ;;  %v2898_v16 = vpack.c.bf16 (!%p293_p9), %v452_v13, %v451_v11  ;;  %s326_s23 = sand.u32 (!%p293_p9), 1, %s3404_s10   ;;  %s2293_s27 = sshll.u32 (!%p293_p9), %s3488_s13, 9 }
  0x10   : > { %v2926_v8 = vpack.c.bf16 (!%p293_p9), %v482_v6, %v481_v5  ;;  %v465_v9 = vld [vmem:[%s4891_s1 + $0x100] sm:$0xff] (!%p293_p9)  ;;  %v466_v10 = vld [vmem:[%s4891_s1 + $0x108] sm:$0xff] (!%p293_p9)  ;;  %2895 = vmatprep.subr.bf16.mxu0 (!%p293_p9), %v2894_v3  ;;  %v436_v15 = vld [vmem:[%s4891_s1 + $0x18] sm:$0xff] (!%p293_p9)  ;;  %s2269_s24 = sshll.u32 (!%p293_p9), %s326_s23, 5  ;;  %s4847_s16 = scalar_lea.hbm (!%p293_p9), %s4899_s9, %s2293_s27 }
  0x11   : > { %v2928_v12 = vpack.c.bf16 (!%p293_p9), %v466_v10, %v465_v9  ;;  %2897 = vmatpush3.bf16.msra.mxu0 (!%p293_p9), %v2896_v7  ;;  %v2900_v17 = vpack.c.bf16 (!%p293_p9), %v436_v15, %v435_v14  ;;  %v483_v18 = vld [vmem:[%s4891_s1 + $0x190] sm:$0xff] (!%p293_p9)  ;;  %v484_v19 = vld [vmem:[%s4891_s1 + $0x198] sm:$0xff] (!%p293_p9)  ;;  %v453_v23 = vld [vmem:[%s4891_s1 + $0xa0] sm:$0xff] (!%p293_p9)  ;;  %s4849_s17 = scalar_lea.sflag (!%p293_p9), [#allocation3], %s326_s23  ;;  %s3414_s13 = smov (!%p293_p9), [#allocation2]  }
  0x12   : > { %2927 = vmatprep.subr.bf16.mxu1 (!%p293_p9), %v2926_v8  ;;  %v467_v20 = vld [vmem:[%s4891_s1 + $0x110] sm:$0xff] (!%p293_p9)  ;;  %v2930_v21 = vpack.c.bf16 (!%p293_p9), %v484_v19, %v483_v18  ;;  %v468_v22 = vld [vmem:[%s4891_s1 + $0x118] sm:$0xff] (!%p293_p9)  ;;  %v454_v24 = vld [vmem:[%s4891_s1 + $0xa8] sm:$0xff] (!%p293_p9)  ;;  %2899 = vmatprep.subr.bf16.mxu0 (!%p293_p9), %v2898_v16 }
  0x13   : > { %2929 = vmatpush3.bf16.msra.mxu1 (!%p293_p9), %v2928_v12  ;;  %v2932_v25 = vpack.c.bf16 (!%p293_p9), %v468_v22, %v467_v20  ;;  %v2902_v26 = vpack.c.bf16 (!%p293_p9), %v454_v24, %v453_v23  ;;  %v437_v27 = vld [vmem:[%s4891_s1 + $0x20] sm:$0xff] (!%p293_p9)  ;;  %v438_v28 = vld [vmem:[%s4891_s1 + $0x28] sm:$0xff] (!%p293_p9)  ;;  %v455_v35 = vld [vmem:[%s4891_s1 + $0xb0] sm:$0xff] (!%p293_p9) }
  0x14   : > { %v485_v29 = vld [vmem:[%s4891_s1 + $0x1a0] sm:$0xff] (!%p293_p9)  ;;  %2931 = vmatprep.subr.bf16.mxu1 (!%p293_p9), %v2930_v21  ;;  %v486_v30 = vld [vmem:[%s4891_s1 + $0x1a8] sm:$0xff] (!%p293_p9)  ;;  %v2904_v33 = vpack.c.bf16 (!%p293_p9), %v438_v28, %v437_v27  ;;  %v456_v36 = vld [vmem:[%s4891_s1 + $0xb8] sm:$0xff] (!%p293_p9) }
  0x15   : > { %v469_v31 = vld [vmem:[%s4891_s1 + $0x120] sm:$0xff]  ;;  %v470_v32 = vld [vmem:[%s4891_s1 + $0x128] sm:$0xff]  ;;  %2901 = vmatpush3.bf16.msra.mxu0 %v2900_v17  ;;  %v2934_v34 = vpack.c.bf16 %v486_v30, %v485_v29  ;;  %v439_v37 = vld [vmem:[%s4891_s1 + $0x30] sm:$0xff]  ;;  %v2906_v39 = vpack.c.bf16 %v456_v36, %v455_v35  ;;  %s4908_s21 = smov (!%p3581_p10, %s2270_s21), 7 }
  0x16   : > { %2903 = vmatprep.subr.bf16.mxu0 %v2902_v26  ;;  %v2936_v38 = vpack.c.bf16 %v470_v32, %v469_v31  ;;  %v440_v40 = vld [vmem:[%s4891_s1 + $0x38] sm:$0xff]  ;;  %v487_v41 = vld [vmem:[%s4891_s1 + $0x1b0] sm:$0xff]  ;;  %v457_v46 = vld [vmem:[%s4891_s1 + $0xc0] sm:$0xff]  ;;  %s3308_s14 = smul.u32 192, %s4908_s21 }
  0x17   : > { %2933 = vmatpush3.bf16.msra.mxu1 %v2932_v25  ;;  %v488_v42 = vld [vmem:[%s4891_s1 + $0x1b8] sm:$0xff]  ;;  %v471_v44 = vld [vmem:[%s4891_s1 + $0x130] sm:$0xff]  ;;  %v458_v47 = vld [vmem:[%s4891_s1 + $0xc8] sm:$0xff]  ;;  %v2908_v48 = vpack.c.bf16 %v440_v40, %v439_v37 }
  0x18   : > { %2935 = vmatprep.subr.bf16.mxu1 %v2934_v34  ;;  %v2938_v43 = vpack.c.bf16 %v488_v42, %v487_v41  ;;  %v472_v45 = vld [vmem:[%s4891_s1 + $0x138] sm:$0xff]  ;;  %v489_v49 = vld [vmem:[%s4891_s1 + $0x1c0] sm:$0xff]  ;;  %v490_v50 = vld [vmem:[%s4891_s1 + $0x1c8] sm:$0xff]  ;;  %v2910_v52 = vpack.c.bf16 %v458_v47, %v457_v46  ;;  %s3682_s21 = scalar_lea.vmem %s4890_s0, %s3308_s14 }
  0x19   : > { %2905 = vmatpush3.bf16.msra.mxu0 %v2904_v33  ;;  %v2940_v51 = vpack.c.bf16 %v472_v45, %v471_v44  ;;  %v441_v53 = vld [vmem:[%s4891_s1 + $0x40] sm:$0xff]  ;;  %v442_v54 = vld [vmem:[%s4891_s1 + $0x48] sm:$0xff]  ;;  %v2942_v56 = vpack.c.bf16 %v490_v50, %v489_v49  ;;  %v459_v58 = vld [vmem:[%s4891_s1 + $0xd0] sm:$0xff] }
  0x1a   : > { %2907 = vmatprep.subr.bf16.mxu0 %v2906_v39  ;;  %v473_v55 = vld [vmem:[%s4891_s1 + $0x140] sm:$0xff]  ;;  %v474_v57 = vld [vmem:[%s4891_s1 + $0x148] sm:$0xff]  ;;  %v460_v59 = vld [vmem:[%s4891_s1 + $0xd8] sm:$0xff]  ;;  %v2912_v62 = vpack.c.bf16 %v442_v54, %v441_v53 }
  0x1b   : > { %2937 = vmatpush3.bf16.msra.mxu1 %v2936_v38  ;;  %v491_v60 = vld [vmem:[%s4891_s1 + $0x1d0] sm:$0xff]  ;;  %v492_v61 = vld [vmem:[%s4891_s1 + $0x1d8] sm:$0xff]  ;;  %v2944_v63 = vpack.c.bf16 %v474_v57, %v473_v55  ;;  %v2914_v0 = vpack.c.bf16 %v460_v59, %v459_v58  ;;  %v461_v6 = vld [vmem:[%s4891_s1 + $0xe0] sm:$0xff] }
  0x1c   : > { %2939 = vmatprep.subr.bf16.mxu1 %v2938_v43  ;;  %v443_v1 = vld [vmem:[%s4891_s1 + $0x50] sm:$0xff]  ;;  %v444_v2 = vld [vmem:[%s4891_s1 + $0x58] sm:$0xff]  ;;  %v2946_v4 = vpack.c.bf16 %v492_v61, %v491_v60  ;;  %v462_v7 = vld [vmem:[%s4891_s1 + $0xe8] sm:$0xff] }
  0x1d   : > { %2909 = vmatpush3.bf16.msra.mxu0 %v2908_v48  ;;  %v475_v3 = vld [vmem:[%s4891_s1 + $0x150] sm:$0xff]  ;;  %v476_v5 = vld [vmem:[%s4891_s1 + $0x158] sm:$0xff]  ;;  %v493_v8 = vld [vmem:[%s4891_s1 + $0x1e0] sm:$0xff]  ;;  %v2916_v10 = vpack.c.bf16 %v444_v2, %v443_v1  ;;  %v2918_v14 = vpack.c.bf16 %v462_v7, %v461_v6 }
  0x1e   : > { %2911 = vmatprep.subr.bf16.mxu0 %v2910_v52  ;;  %v494_v9 = vld [vmem:[%s4891_s1 + $0x1e8] sm:$0xff]  ;;  %v445_v11 = vld [vmem:[%s4891_s1 + $0x60] sm:$0xff]  ;;  %v2948_v13 = vpack.c.bf16 %v476_v5, %v475_v3  ;;  %v463_v19 = vld [vmem:[%s4891_s1 + $0xf0] sm:$0xff] }
  0x1f   : > { %2941 = vmatpush3.bf16.msra.mxu1 %v2940_v51  ;;  %v446_v12 = vld [vmem:[%s4891_s1 + $0x68] sm:$0xff]  ;;  %v477_v15 = vld [vmem:[%s4891_s1 + $0x160] sm:$0xff]  ;;  %v2950_v18 = vpack.c.bf16 %v494_v9, %v493_v8  ;;  %v464_v20 = vld [vmem:[%s4891_s1 + $0xf8] sm:$0xff] }
  0x20   : > { %2943 = vmatprep.subr.bf16.mxu1 %v2942_v56  ;;  %v478_v16 = vld [vmem:[%s4891_s1 + $0x168] sm:$0xff]  ;;  %v340_v21 = vld [vmem:[%s3682_s21 + $0x18] sm:$0xff]  ;;  %v495_v22 = vld [vmem:[%s4891_s1 + $0x1f0] sm:$0xff]  ;;  %v2920_v24 = vpack.c.bf16 %v446_v12, %v445_v11  ;;  %v2922_v26 = vpack.c.bf16 %v464_v20, %v463_v19 }
  0x21   : > { %2913 = vmatpush3.bf16.msra.mxu0 %v2912_v62  ;;  %v338_v17 = vld [vmem:[%s3682_s21 + $0x8] sm:$0xff]  ;;  %v496_v23 = vld [vmem:[%s4891_s1 + $0x1f8] sm:$0xff]  ;;  %973 = vmatprep.mubr.f32.mxu1 %v340_v21  ;;  %v2952_v25 = vpack.c.bf16 %v478_v16, %v477_v15  ;;  %v447_v27 = vld [vmem:[%s4891_s1 + $0x70] sm:$0xff] }
  0x22   : > { %2915 = vmatprep.subr.bf16.mxu0 %v2914_v0  ;;  %888 = vmatprep.mubr.f32.mxu0 %v338_v17  ;;  %v448_v28 = vld [vmem:[%s4891_s1 + $0x78] sm:$0xff]  ;;  %v479_v29 = vld [vmem:[%s4891_s1 + $0x170] sm:$0xff]  ;;  %v2954_v30 = vpack.c.bf16 %v496_v23, %v495_v22  ;;  %v513_v32 = vld [vmem:[%s4891_s1 + $0x280] sm:$0xff] }
  0x23   : > { %2945 = vmatpush3.bf16.msra.mxu1 %v2944_v63  ;;  %v480_v31 = vld [vmem:[%s4891_s1 + $0x178] sm:$0xff]  ;;  %v514_v33 = vld [vmem:[%s4891_s1 + $0x288] sm:$0xff]  ;;  %v545_v34 = vld [vmem:[%s4891_s1 + $0x380] sm:$0xff]  ;;  %v2924_v36 = vpack.c.bf16 %v448_v28, %v447_v27 }
  0x24   : > { %2947 = vmatprep.subr.bf16.mxu1 %v2946_v4  ;;  %v546_v35 = vld [vmem:[%s4891_s1 + $0x388] sm:$0xff]  ;;  %v2956_v37 = vpack.c.bf16 %v480_v31, %v479_v29  ;;  %v2958_v38 = vpack.c.bf16 %v514_v33, %v513_v32  ;;  %v497_v39 = vld [vmem:[%s4891_s1 + $0x200] sm:$0xff]  ;;  %v515_v44 = vld [vmem:[%s4891_s1 + $0x290] sm:$0xff] }
  0x25   : > { %2917 = vmatpush3.bf16.msra.mxu0 %v2916_v10  ;;  %v498_v40 = vld [vmem:[%s4891_s1 + $0x208] sm:$0xff]  ;;  %v529_v41 = vld [vmem:[%s4891_s1 + $0x300] sm:$0xff]  ;;  %v2990_v42 = vpack.c.bf16 %v546_v35, %v545_v34  ;;  %v516_v45 = vld [vmem:[%s4891_s1 + $0x298] sm:$0xff] }
  0x26   : > { %2919 = vmatprep.subr.bf16.mxu0 %v2918_v14  ;;  %v530_v43 = vld [vmem:[%s4891_s1 + $0x308] sm:$0xff]  ;;  %v547_v46 = vld [vmem:[%s4891_s1 + $0x390] sm:$0xff]  ;;  %v548_v47 = vld [vmem:[%s4891_s1 + $0x398] sm:$0xff]  ;;  %v2960_v49 = vpack.c.bf16 %v498_v40, %v497_v39  ;;  %v2962_v52 = vpack.c.bf16 %v516_v45, %v515_v44 }
  0x27   : > { %2949 = vmatpush3.bf16.msra.mxu1 %v2948_v13  ;;  %v337_v48 = vld [vmem:[%s3682_s21] sm:$0xff]  ;;  %v339_v50 = vld [vmem:[%s3682_s21 + $0x10] sm:$0xff]  ;;  %v2992_v51 = vpack.c.bf16 %v530_v43, %v529_v41  ;;  %v500_v54 = vld [vmem:[%s4891_s1 + $0x218] sm:$0xff]  ;;  %v2994_v56 = vpack.c.bf16 %v548_v47, %v547_v46 }
  0x28   : > { %2951 = vmatprep.subr.bf16.mxu1 %v2950_v18  ;;  %v499_v53 = vld [vmem:[%s4891_s1 + $0x210] sm:$0xff]  ;;  %v532_v57 = vld [vmem:[%s4891_s1 + $0x318] sm:$0xff]  ;;  %v517_v58 = vld [vmem:[%s4891_s1 + $0x2a0] sm:$0xff] }
  0x29   : > { %2921 = vmatpush3.bf16.msra.mxu0 %v2920_v24  ;;  %v531_v55 = vld [vmem:[%s4891_s1 + $0x310] sm:$0xff]  ;;  %v518_v59 = vld [vmem:[%s4891_s1 + $0x2a8] sm:$0xff]  ;;  %v549_v60 = vld [vmem:[%s4891_s1 + $0x3a0] sm:$0xff]  ;;  %v2964_v62 = vpack.c.bf16 %v500_v54, %v499_v53 }
  0x2a   : > { %2923 = vmatprep.subr.bf16.mxu0 %v2922_v26  ;;  %v550_v61 = vld [vmem:[%s4891_s1 + $0x3a8] sm:$0xff]  ;;  %v501_v63 = vld [vmem:[%s4891_s1 + $0x220] sm:$0xff]  ;;  %v2996_v2 = vpack.c.bf16 %v532_v57, %v531_v55  ;;  %v2966_v3 = vpack.c.bf16 %v518_v59, %v517_v58  ;;  %v364_v6 = vld [vmem:[%s3682_s21 + $0xd8] sm:$0xff] }
  0x2b   : > { %2953 = vmatpush3.bf16.msra.mxu1 %v2952_v25  ;;  %v362_v0 = vld [vmem:[%s3682_s21 + $0xc8] sm:$0xff]  ;;  %v361_v1 = vld [vmem:[%s3682_s21 + $0xc0] sm:$0xff]  ;;  %v2998_v7 = vpack.c.bf16 %v550_v61, %v549_v60  ;;  %v519_v9 = vld [vmem:[%s4891_s1 + $0x2b0] sm:$0xff] }
  0x2c   : > { %2955 = vmatprep.subr.bf16.mxu1 %v2954_v30  ;;  %v502_v4 = vld [vmem:[%s4891_s1 + $0x228] sm:$0xff]  ;;  %v533_v5 = vld [vmem:[%s4891_s1 + $0x320] sm:$0xff]  ;;  %v520_v10 = vld [vmem:[%s4891_s1 + $0x2b8] sm:$0xff] }
  0x2d   : > { %2925 = vmatpush3.bf16.msra.mxu0 %v2924_v36  ;;  %v534_v8 = vld [vmem:[%s4891_s1 + $0x328] sm:$0xff]  ;;  %v551_v11 = vld [vmem:[%s4891_s1 + $0x3b0] sm:$0xff]  ;;  %v552_v12 = vld [vmem:[%s4891_s1 + $0x3b8] sm:$0xff]  ;;  %v2968_v14 = vpack.c.bf16 %v502_v4, %v501_v63  ;;  %v2970_v19 = vpack.c.bf16 %v520_v10, %v519_v9 }
  0x2e   : > { %2959 = vmatprep.subr.bf16.mxu0 %v2958_v38  ;;  %v363_v13 = vld [vmem:[%s3682_s21 + $0xd0] sm:$0xff]  ;;  %v386_v16 = vld [vmem:[%s3682_s21 + $0x188] sm:$0xff]  ;;  %v385_v17 = vld [vmem:[%s3682_s21 + $0x180] sm:$0xff]  ;;  %v3000_v18 = vpack.c.bf16 %v534_v8, %v533_v5  ;;  %v3002_v23 = vpack.c.bf16 %v552_v12, %v551_v11 }
  0x2f   : > { %2957 = vmatpush3.bf16.msra.mxu1 %v2956_v37  ;;  %v503_v15 = vld [vmem:[%s4891_s1 + $0x230] sm:$0xff]  ;;  %v504_v20 = vld [vmem:[%s4891_s1 + $0x238] sm:$0xff]  ;;  %v521_v25 = vld [vmem:[%s4891_s1 + $0x2c0] sm:$0xff] }
  0x30   : > { %2991 = vmatprep.subr.bf16.mxu1 %v2990_v42  ;;  %889 = vmatmul.mubr.f32.vlgmr.msra.gmra.mrb[0].mxu0 %v337_v48  ;;  %v535_v21 = vld [vmem:[%s4891_s1 + $0x330] sm:$0xff]  ;;  %v388_v22 = vld [vmem:[%s3682_s21 + $0x198] sm:$0xff]  ;;  %v522_v26 = vld [vmem:[%s4891_s1 + $0x2c8] sm:$0xff]  ;;  %v2972_v30 = vpack.c.bf16 %v504_v20, %v503_v15 }
  0x31   : > { %2961 = vmatpush3.bf16.msra.mxu0 %v2960_v49  ;;  %893 = vmatprep.mubr.f32.mxu0 %v362_v0  ;;  %v536_v24 = vld [vmem:[%s4891_s1 + $0x338] sm:$0xff]  ;;  %v553_v27 = vld [vmem:[%s4891_s1 + $0x3c0] sm:$0xff]  ;;  %v554_v28 = vld [vmem:[%s4891_s1 + $0x3c8] sm:$0xff]  ;;  %v2974_v35 = vpack.c.bf16 %v522_v26, %v521_v25 }
  0x32   : > { %974 = vmatmul.mubr.f32.vlgmr.msra.gmra.mrb[0].mxu1 %v339_v50  ;;  %2963 = vmatprep.subr.bf16.mxu0 %v2962_v52  ;;  %v387_v29 = vld [vmem:[%s3682_s21 + $0x190] sm:$0xff]  ;;  %v505_v31 = vld [vmem:[%s4891_s1 + $0x240] sm:$0xff]  ;;  %v410_v32 = vld [vmem:[%s3682_s21 + $0x248] sm:$0xff]  ;;  %v3004_v34 = vpack.c.bf16 %v536_v24, %v535_v21  ;;  %v3006_v39 = vpack.c.bf16 %v554_v28, %v553_v27 }
  0x33   : > { %2993 = vmatpush3.bf16.msra.mxu1 %v2992_v51  ;;  %978 = vmatprep.mubr.f32.mxu1 %v364_v6  ;;  %v409_v33 = vld [vmem:[%s3682_s21 + $0x240] sm:$0xff]  ;;  %v506_v36 = vld [vmem:[%s4891_s1 + $0x248] sm:$0xff]  ;;  %v412_v38 = vld [vmem:[%s3682_s21 + $0x258] sm:$0xff] }
  0x34   : > { %2995 = vmatprep.subr.bf16.mxu1 %v2994_v56  ;;  %894 = vmatmul.mubr.f32.gmra.mrb[2].mxu0 %v361_v1  ;;  %v537_v37 = vld [vmem:[%s4891_s1 + $0x340] sm:$0xff]  ;;  %v538_v40 = vld [vmem:[%s4891_s1 + $0x348] sm:$0xff]  ;;  %v523_v41 = vld [vmem:[%s4891_s1 + $0x2d0] sm:$0xff]  ;;  %v2976_v46 = vpack.c.bf16 %v506_v36, %v505_v31 }
  0x35   : > { %2965 = vmatpush3.bf16.msra.mxu0 %v2964_v62  ;;  %898 = vmatprep.mubr.f32.mxu0 %v386_v16  ;;  %v524_v42 = vld [vmem:[%s4891_s1 + $0x2d8] sm:$0xff]  ;;  %v555_v43 = vld [vmem:[%s4891_s1 + $0x3d0] sm:$0xff]  ;;  %v342_v48 = vld [vmem:[%s3682_s21 + $0x28] sm:$0xff]  ;;  %v3008_v49 = vpack.c.bf16 %v538_v40, %v537_v37 }
  0x36   : > { %979 = vmatmul.mubr.f32.gmra.mrb[2].mxu1 %v363_v13  ;;  %2967 = vmatprep.subr.bf16.mxu0 %v2966_v3  ;;  %v556_v44 = vld [vmem:[%s4891_s1 + $0x3d8] sm:$0xff]  ;;  %v411_v45 = vld [vmem:[%s3682_s21 + $0x250] sm:$0xff]  ;;  %v2978_v50 = vpack.c.bf16 %v524_v42, %v523_v41  ;;  %v525_v56 = vld [vmem:[%s4891_s1 + $0x2e0] sm:$0xff] }
  0x37   : > { %2997 = vmatpush3.bf16.msra.mxu1 %v2996_v2  ;;  %983 = vmatprep.mubr.f32.mxu1 %v388_v22  ;;  %v507_v47 = vld [vmem:[%s4891_s1 + $0x250] sm:$0xff]  ;;  %v508_v51 = vld [vmem:[%s4891_s1 + $0x258] sm:$0xff]  ;;  %v3010_v54 = vpack.c.bf16 %v556_v44, %v555_v43  ;;  %v526_v57 = vld [vmem:[%s4891_s1 + $0x2e8] sm:$0xff] }
  0x38   : > { %2999 = vmatprep.subr.bf16.mxu1 %v2998_v7  ;;  %899 = vmatmul.mubr.f32.gmra.mrb[4].mxu0 %v385_v17  ;;  %v539_v52 = vld [vmem:[%s4891_s1 + $0x350] sm:$0xff]  ;;  %v344_v53 = vld [vmem:[%s3682_s21 + $0x38] sm:$0xff]  ;;  %v557_v58 = vld [vmem:[%s4891_s1 + $0x3e0] sm:$0xff]  ;;  %v2980_v60 = vpack.c.bf16 %v508_v51, %v507_v47  ;;  %v2982_v62 = vpack.c.bf16 %v526_v57, %v525_v56 }
  0x39   : > { %2969 = vmatpush3.bf16.msra.mxu0 %v2968_v14  ;;  %903 = vmatprep.mubr.f32.mxu0 %v410_v32  ;;  %v540_v55 = vld [vmem:[%s4891_s1 + $0x358] sm:$0xff]  ;;  %v558_v59 = vld [vmem:[%s4891_s1 + $0x3e8] sm:$0xff]  ;;  %v509_v63 = vld [vmem:[%s4891_s1 + $0x260] sm:$0xff] }
  0x3a   : > { %984 = vmatmul.mubr.f32.gmra.mrb[4].mxu1 %v387_v29  ;;  %2971 = vmatprep.subr.bf16.mxu0 %v2970_v19  ;;  %v3012_v61 = vpack.c.bf16 %v540_v55, %v539_v52  ;;  %v510_v0 = vld [vmem:[%s4891_s1 + $0x268] sm:$0xff]  ;;  %v541_v1 = vld [vmem:[%s4891_s1 + $0x360] sm:$0xff]  ;;  %v3014_v2 = vpack.c.bf16 %v558_v59, %v557_v58  ;;  %v527_v4 = vld [vmem:[%s4891_s1 + $0x2f0] sm:$0xff] }
  0x3b   : > { %3001 = vmatpush3.bf16.msra.mxu1 %v3000_v18  ;;  %988 = vmatprep.mubr.f32.mxu1 %v412_v38  ;;  %v542_v3 = vld [vmem:[%s4891_s1 + $0x368] sm:$0xff]  ;;  %v528_v5 = vld [vmem:[%s4891_s1 + $0x2f8] sm:$0xff]  ;;  %v559_v6 = vld [vmem:[%s4891_s1 + $0x3f0] sm:$0xff]  ;;  %v2984_v8 = vpack.c.bf16 %v510_v0, %v509_v63 }
  0x3c   : > { %3003 = vmatprep.subr.bf16.mxu1 %v3002_v23  ;;  %904 = vmatmul.mubr.f32.gmra.mrb[6].mxu0 %v409_v33  ;;  %v560_v7 = vld [vmem:[%s4891_s1 + $0x3f8] sm:$0xff]  ;;  %v3016_v9 = vpack.c.bf16 %v542_v3, %v541_v1  ;;  %v2986_v10 = vpack.c.bf16 %v528_v5, %v527_v4  ;;  %v511_v11 = vld [vmem:[%s4891_s1 + $0x270] sm:$0xff]  ;;  %v577_v16 = vld [vmem:[%s4891_s1 + $0x480] sm:$0xff] }
  0x3d   : > { %2973 = vmatpush3.bf16.msra.mxu0 %v2972_v30  ;;  %1058 = vmatprep.mubr.f32.mxu0 %v342_v48  ;;  %v512_v12 = vld [vmem:[%s4891_s1 + $0x278] sm:$0xff]  ;;  %v543_v13 = vld [vmem:[%s4891_s1 + $0x370] sm:$0xff]  ;;  %v3018_v14 = vpack.c.bf16 %v560_v7, %v559_v6  ;;  %v578_v17 = vld [vmem:[%s4891_s1 + $0x488] sm:$0xff] }
  0x3e   : > { %989 = vmatmul.mubr.f32.gmra.mrb[6].mxu1 %v411_v45  ;;  %2975 = vmatprep.subr.bf16.mxu0 %v2974_v35  ;;  %v544_v15 = vld [vmem:[%s4891_s1 + $0x378] sm:$0xff]  ;;  %v609_v18 = vld [vmem:[%s4891_s1 + $0x580] sm:$0xff]  ;;  %v610_v19 = vld [vmem:[%s4891_s1 + $0x588] sm:$0xff]  ;;  %v2988_v20 = vpack.c.bf16 %v512_v12, %v511_v11  ;;  %v3022_v22 = vpack.c.bf16 %v578_v17, %v577_v16 }
  0x3f   : > { %3005 = vmatpush3.bf16.msra.mxu1 %v3004_v34  ;;  %1143 = vmatprep.mubr.f32.mxu1 %v344_v53  ;;  %v3020_v21 = vpack.c.bf16 %v544_v15, %v543_v13  ;;  %v561_v23 = vld [vmem:[%s4891_s1 + $0x400] sm:$0xff]  ;;  %v562_v24 = vld [vmem:[%s4891_s1 + $0x408] sm:$0xff]  ;;  %v3054_v25 = vpack.c.bf16 %v610_v19, %v609_v18  ;;  %v579_v29 = vld [vmem:[%s4891_s1 + $0x490] sm:$0xff] }
  0x40   : > { %3007 = vmatprep.subr.bf16.mxu1 %v3006_v39  ;;  %v593_v26 = vld [vmem:[%s4891_s1 + $0x500] sm:$0xff]  ;;  %v594_v27 = vld [vmem:[%s4891_s1 + $0x508] sm:$0xff]  ;;  %v580_v30 = vld [vmem:[%s4891_s1 + $0x498] sm:$0xff]  ;;  %v3024_v31 = vpack.c.bf16 %v562_v24, %v561_v23 }
  0x41   : > { %2977 = vmatpush3.bf16.msra.mxu0 %v2976_v46  ;;  %v341_v28 = vld [vmem:[%s3682_s21 + $0x20] sm:$0xff]  ;;  %v343_v32 = vld [vmem:[%s3682_s21 + $0x30] sm:$0xff]  ;;  %v612_v34 = vld [vmem:[%s4891_s1 + $0x598] sm:$0xff]  ;;  %v3056_v35 = vpack.c.bf16 %v594_v27, %v593_v26  ;;  %v3026_v40 = vpack.c.bf16 %v580_v30, %v579_v29 }
  0x42   : > { %2979 = vmatprep.subr.bf16.mxu0 %v2978_v50  ;;  %v611_v33 = vld [vmem:[%s4891_s1 + $0x590] sm:$0xff]  ;;  %v366_v36 = vld [vmem:[%s3682_s21 + $0xe8] sm:$0xff]  ;;  %v564_v38 = vld [vmem:[%s4891_s1 + $0x418] sm:$0xff] }
  0x43   : > { %3009 = vmatpush3.bf16.msra.mxu1 %v3008_v49  ;;  %v563_v37 = vld [vmem:[%s4891_s1 + $0x410] sm:$0xff]  ;;  %v365_v39 = vld [vmem:[%s3682_s21 + $0xe0] sm:$0xff]  ;;  %v596_v42 = vld [vmem:[%s4891_s1 + $0x518] sm:$0xff]  ;;  %v3058_v44 = vpack.c.bf16 %v612_v34, %v611_v33 }
  0x44   : > { %3011 = vmatprep.subr.bf16.mxu1 %v3010_v54  ;;  %v595_v41 = vld [vmem:[%s4891_s1 + $0x510] sm:$0xff]  ;;  %v368_v43 = vld [vmem:[%s3682_s21 + $0xf8] sm:$0xff]  ;;  %v581_v45 = vld [vmem:[%s4891_s1 + $0x4a0] sm:$0xff]  ;;  %v3028_v47 = vpack.c.bf16 %v564_v38, %v563_v37 }
  0x45   : > { %2981 = vmatpush3.bf16.msra.mxu0 %v2980_v60  ;;  %v582_v46 = vld [vmem:[%s4891_s1 + $0x4a8] sm:$0xff]  ;;  %v367_v48 = vld [vmem:[%s3682_s21 + $0xf0] sm:$0xff]  ;;  %v613_v49 = vld [vmem:[%s4891_s1 + $0x5a0] sm:$0xff]  ;;  %v3060_v51 = vpack.c.bf16 %v596_v42, %v595_v41 }
  0x46   : > { %2983 = vmatprep.subr.bf16.mxu0 %v2982_v62  ;;  %v614_v50 = vld [vmem:[%s4891_s1 + $0x5a8] sm:$0xff]  ;;  %v565_v53 = vld [vmem:[%s4891_s1 + $0x420] sm:$0xff]  ;;  %v3030_v56 = vpack.c.bf16 %v582_v46, %v581_v45  ;;  %v392_v57 = vld [vmem:[%s3682_s21 + $0x1b8] sm:$0xff] }
  0x47   : > { %3013 = vmatpush3.bf16.msra.mxu1 %v3012_v61  ;;  %v390_v52 = vld [vmem:[%s3682_s21 + $0x1a8] sm:$0xff]  ;;  %v389_v55 = vld [vmem:[%s3682_s21 + $0x1a0] sm:$0xff]  ;;  %v3062_v60 = vpack.c.bf16 %v614_v50, %v613_v49  ;;  %v391_v61 = vld [vmem:[%s3682_s21 + $0x1b0] sm:$0xff] }
  0x48   : > { %3015 = vmatprep.subr.bf16.mxu1 %v3014_v2  ;;  %v566_v54 = vld [vmem:[%s4891_s1 + $0x428] sm:$0xff]  ;;  %v597_v58 = vld [vmem:[%s4891_s1 + $0x520] sm:$0xff]  ;;  %v583_v62 = vld [vmem:[%s4891_s1 + $0x4b0] sm:$0xff] }
  0x49   : > { %2985 = vmatpush3.bf16.msra.mxu0 %v2984_v8  ;;  %v598_v59 = vld [vmem:[%s4891_s1 + $0x528] sm:$0xff]  ;;  %v584_v63 = vld [vmem:[%s4891_s1 + $0x4b8] sm:$0xff]  ;;  %v3032_v0 = vpack.c.bf16 %v566_v54, %v565_v53  ;;  %v615_v2 = vld [vmem:[%s4891_s1 + $0x5b0] sm:$0xff] }
  0x4a   : > { %2987 = vmatprep.subr.bf16.mxu0 %v2986_v10  ;;  %v414_v1 = vld [vmem:[%s3682_s21 + $0x268] sm:$0xff]  ;;  %v616_v3 = vld [vmem:[%s4891_s1 + $0x5b8] sm:$0xff]  ;;  %v3064_v4 = vpack.c.bf16 %v598_v59, %v597_v58  ;;  %v567_v5 = vld [vmem:[%s4891_s1 + $0x430] sm:$0xff]  ;;  %v3034_v8 = vpack.c.bf16 %v584_v63, %v583_v62 }
  0x4b   : > { %3017 = vmatpush3.bf16.msra.mxu1 %v3016_v9  ;;  %v568_v6 = vld [vmem:[%s4891_s1 + $0x438] sm:$0xff]  ;;  %v599_v7 = vld [vmem:[%s4891_s1 + $0x530] sm:$0xff]  ;;  %v585_v10 = vld [vmem:[%s4891_s1 + $0x4c0] sm:$0xff]  ;;  %v3066_v13 = vpack.c.bf16 %v616_v3, %v615_v2 }
  0x4c   : > { %3019 = vmatprep.subr.bf16.mxu1 %v3018_v14  ;;  %v600_v9 = vld [vmem:[%s4891_s1 + $0x538] sm:$0xff]  ;;  %v586_v11 = vld [vmem:[%s4891_s1 + $0x4c8] sm:$0xff]  ;;  %v617_v14 = vld [vmem:[%s4891_s1 + $0x5c0] sm:$0xff]  ;;  %v3036_v17 = vpack.c.bf16 %v568_v6, %v567_v5 }
  0x4d   : > { %2989 = vmatpush3.bf16.msra.mxu0 %v2988_v20  ;;  %v416_v12 = vld [vmem:[%s3682_s21 + $0x278] sm:$0xff]  ;;  %v618_v15 = vld [vmem:[%s4891_s1 + $0x5c8] sm:$0xff]  ;;  %v413_v16 = vld [vmem:[%s3682_s21 + $0x260] sm:$0xff]  ;;  %v3068_v19 = vpack.c.bf16 %v600_v9, %v599_v7  ;;  %v3038_v20 = vpack.c.bf16 %v586_v11, %v585_v10 }
  0x4e   : > { %3023 = vmatprep.subr.bf16.mxu0 %v3022_v22  ;;  %v415_v18 = vld [vmem:[%s3682_s21 + $0x270] sm:$0xff]  ;;  %v570_v22 = vld [vmem:[%s4891_s1 + $0x448] sm:$0xff]  ;;  %v601_v23 = vld [vmem:[%s4891_s1 + $0x540] sm:$0xff]  ;;  %v3070_v24 = vpack.c.bf16 %v618_v15, %v617_v14 }
  0x4f   : > { %3021 = vmatpush3.bf16.msra.mxu1 %v3020_v21  ;;  %v569_v21 = vld [vmem:[%s4891_s1 + $0x440] sm:$0xff]  ;;  %v587_v26 = vld [vmem:[%s4891_s1 + $0x4d0] sm:$0xff]  ;;  %v588_v27 = vld [vmem:[%s4891_s1 + $0x4d8] sm:$0xff] }
  0x50   : > { %3055 = vmatprep.subr.bf16.mxu1 %v3054_v25  ;;  %1059 = vmatmul.mubr.f32.vlgmr.msra.gmra.mrb[8].mxu0 %v341_v28  ;;  %v602_v25 = vld [vmem:[%s4891_s1 + $0x548] sm:$0xff]  ;;  %v619_v28 = vld [vmem:[%s4891_s1 + $0x5d0] sm:$0xff]  ;;  %v620_v29 = vld [vmem:[%s4891_s1 + $0x5d8] sm:$0xff]  ;;  %v3042_v34 = vpack.c.bf16 %v588_v27, %v587_v26 }
  0x51   : > { %3025 = vmatpush3.bf16.msra.mxu0 %v3024_v31  ;;  %1063 = vmatprep.mubr.f32.mxu0 %v366_v36  ;;  %v346_v30 = vld [vmem:[%s3682_s21 + $0x48] sm:$0xff]  ;;  %v3040_v31 = vpack.c.bf16 %v570_v22, %v569_v21  ;;  %v3072_v33 = vpack.c.bf16 %v602_v25, %v601_v23  ;;  %v572_v36 = vld [vmem:[%s4891_s1 + $0x458] sm:$0xff]  ;;  %v603_v37 = vld [vmem:[%s4891_s1 + $0x550] sm:$0xff]  ;;  %v3074_v38 = vpack.c.bf16 %v620_v29, %v619_v28 }
  0x52   : > { %1144 = vmatmul.mubr.f32.vlgmr.msra.gmra.mrb[8].mxu1 %v343_v32  ;;  %3027 = vmatprep.subr.bf16.mxu0 %v3026_v40  ;;  %v348_v32 = vld [vmem:[%s3682_s21 + $0x58] sm:$0xff]  ;;  %v589_v40 = vld [vmem:[%s4891_s1 + $0x4e0] sm:$0xff]  ;;  %v590_v41 = vld [vmem:[%s4891_s1 + $0x4e8] sm:$0xff] }
  0x53   : > { %3057 = vmatpush3.bf16.msra.mxu1 %v3056_v35  ;;  %1148 = vmatprep.mubr.f32.mxu1 %v368_v43  ;;  %v571_v35 = vld [vmem:[%s4891_s1 + $0x450] sm:$0xff]  ;;  %v621_v42 = vld [vmem:[%s4891_s1 + $0x5e0] sm:$0xff]  ;;  %v622_v43 = vld [vmem:[%s4891_s1 + $0x5e8] sm:$0xff]  ;;  %v3046_v46 = vpack.c.bf16 %v590_v41, %v589_v40 }
  0x54   : > { %1064 = vmatmul.mubr.f32.gmra.mrb[10].mxu0 %v365_v39  ;;  %3059 = vmatprep.subr.bf16.mxu1 %v3058_v44  ;;  %v604_v39 = vld [vmem:[%s4891_s1 + $0x558] sm:$0xff]  ;;  %v3044_v44 = vpack.c.bf16 %v572_v36, %v571_v35  ;;  %v605_v49 = vld [vmem:[%s4891_s1 + $0x560] sm:$0xff]  ;;  %v3078_v50 = vpack.c.bf16 %v622_v43, %v621_v42  ;;  %v623_v54 = vld [vmem:[%s4891_s1 + $0x5f0] sm:$0xff] }
  0x55   : > { %3029 = vmatpush3.bf16.msra.mxu0 %v3028_v47  ;;  %1068 = vmatprep.mubr.f32.mxu0 %v390_v52  ;;  %v3076_v45 = vpack.c.bf16 %v604_v39, %v603_v37  ;;  %v573_v47 = vld [vmem:[%s4891_s1 + $0x460] sm:$0xff]  ;;  %v591_v52 = vld [vmem:[%s4891_s1 + $0x4f0] sm:$0xff]  ;;  %v592_v53 = vld [vmem:[%s4891_s1 + $0x4f8] sm:$0xff] }
  0x56   : > { %1149 = vmatmul.mubr.f32.gmra.mrb[10].mxu1 %v367_v48  ;;  %3031 = vmatprep.subr.bf16.mxu0 %v3030_v56  ;;  %v574_v48 = vld [vmem:[%s4891_s1 + $0x468] sm:$0xff]  ;;  %v3050_v58 = vpack.c.bf16 %v592_v53, %v591_v52  ;;  %v575_v59 = vld [vmem:[%s4891_s1 + $0x470] sm:$0xff]  ;;  %v608_v63 = vld [vmem:[%s4891_s1 + $0x578] sm:$0xff] }
  0x57   : > { %3061 = vmatpush3.bf16.msra.mxu1 %v3060_v51  ;;  %1153 = vmatprep.mubr.f32.mxu1 %v392_v57  ;;  %v606_v51 = vld [vmem:[%s4891_s1 + $0x568] sm:$0xff]  ;;  %v3048_v56 = vpack.c.bf16 %v574_v48, %v573_v47  ;;  %v673_v2 = vld [vmem:[%s4891_s1 + $0x780] sm:$0xff]  ;;  %v644_v14 = vld [vmem:[%s4891_s1 + $0x698] sm:$0xff] }
  0x58   : > { %1069 = vmatmul.mubr.f32.gmra.mrb[12].mxu0 %v389_v55  ;;  %3063 = vmatprep.subr.bf16.mxu1 %v3062_v60  ;;  %v624_v55 = vld [vmem:[%s4891_s1 + $0x5f8] sm:$0xff]  ;;  %v3080_v57 = vpack.c.bf16 %v606_v51, %v605_v49  ;;  %v674_v3 = vld [vmem:[%s4891_s1 + $0x788] sm:$0xff]  ;;  %v625_v7 = vld [vmem:[%s4891_s1 + $0x600] sm:$0xff] }
  0x59   : > { %3033 = vmatpush3.bf16.msra.mxu0 %v3032_v0  ;;  %1073 = vmatprep.mubr.f32.mxu0 %v414_v1  ;;  %v576_v60 = vld [vmem:[%s4891_s1 + $0x478] sm:$0xff]  ;;  %v3082_v62 = vpack.c.bf16 %v624_v55, %v623_v54  ;;  %v641_v0 = vld [vmem:[%s4891_s1 + $0x680] sm:$0xff]  ;;  %v642_v1 = vld [vmem:[%s4891_s1 + $0x688] sm:$0xff]  ;;  %v3118_v9 = vpack.c.bf16 %v674_v3, %v673_v2 }
  0x5a   : > { %1154 = vmatmul.mubr.f32.gmra.mrb[12].mxu1 %v391_v61  ;;  %3035 = vmatprep.subr.bf16.mxu0 %v3034_v8  ;;  %v607_v61 = vld [vmem:[%s4891_s1 + $0x570] sm:$0xff]  ;;  %v3086_v6 = vpack.c.bf16 %v642_v1, %v641_v0  ;;  %v626_v8 = vld [vmem:[%s4891_s1 + $0x608] sm:$0xff]  ;;  %v657_v10 = vld [vmem:[%s4891_s1 + $0x700] sm:$0xff] }
  0x5b   : > { %3065 = vmatpush3.bf16.msra.mxu1 %v3064_v4  ;;  %1158 = vmatprep.mubr.f32.mxu1 %v416_v12  ;;  %v3052_v4 = vpack.c.bf16 %v576_v60, %v575_v59  ;;  %v3084_v5 = vpack.c.bf16 %v608_v63, %v607_v61  ;;  %v658_v11 = vld [vmem:[%s4891_s1 + $0x708] sm:$0xff]  ;;  %v345_v12 = vld [vmem:[%s3682_s21 + $0x40] sm:$0xff]  ;;  %v3088_v15 = vpack.c.bf16 %v626_v8, %v625_v7  ;;  %v627_v21 = vld [vmem:[%s4891_s1 + $0x610] sm:$0xff] }
  0x5c   : > { %1074 = vmatmul.mubr.f32.gmra.mrb[14].mxu0 %v413_v16  ;;  %3067 = vmatprep.subr.bf16.mxu1 %v3066_v13  ;;  %v643_v13 = vld [vmem:[%s4891_s1 + $0x690] sm:$0xff]  ;;  %v628_v22 = vld [vmem:[%s4891_s1 + $0x618] sm:$0xff]  ;;  %v369_v23 = vld [vmem:[%s3682_s21 + $0x100] sm:$0xff] }
  0x5d   : > { %3037 = vmatpush3.bf16.msra.mxu0 %v3036_v17  ;;  %1228 = vmatprep.mubr.f32.mxu0 %v346_v30  ;;  %v347_v16 = vld [vmem:[%s3682_s21 + $0x50] sm:$0xff]  ;;  %v660_v26 = vld [vmem:[%s4891_s1 + $0x718] sm:$0xff]  ;;  %v645_v29 = vld [vmem:[%s4891_s1 + $0x6a0] sm:$0xff] }
  0x5e   : > { %1159 = vmatmul.mubr.f32.gmra.mrb[14].mxu1 %v415_v18  ;;  %3039 = vmatprep.subr.bf16.mxu0 %v3038_v20  ;;  %v675_v17 = vld [vmem:[%s4891_s1 + $0x790] sm:$0xff]  ;;  %v676_v18 = vld [vmem:[%s4891_s1 + $0x798] sm:$0xff]  ;;  %v370_v20 = vld [vmem:[%s3682_s21 + $0x108] sm:$0xff] }
  0x5f   : > { %3069 = vmatpush3.bf16.msra.mxu1 %v3068_v19  ;;  %1313 = vmatprep.mubr.f32.mxu1 %v348_v32  ;;  %v3120_v19 = vpack.c.bf16 %v658_v11, %v657_v10  ;;  %v659_v25 = vld [vmem:[%s4891_s1 + $0x710] sm:$0xff]  ;;  %v372_v27 = vld [vmem:[%s3682_s21 + $0x118] sm:$0xff]  ;;  %v3122_v28 = vpack.c.bf16 %v676_v18, %v675_v17  ;;  %v646_v30 = vld [vmem:[%s4891_s1 + $0x6a8] sm:$0xff] }
  0x60   : > { %3071 = vmatprep.subr.bf16.mxu1 %v3070_v24  ;;  %v3090_v24 = vpack.c.bf16 %v644_v14, %v643_v13  ;;  %v371_v32 = vld [vmem:[%s3682_s21 + $0x110] sm:$0xff]  ;;  %v3124_v35 = vpack.c.bf16 %v660_v26, %v659_v25  ;;  %v394_v36 = vld [vmem:[%s3682_s21 + $0x1c8] sm:$0xff]  ;;  %v629_v37 = vld [vmem:[%s4891_s1 + $0x620] sm:$0xff]  ;;  %v3094_v40 = vpack.c.bf16 %v646_v30, %v645_v29 }
  0x61   : > { %3041 = vmatpush3.bf16.msra.mxu0 %v3040_v31  ;;  %v3092_v31 = vpack.c.bf16 %v628_v22, %v627_v21  ;;  %v393_v39 = vld [vmem:[%s3682_s21 + $0x1c0] sm:$0xff]  ;;  %v396_v41 = vld [vmem:[%s3682_s21 + $0x1d8] sm:$0xff]  ;;  %v662_v43 = vld [vmem:[%s4891_s1 + $0x728] sm:$0xff] }
  0x62   : > { %3043 = vmatprep.subr.bf16.mxu0 %v3042_v34  ;;  %v678_v34 = vld [vmem:[%s4891_s1 + $0x7a8] sm:$0xff]  ;;  %v661_v42 = vld [vmem:[%s4891_s1 + $0x720] sm:$0xff]  ;;  %v648_v47 = vld [vmem:[%s4891_s1 + $0x6b8] sm:$0xff] }
  0x63   : > { %3073 = vmatpush3.bf16.msra.mxu1 %v3072_v33  ;;  %v677_v33 = vld [vmem:[%s4891_s1 + $0x7a0] sm:$0xff]  ;;  %v418_v49 = vld [vmem:[%s3682_s21 + $0x288] sm:$0xff]  ;;  %v680_v51 = vld [vmem:[%s4891_s1 + $0x7b8] sm:$0xff]  ;;  %v3128_v52 = vpack.c.bf16 %v662_v43, %v661_v42 }
  0x64   : > { %3075 = vmatprep.subr.bf16.mxu1 %v3074_v38  ;;  %v630_v38 = vld [vmem:[%s4891_s1 + $0x628] sm:$0xff]  ;;  %v631_v53 = vld [vmem:[%s4891_s1 + $0x630] sm:$0xff]  ;;  %v632_v54 = vld [vmem:[%s4891_s1 + $0x638] sm:$0xff] }
  0x65   : > { %3045 = vmatpush3.bf16.msra.mxu0 %v3044_v44  ;;  %v3126_v44 = vpack.c.bf16 %v678_v34, %v677_v33  ;;  %v3096_v48 = vpack.c.bf16 %v630_v38, %v629_v37  ;;  %v663_v55 = vld [vmem:[%s4891_s1 + $0x730] sm:$0xff]  ;;  %v650_v59 = vld [vmem:[%s4891_s1 + $0x6c8] sm:$0xff]  ;;  %v420_v60 = vld [vmem:[%s3682_s21 + $0x298] sm:$0xff]  ;;  %v3100_v1 = vpack.c.bf16 %v632_v54, %v631_v53 }
  0x66   : > { %3047 = vmatprep.subr.bf16.mxu0 %v3046_v46  ;;  %v647_v46 = vld [vmem:[%s4891_s1 + $0x6b0] sm:$0xff]  ;;  %v682_v63 = vld [vmem:[%s4891_s1 + $0x7c8] sm:$0xff]  ;;  %v417_v0 = vld [vmem:[%s3682_s21 + $0x280] sm:$0xff] }
  0x67   : > { %3077 = vmatpush3.bf16.msra.mxu1 %v3076_v45  ;;  %v395_v45 = vld [vmem:[%s3682_s21 + $0x1d0] sm:$0xff]  ;;  %v665_v7 = vld [vmem:[%s4891_s1 + $0x740] sm:$0xff]  ;;  %v652_v11 = vld [vmem:[%s4891_s1 + $0x6d8] sm:$0xff] }
  0x68   : > { %3079 = vmatprep.subr.bf16.mxu1 %v3078_v50  ;;  %v679_v50 = vld [vmem:[%s4891_s1 + $0x7b0] sm:$0xff]  ;;  %v684_v13 = vld [vmem:[%s4891_s1 + $0x7d8] sm:$0xff]  ;;  %v350_v14 = vld [vmem:[%s3682_s21 + $0x68] sm:$0xff] }
  0x69   : > { %3049 = vmatpush3.bf16.msra.mxu0 %v3048_v56  ;;  %v3098_v56 = vpack.c.bf16 %v648_v47, %v647_v46  ;;  %v3130_v61 = vpack.c.bf16 %v680_v51, %v679_v50  ;;  %v419_v2 = vld [vmem:[%s3682_s21 + $0x290] sm:$0xff]  ;;  %v654_v25 = vld [vmem:[%s4891_s1 + $0x6e8] sm:$0xff]  ;;  %v685_v26 = vld [vmem:[%s4891_s1 + $0x7e0] sm:$0xff] }
  0x6a   : > { %3051 = vmatprep.subr.bf16.mxu0 %v3050_v58  ;;  %v649_v58 = vld [vmem:[%s4891_s1 + $0x6c0] sm:$0xff]  ;;  %v651_v10 = vld [vmem:[%s4891_s1 + $0x6d0] sm:$0xff]  ;;  %v656_v37 = vld [vmem:[%s4891_s1 + $0x6f8] sm:$0xff] }
  0x6b   : > { %3081 = vmatpush3.bf16.msra.mxu1 %v3080_v57  ;;  %v664_v57 = vld [vmem:[%s4891_s1 + $0x738] sm:$0xff]  ;;  %v3106_v18 = vpack.c.bf16 %v652_v11, %v651_v10  ;;  %v667_v21 = vld [vmem:[%s4891_s1 + $0x750] sm:$0xff]  ;;  %v669_v33 = vld [vmem:[%s4891_s1 + $0x760] sm:$0xff] }
  0x6c   : > { %3083 = vmatprep.subr.bf16.mxu1 %v3082_v62  ;;  %v681_v62 = vld [vmem:[%s4891_s1 + $0x7c0] sm:$0xff]  ;;  %v3132_v3 = vpack.c.bf16 %v664_v57, %v663_v55  ;;  %v687_v38 = vld [vmem:[%s4891_s1 + $0x7f0] sm:$0xff]  ;;  %v672_v47 = vld [vmem:[%s4891_s1 + $0x778] sm:$0xff] }
  0x6d   : > { %3053 = vmatpush3.bf16.msra.mxu0 %v3052_v4  ;;  %v3102_v4 = vpack.c.bf16 %v650_v59, %v649_v58  ;;  %v3134_v8 = vpack.c.bf16 %v682_v63, %v681_v62  ;;  %v639_v43 = vld [vmem:[%s4891_s1 + $0x670] sm:$0xff]  ;;  %v737_v50 = vld [vmem:[%s4891_s1 + $0x980] sm:$0xff]  ;;  %v738_v51 = vld [vmem:[%s4891_s1 + $0x988] sm:$0xff] }
  0x6e   : > { %3087 = vmatprep.subr.bf16.mxu0 %v3086_v6  ;;  %v634_v6 = vld [vmem:[%s4891_s1 + $0x648] sm:$0xff]  ;;  %v689_v55 = vld [vmem:[%s4891_s1 + $0x800] sm:$0xff]  ;;  %v3182_v57 = vpack.c.bf16 %v738_v51, %v737_v50  ;;  %v708_v62 = vld [vmem:[%s4891_s1 + $0x898] sm:$0xff] }
  0x6f   : > { %3085 = vmatpush3.bf16.msra.mxu1 %v3084_v5  ;;  %v633_v5 = vld [vmem:[%s4891_s1 + $0x640] sm:$0xff]  ;;  %v722_v59 = vld [vmem:[%s4891_s1 + $0x908] sm:$0xff]  ;;  %v724_v10 = vld [vmem:[%s4891_s1 + $0x918] sm:$0xff] }
  0x70   : > { %3119 = vmatprep.subr.bf16.mxu1 %v3118_v9  ;;  %1229 = vmatmul.mubr.f32.vlgmr.msra.gmra.mrb[16].mxu0 %v345_v12  ;;  %v666_v9 = vld [vmem:[%s4891_s1 + $0x748] sm:$0xff]  ;;  %v683_v12 = vld [vmem:[%s4891_s1 + $0x7d0] sm:$0xff]  ;;  %v721_v58 = vld [vmem:[%s4891_s1 + $0x900] sm:$0xff] }
  0x71   : > { %3089 = vmatpush3.bf16.msra.mxu0 %v3088_v15  ;;  %1233 = vmatprep.mubr.f32.mxu0 %v370_v20  ;;  %v3104_v15 = vpack.c.bf16 %v634_v6, %v633_v5  ;;  %v3136_v17 = vpack.c.bf16 %v666_v9, %v665_v7  ;;  %v636_v20 = vld [vmem:[%s4891_s1 + $0x658] sm:$0xff]  ;;  %v3138_v22 = vpack.c.bf16 %v684_v13, %v683_v12  ;;  %v691_v5 = vld [vmem:[%s4891_s1 + $0x810] sm:$0xff]  ;;  %v373_v7 = vld [vmem:[%s3682_s21 + $0x120] sm:$0xff] }
  0x72   : > { %1314 = vmatmul.mubr.f32.vlgmr.msra.gmra.mrb[16].mxu1 %v347_v16  ;;  %3091 = vmatprep.subr.bf16.mxu0 %v3090_v24  ;;  %v352_v16 = vld [vmem:[%s3682_s21 + $0x78] sm:$0xff]  ;;  %v653_v24 = vld [vmem:[%s4891_s1 + $0x6e0] sm:$0xff]  ;;  %v723_v9 = vld [vmem:[%s4891_s1 + $0x910] sm:$0xff] }
  0x73   : > { %3121 = vmatpush3.bf16.msra.mxu1 %v3120_v19  ;;  %1318 = vmatprep.mubr.f32.mxu1 %v372_v27  ;;  %v635_v19 = vld [vmem:[%s4891_s1 + $0x650] sm:$0xff]  ;;  %v686_v27 = vld [vmem:[%s4891_s1 + $0x7e8] sm:$0xff]  ;;  %v3110_v30 = vpack.c.bf16 %v654_v25, %v653_v24  ;;  %v692_v6 = vld [vmem:[%s4891_s1 + $0x818] sm:$0xff] }
  0x74   : > { %1234 = vmatmul.mubr.f32.gmra.mrb[18].mxu0 %v369_v23  ;;  %3123 = vmatprep.subr.bf16.mxu1 %v3122_v28  ;;  %v668_v23 = vld [vmem:[%s4891_s1 + $0x758] sm:$0xff]  ;;  %v3108_v28 = vpack.c.bf16 %v636_v20, %v635_v19  ;;  %v3142_v34 = vpack.c.bf16 %v686_v27, %v685_v26  ;;  %v709_v13 = vld [vmem:[%s4891_s1 + $0x8a0] sm:$0xff]  ;;  %v3188_v19 = vpack.c.bf16 %v724_v10, %v723_v9  ;;  %v398_v20 = vld [vmem:[%s3682_s21 + $0x1e8] sm:$0xff] }
  0x75   : > { %3093 = vmatpush3.bf16.msra.mxu0 %v3092_v31  ;;  %1238 = vmatprep.mubr.f32.mxu0 %v394_v36  ;;  %v3140_v29 = vpack.c.bf16 %v668_v23, %v667_v21  ;;  %v637_v31 = vld [vmem:[%s4891_s1 + $0x660] sm:$0xff]  ;;  %v655_v36 = vld [vmem:[%s4891_s1 + $0x6f0] sm:$0xff]  ;;  %v376_v11 = vld [vmem:[%s3682_s21 + $0x138] sm:$0xff] }
  0x76   : > { %1319 = vmatmul.mubr.f32.gmra.mrb[18].mxu1 %v371_v32  ;;  %3095 = vmatprep.subr.bf16.mxu0 %v3094_v40  ;;  %v638_v32 = vld [vmem:[%s4891_s1 + $0x668] sm:$0xff]  ;;  %v3114_v42 = vpack.c.bf16 %v656_v37, %v655_v36  ;;  %v693_v21 = vld [vmem:[%s4891_s1 + $0x820] sm:$0xff]  ;;  %v400_v25 = vld [vmem:[%s3682_s21 + $0x1f8] sm:$0xff] }
  0x77   : > { %3125 = vmatpush3.bf16.msra.mxu1 %v3124_v35  ;;  %1323 = vmatprep.mubr.f32.mxu1 %v396_v41  ;;  %v670_v35 = vld [vmem:[%s4891_s1 + $0x768] sm:$0xff]  ;;  %v3112_v40 = vpack.c.bf16 %v638_v32, %v637_v31  ;;  %v397_v23 = vld [vmem:[%s3682_s21 + $0x1e0] sm:$0xff]  ;;  %v712_v31 = vld [vmem:[%s4891_s1 + $0x8b8] sm:$0xff] }
  0x78   : > { %1239 = vmatmul.mubr.f32.gmra.mrb[20].mxu0 %v393_v39  ;;  %3127 = vmatprep.subr.bf16.mxu1 %v3126_v44  ;;  %v688_v39 = vld [vmem:[%s4891_s1 + $0x7f8] sm:$0xff]  ;;  %v3144_v41 = vpack.c.bf16 %v670_v35, %v669_v33  ;;  %v725_v26 = vld [vmem:[%s4891_s1 + $0x920] sm:$0xff]  ;;  %v726_v27 = vld [vmem:[%s4891_s1 + $0x928] sm:$0xff] }
  0x79   : > { %3097 = vmatpush3.bf16.msra.mxu0 %v3096_v48  ;;  %1243 = vmatprep.mubr.f32.mxu0 %v418_v49  ;;  %v640_v44 = vld [vmem:[%s4891_s1 + $0x678] sm:$0xff]  ;;  %v3146_v46 = vpack.c.bf16 %v688_v39, %v687_v38  ;;  %v705_v48 = vld [vmem:[%s4891_s1 + $0x880] sm:$0xff]  ;;  %v706_v49 = vld [vmem:[%s4891_s1 + $0x888] sm:$0xff]  ;;  %v3192_v36 = vpack.c.bf16 %v726_v27, %v725_v26 }
  0x7a   : > { %1324 = vmatmul.mubr.f32.gmra.mrb[20].mxu1 %v395_v45  ;;  %3099 = vmatprep.subr.bf16.mxu0 %v3098_v56  ;;  %v671_v45 = vld [vmem:[%s4891_s1 + $0x770] sm:$0xff]  ;;  %v3150_v54 = vpack.c.bf16 %v706_v49, %v705_v48  ;;  %v690_v56 = vld [vmem:[%s4891_s1 + $0x808] sm:$0xff]  ;;  %v744_v35 = vld [vmem:[%s4891_s1 + $0x9b8] sm:$0xff] }
  0x7b   : > { %3129 = vmatpush3.bf16.msra.mxu1 %v3128_v52  ;;  %1328 = vmatprep.mubr.f32.mxu1 %v420_v60  ;;  %v3116_v52 = vpack.c.bf16 %v640_v44, %v639_v43  ;;  %v3148_v53 = vpack.c.bf16 %v672_v47, %v671_v45  ;;  %v349_v60 = vld [vmem:[%s3682_s21 + $0x60] sm:$0xff]  ;;  %v3152_v63 = vpack.c.bf16 %v690_v56, %v689_v55  ;;  %v422_v33 = vld [vmem:[%s3682_s21 + $0x2a8] sm:$0xff]  ;;  %v695_v37 = vld [vmem:[%s4891_s1 + $0x830] sm:$0xff] }
  0x7c   : > { %1244 = vmatmul.mubr.f32.gmra.mrb[22].mxu0 %v417_v0  ;;  %3131 = vmatprep.subr.bf16.mxu1 %v3130_v61  ;;  %v707_v61 = vld [vmem:[%s4891_s1 + $0x890] sm:$0xff]  ;;  %v696_v38 = vld [vmem:[%s4891_s1 + $0x838] sm:$0xff]  ;;  %v714_v43 = vld [vmem:[%s4891_s1 + $0x8c8] sm:$0xff] }
  0x7d   : > { %3101 = vmatpush3.bf16.msra.mxu0 %v3100_v1  ;;  %1398 = vmatprep.mubr.f32.mxu0 %v350_v14  ;;  %v351_v0 = vld [vmem:[%s3682_s21 + $0x70] sm:$0xff]  ;;  %v710_v14 = vld [vmem:[%s4891_s1 + $0x8a8] sm:$0xff]  ;;  %v424_v44 = vld [vmem:[%s3682_s21 + $0x2b8] sm:$0xff]  ;;  %v3164_v49 = vpack.c.bf16 %v696_v38, %v695_v37 }
  0x7e   : > { %1329 = vmatmul.mubr.f32.gmra.mrb[22].mxu1 %v419_v2  ;;  %3103 = vmatprep.subr.bf16.mxu0 %v3102_v4  ;;  %v739_v1 = vld [vmem:[%s4891_s1 + $0x990] sm:$0xff]  ;;  %v740_v2 = vld [vmem:[%s4891_s1 + $0x998] sm:$0xff]  ;;  %v374_v4 = vld [vmem:[%s3682_s21 + $0x128] sm:$0xff]  ;;  %v3158_v24 = vpack.c.bf16 %v710_v14, %v709_v13 }
  0x7f   : > { %3133 = vmatpush3.bf16.msra.mxu1 %v3132_v3  ;;  %1483 = vmatprep.mubr.f32.mxu1 %v352_v16  ;;  %v3184_v3 = vpack.c.bf16 %v722_v59, %v721_v58  ;;  %v3186_v12 = vpack.c.bf16 %v740_v2, %v739_v1  ;;  %v375_v16 = vld [vmem:[%s3682_s21 + $0x130] sm:$0xff]  ;;  %v746_v47 = vld [vmem:[%s4891_s1 + $0x9c8] sm:$0xff]  ;;  %v421_v48 = vld [vmem:[%s3682_s21 + $0x2a0] sm:$0xff] }
  0x80   : > { %3135 = vmatprep.subr.bf16.mxu1 %v3134_v8  ;;  %v3154_v8 = vpack.c.bf16 %v708_v62, %v707_v61  ;;  %v727_v39 = vld [vmem:[%s4891_s1 + $0x930] sm:$0xff]  ;;  %v729_v55 = vld [vmem:[%s4891_s1 + $0x940] sm:$0xff]  ;;  %v716_v59 = vld [vmem:[%s4891_s1 + $0x8d8] sm:$0xff] }
  0x81   : > { %3105 = vmatpush3.bf16.msra.mxu0 %v3104_v15  ;;  %v3156_v15 = vpack.c.bf16 %v692_v6, %v691_v5  ;;  %v423_v50 = vld [vmem:[%s3682_s21 + $0x2b0] sm:$0xff]  ;;  %v748_v61 = vld [vmem:[%s4891_s1 + $0x9d8] sm:$0xff]  ;;  %v354_v62 = vld [vmem:[%s3682_s21 + $0x88] sm:$0xff] }
  0x82   : > { %3107 = vmatprep.subr.bf16.mxu0 %v3106_v18  ;;  %v742_v18 = vld [vmem:[%s4891_s1 + $0x9a8] sm:$0xff]  ;;  %v715_v58 = vld [vmem:[%s4891_s1 + $0x8d0] sm:$0xff]  ;;  %v749_v10 = vld [vmem:[%s4891_s1 + $0x9e0] sm:$0xff] }
  0x83   : > { %3137 = vmatpush3.bf16.msra.mxu1 %v3136_v17  ;;  %v741_v17 = vld [vmem:[%s4891_s1 + $0x9a0] sm:$0xff]  ;;  %v3170_v2 = vpack.c.bf16 %v716_v59, %v715_v58  ;;  %v731_v5 = vld [vmem:[%s4891_s1 + $0x950] sm:$0xff]  ;;  %v718_v9 = vld [vmem:[%s4891_s1 + $0x8e8] sm:$0xff] }
  0x84   : > { %3139 = vmatprep.subr.bf16.mxu1 %v3138_v22  ;;  %v694_v22 = vld [vmem:[%s4891_s1 + $0x828] sm:$0xff]  ;;  %v703_v27 = vld [vmem:[%s4891_s1 + $0x870] sm:$0xff]  ;;  %v788_v58 = vld [vmem:[%s4891_s1 + $0xb18] sm:$0xff] }
  0x85   : > { %3109 = vmatpush3.bf16.msra.mxu0 %v3108_v28  ;;  %v3190_v28 = vpack.c.bf16 %v742_v18, %v741_v17  ;;  %v3160_v32 = vpack.c.bf16 %v694_v22, %v693_v21  ;;  %v733_v17 = vld [vmem:[%s4891_s1 + $0x960] sm:$0xff]  ;;  %v720_v21 = vld [vmem:[%s4891_s1 + $0x8f8] sm:$0xff]  ;;  %v751_v22 = vld [vmem:[%s4891_s1 + $0x9f0] sm:$0xff] }
  0x86   : > { %3111 = vmatprep.subr.bf16.mxu0 %v3110_v30  ;;  %v711_v30 = vld [vmem:[%s4891_s1 + $0x8b0] sm:$0xff]  ;;  %v380_v59 = vld [vmem:[%s3682_s21 + $0x158] sm:$0xff] }
  0x87   : > { %3141 = vmatpush3.bf16.msra.mxu1 %v3140_v29  ;;  %v399_v29 = vld [vmem:[%s3682_s21 + $0x1f0] sm:$0xff] }
  0x88   : > { %3143 = vmatprep.subr.bf16.mxu1 %v3142_v34  ;;  %v743_v34 = vld [vmem:[%s4891_s1 + $0x9b0] sm:$0xff] }
  0x89   : > { %3113 = vmatpush3.bf16.msra.mxu0 %v3112_v40  ;;  %v3162_v40 = vpack.c.bf16 %v712_v31, %v711_v30  ;;  %v3194_v45 = vpack.c.bf16 %v744_v35, %v743_v34  ;;  %v736_v31 = vld [vmem:[%s4891_s1 + $0x978] sm:$0xff]  ;;  %v801_v34 = vld [vmem:[%s4891_s1 + $0xb80] sm:$0xff]  ;;  %v802_v35 = vld [vmem:[%s4891_s1 + $0xb88] sm:$0xff] }
  0x8a   : > { %3115 = vmatprep.subr.bf16.mxu0 %v3114_v42  ;;  %v713_v42 = vld [vmem:[%s4891_s1 + $0x8c0] sm:$0xff] }
  0x8b   : > { %3145 = vmatpush3.bf16.msra.mxu1 %v3144_v41  ;;  %v728_v41 = vld [vmem:[%s4891_s1 + $0x938] sm:$0xff] }
  0x8c   : > { %3147 = vmatprep.subr.bf16.mxu1 %v3146_v46  ;;  %v745_v46 = vld [vmem:[%s4891_s1 + $0x9c0] sm:$0xff]  ;;  %v3196_v51 = vpack.c.bf16 %v728_v41, %v727_v39  ;;  %v3246_v41 = vpack.c.bf16 %v802_v35, %v801_v34  ;;  %v427_v34 = vld [vmem:[%s3682_s21 + $0x2d0] sm:$0xff] }
  0x8d   : > { %3117 = vmatpush3.bf16.msra.mxu0 %v3116_v52  ;;  %v3166_v52 = vpack.c.bf16 %v714_v43, %v713_v42  ;;  %v3198_v56 = vpack.c.bf16 %v746_v47, %v745_v46  ;;  %v753_v39 = vld [vmem:[%s4891_s1 + $0xa00] sm:$0xff]  ;;  %v786_v43 = vld [vmem:[%s4891_s1 + $0xb08] sm:$0xff]  ;;  %v772_v46 = vld [vmem:[%s4891_s1 + $0xa98] sm:$0xff] }
  0x8e   : > { %3151 = vmatprep.subr.bf16.mxu0 %v3150_v54  ;;  %v698_v54 = vld [vmem:[%s4891_s1 + $0x848] sm:$0xff]  ;;  %v785_v42 = vld [vmem:[%s4891_s1 + $0xb00] sm:$0xff] }
  0x8f   : > { %3149 = vmatpush3.bf16.msra.mxu1 %v3148_v53  ;;  %v697_v53 = vld [vmem:[%s4891_s1 + $0x840] sm:$0xff] }
  0x90   : > { %3183 = vmatprep.subr.bf16.mxu1 %v3182_v57  ;;  %1399 = vmatmul.mubr.f32.vlgmr.msra.gmra.mrb[24].mxu0 %v349_v60  ;;  %v730_v57 = vld [vmem:[%s4891_s1 + $0x948] sm:$0xff]  ;;  %v747_v60 = vld [vmem:[%s4891_s1 + $0x9d0] sm:$0xff] }
  0x91   : > { %3153 = vmatpush3.bf16.msra.mxu0 %v3152_v63  ;;  %1403 = vmatprep.mubr.f32.mxu0 %v374_v4  ;;  %v3168_v63 = vpack.c.bf16 %v698_v54, %v697_v53  ;;  %v3200_v1 = vpack.c.bf16 %v730_v57, %v729_v55  ;;  %v700_v4 = vld [vmem:[%s4891_s1 + $0x858] sm:$0xff]  ;;  %v3202_v6 = vpack.c.bf16 %v748_v61, %v747_v60  ;;  %v755_v53 = vld [vmem:[%s4891_s1 + $0xa10] sm:$0xff]  ;;  %v377_v55 = vld [vmem:[%s3682_s21 + $0x140] sm:$0xff] }
  0x92   : > { %1484 = vmatmul.mubr.f32.vlgmr.msra.gmra.mrb[24].mxu1 %v351_v0  ;;  %3155 = vmatprep.subr.bf16.mxu0 %v3154_v8  ;;  %v356_v0 = vld [vmem:[%s3682_s21 + $0x98] sm:$0xff]  ;;  %v717_v8 = vld [vmem:[%s4891_s1 + $0x8e0] sm:$0xff]  ;;  %v787_v57 = vld [vmem:[%s4891_s1 + $0xb10] sm:$0xff] }
  0x93   : > { %3185 = vmatpush3.bf16.msra.mxu1 %v3184_v3  ;;  %1488 = vmatprep.mubr.f32.mxu1 %v376_v11  ;;  %v699_v3 = vld [vmem:[%s4891_s1 + $0x850] sm:$0xff]  ;;  %v750_v11 = vld [vmem:[%s4891_s1 + $0x9e8] sm:$0xff]  ;;  %v3174_v14 = vpack.c.bf16 %v718_v9, %v717_v8  ;;  %v756_v54 = vld [vmem:[%s4891_s1 + $0xa18] sm:$0xff] }
  0x94   : > { %1404 = vmatmul.mubr.f32.gmra.mrb[26].mxu0 %v373_v7  ;;  %3187 = vmatprep.subr.bf16.mxu1 %v3186_v12  ;;  %v732_v7 = vld [vmem:[%s4891_s1 + $0x958] sm:$0xff]  ;;  %v3172_v12 = vpack.c.bf16 %v700_v4, %v699_v3  ;;  %v3206_v18 = vpack.c.bf16 %v750_v11, %v749_v10  ;;  %v773_v61 = vld [vmem:[%s4891_s1 + $0xaa0] sm:$0xff]  ;;  %v3252_v3 = vpack.c.bf16 %v788_v58, %v787_v57  ;;  %v402_v4 = vld [vmem:[%s3682_s21 + $0x208] sm:$0xff] }
  0x95   : > { %3157 = vmatpush3.bf16.msra.mxu0 %v3156_v15  ;;  %1408 = vmatprep.mubr.f32.mxu0 %v398_v20  ;;  %v3204_v13 = vpack.c.bf16 %v732_v7, %v731_v5  ;;  %v701_v15 = vld [vmem:[%s4891_s1 + $0x860] sm:$0xff]  ;;  %v719_v20 = vld [vmem:[%s4891_s1 + $0x8f0] sm:$0xff]  ;;  %v404_v9 = vld [vmem:[%s3682_s21 + $0x218] sm:$0xff] }
  0x96   : > { %1489 = vmatmul.mubr.f32.gmra.mrb[26].mxu1 %v375_v16  ;;  %3159 = vmatprep.subr.bf16.mxu0 %v3158_v24  ;;  %v702_v16 = vld [vmem:[%s4891_s1 + $0x868] sm:$0xff]  ;;  %v3178_v26 = vpack.c.bf16 %v720_v21, %v719_v20  ;;  %v757_v5 = vld [vmem:[%s4891_s1 + $0xa20] sm:$0xff]  ;;  %v759_v21 = vld [vmem:[%s4891_s1 + $0xa30] sm:$0xff] }
  0x97   : > { %3189 = vmatpush3.bf16.msra.mxu1 %v3188_v19  ;;  %1493 = vmatprep.mubr.f32.mxu1 %v400_v25  ;;  %v734_v19 = vld [vmem:[%s4891_s1 + $0x968] sm:$0xff]  ;;  %v3176_v24 = vpack.c.bf16 %v702_v16, %v701_v15  ;;  %v401_v7 = vld [vmem:[%s3682_s21 + $0x200] sm:$0xff]  ;;  %v776_v15 = vld [vmem:[%s4891_s1 + $0xab8] sm:$0xff] }
  0x98   : > { %1409 = vmatmul.mubr.f32.gmra.mrb[28].mxu0 %v397_v23  ;;  %3191 = vmatprep.subr.bf16.mxu1 %v3190_v28  ;;  %v752_v23 = vld [vmem:[%s4891_s1 + $0x9f8] sm:$0xff]  ;;  %v3208_v25 = vpack.c.bf16 %v734_v19, %v733_v17  ;;  %v789_v10 = vld [vmem:[%s4891_s1 + $0xb20] sm:$0xff]  ;;  %v790_v11 = vld [vmem:[%s4891_s1 + $0xb28] sm:$0xff] }
  0x99   : > { %3161 = vmatpush3.bf16.msra.mxu0 %v3160_v32  ;;  %1413 = vmatprep.mubr.f32.mxu0 %v422_v33  ;;  %v704_v28 = vld [vmem:[%s4891_s1 + $0x878] sm:$0xff]  ;;  %v3210_v30 = vpack.c.bf16 %v752_v23, %v751_v22  ;;  %v769_v32 = vld [vmem:[%s4891_s1 + $0xa80] sm:$0xff]  ;;  %v770_v33 = vld [vmem:[%s4891_s1 + $0xa88] sm:$0xff]  ;;  %v3256_v20 = vpack.c.bf16 %v790_v11, %v789_v10 }
  0x9a   : > { %1494 = vmatmul.mubr.f32.gmra.mrb[28].mxu1 %v399_v29  ;;  %3163 = vmatprep.subr.bf16.mxu0 %v3162_v40  ;;  %v735_v29 = vld [vmem:[%s4891_s1 + $0x970] sm:$0xff]  ;;  %v3214_v38 = vpack.c.bf16 %v770_v33, %v769_v32  ;;  %v754_v40 = vld [vmem:[%s4891_s1 + $0xa08] sm:$0xff]  ;;  %v808_v19 = vld [vmem:[%s4891_s1 + $0xbb8] sm:$0xff] }
  0x9b   : > { %3193 = vmatpush3.bf16.msra.mxu1 %v3192_v36  ;;  %1498 = vmatprep.mubr.f32.mxu1 %v424_v44  ;;  %v3180_v36 = vpack.c.bf16 %v704_v28, %v703_v27  ;;  %v3212_v37 = vpack.c.bf16 %v736_v31, %v735_v29  ;;  %v353_v44 = vld [vmem:[%s3682_s21 + $0x80] sm:$0xff]  ;;  %v3216_v47 = vpack.c.bf16 %v754_v40, %v753_v39  ;;  %v426_v17 = vld [vmem:[%s3682_s21 + $0x2c8] sm:$0xff]  ;;  %v760_v22 = vld [vmem:[%s4891_s1 + $0xa38] sm:$0xff] }
  0x9c   : > { %1414 = vmatmul.mubr.f32.gmra.mrb[30].mxu0 %v421_v48  ;;  %3195 = vmatprep.subr.bf16.mxu1 %v3194_v45  ;;  %v771_v45 = vld [vmem:[%s4891_s1 + $0xa90] sm:$0xff]  ;;  %v778_v27 = vld [vmem:[%s4891_s1 + $0xac8] sm:$0xff]  ;;  %v428_v28 = vld [vmem:[%s3682_s21 + $0x2d8] sm:$0xff]  ;;  %v3228_v33 = vpack.c.bf16 %v760_v22, %v759_v21 }
  0x9d   : > { %3165 = vmatpush3.bf16.msra.mxu0 %v3164_v49  ;;  %1568 = vmatprep.mubr.f32.mxu0 %v354_v62  ;;  %v355_v48 = vld [vmem:[%s3682_s21 + $0x90] sm:$0xff]  ;;  %v774_v62 = vld [vmem:[%s4891_s1 + $0xaa8] sm:$0xff]  ;;  %v425_v32 = vld [vmem:[%s3682_s21 + $0x2c0] sm:$0xff] }
  0x9e   : > { %1499 = vmatmul.mubr.f32.gmra.mrb[30].mxu1 %v423_v50  ;;  %3167 = vmatprep.subr.bf16.mxu0 %v3166_v52  ;;  %v803_v49 = vld [vmem:[%s4891_s1 + $0xb90] sm:$0xff]  ;;  %v804_v50 = vld [vmem:[%s4891_s1 + $0xb98] sm:$0xff]  ;;  %v378_v52 = vld [vmem:[%s3682_s21 + $0x148] sm:$0xff]  ;;  %v3222_v8 = vpack.c.bf16 %v774_v62, %v773_v61 }
  0x9f   : > { %3197 = vmatpush3.bf16.msra.mxu1 %v3196_v51  ;;  %1653 = vmatprep.mubr.f32.mxu1 %v356_v0  ;;  %v3248_v51 = vpack.c.bf16 %v786_v43, %v785_v42  ;;  %v3250_v60 = vpack.c.bf16 %v804_v50, %v803_v49  ;;  %v379_v0 = vld [vmem:[%s3682_s21 + $0x150] sm:$0xff]  ;;  %v810_v31 = vld [vmem:[%s4891_s1 + $0xbc8] sm:$0xff]  ;;  %v793_v39 = vld [vmem:[%s4891_s1 + $0xb40] sm:$0xff] }
  0xa0   : > { %3199 = vmatprep.subr.bf16.mxu1 %v3198_v56  ;;  %v3218_v56 = vpack.c.bf16 %v772_v46, %v771_v45  ;;  %v791_v23 = vld [vmem:[%s4891_s1 + $0xb30] sm:$0xff]  ;;  %v780_v43 = vld [vmem:[%s4891_s1 + $0xad8] sm:$0xff]  ;;  %v358_v46 = vld [vmem:[%s3682_s21 + $0xa8] sm:$0xff] }
  0xa1   : > { %3169 = vmatpush3.bf16.msra.mxu0 %v3168_v63  ;;  %v3220_v63 = vpack.c.bf16 %v756_v54, %v755_v53  ;;  %v779_v42 = vld [vmem:[%s4891_s1 + $0xad0] sm:$0xff]  ;;  %v812_v45 = vld [vmem:[%s4891_s1 + $0xbd8] sm:$0xff]  ;;  %v782_v57 = vld [vmem:[%s4891_s1 + $0xae8] sm:$0xff] }
  0xa2   : > { %3171 = vmatprep.subr.bf16.mxu0 %v3170_v2  ;;  %v806_v2 = vld [vmem:[%s4891_s1 + $0xba8] sm:$0xff]  ;;  %v3234_v50 = vpack.c.bf16 %v780_v43, %v779_v42  ;;  %v795_v53 = vld [vmem:[%s4891_s1 + $0xb50] sm:$0xff]  ;;  %v813_v58 = vld [vmem:[%s4891_s1 + $0xbe0] sm:$0xff] }
  0xa3   : > { %3201 = vmatpush3.bf16.msra.mxu1 %v3200_v1  ;;  %v805_v1 = vld [vmem:[%s4891_s1 + $0xba0] sm:$0xff]  ;;  %v767_v11 = vld [vmem:[%s4891_s1 + $0xa70] sm:$0xff]  ;;  %v384_v21 = vld [vmem:[%s3682_s21 + $0x178] sm:$0xff] }
  0xa4   : > { %3203 = vmatprep.subr.bf16.mxu1 %v3202_v6  ;;  %v758_v6 = vld [vmem:[%s4891_s1 + $0xa28] sm:$0xff]  ;;  %v381_v22 = vld [vmem:[%s3682_s21 + $0x160] sm:$0xff] }
  0xa5   : > { %3173 = vmatpush3.bf16.msra.mxu0 %v3172_v12  ;;  %v3254_v12 = vpack.c.bf16 %v806_v2, %v805_v1  ;;  %v3224_v16 = vpack.c.bf16 %v758_v6, %v757_v5  ;;  %v797_v1 = vld [vmem:[%s4891_s1 + $0xb60] sm:$0xff]  ;;  %v784_v5 = vld [vmem:[%s4891_s1 + $0xaf8] sm:$0xff]  ;;  %v815_v6 = vld [vmem:[%s4891_s1 + $0xbf0] sm:$0xff] }
  0xa6   : > { %3175 = vmatprep.subr.bf16.mxu0 %v3174_v14  ;;  %v775_v14 = vld [vmem:[%s4891_s1 + $0xab0] sm:$0xff] }
  0xa7   : > { %3205 = vmatpush3.bf16.msra.mxu1 %v3204_v13  ;;  %v403_v13 = vld [vmem:[%s3682_s21 + $0x210] sm:$0xff] }
  0xa8   : > { %3207 = vmatprep.subr.bf16.mxu1 %v3206_v18  ;;  %v807_v18 = vld [vmem:[%s4891_s1 + $0xbb0] sm:$0xff] }
  0xa9   : > { %3177 = vmatpush3.bf16.msra.mxu0 %v3176_v24  ;;  %v3226_v24 = vpack.c.bf16 %v776_v15, %v775_v14  ;;  %v3258_v29 = vpack.c.bf16 %v808_v19, %v807_v18  ;;  %v799_v14 = vld [vmem:[%s4891_s1 + $0xb70] sm:$0xff]  ;;  %v800_v15 = vld [vmem:[%s4891_s1 + $0xb78] sm:$0xff]  ;;  %v357_v18 = vld [vmem:[%s3682_s21 + $0xa0] sm:$0xff] }
  0xaa   : > { %3179 = vmatprep.subr.bf16.mxu0 %v3178_v26  ;;  %v777_v26 = vld [vmem:[%s4891_s1 + $0xac0] sm:$0xff]  ;;  %v359_v19 = vld [vmem:[%s3682_s21 + $0xb0] sm:$0xff] }
  0xab   : > { %3209 = vmatpush3.bf16.msra.mxu1 %v3208_v25  ;;  %v792_v25 = vld [vmem:[%s4891_s1 + $0xb38] sm:$0xff] }
  0xac   : > { %3211 = vmatprep.subr.bf16.mxu1 %v3210_v30  ;;  %v809_v30 = vld [vmem:[%s4891_s1 + $0xbc0] sm:$0xff]  ;;  %v3260_v35 = vpack.c.bf16 %v792_v25, %v791_v23  ;;  %v383_v23 = vld [vmem:[%s3682_s21 + $0x170] sm:$0xff]  ;;  %v408_v25 = vld [vmem:[%s3682_s21 + $0x238] sm:$0xff] }
  0xad   : > { %3181 = vmatpush3.bf16.msra.mxu0 %v3180_v36  ;;  %v3230_v36 = vpack.c.bf16 %v778_v27, %v777_v26  ;;  %v3262_v40 = vpack.c.bf16 %v810_v31, %v809_v30  ;;  %v405_v26 = vld [vmem:[%s3682_s21 + $0x220] sm:$0xff]  ;;  %v407_v27 = vld [vmem:[%s3682_s21 + $0x230] sm:$0xff] }
  0xae   : > { %3215 = vmatprep.subr.bf16.mxu0 %v3214_v38  ;;  %v762_v38 = vld [vmem:[%s4891_s1 + $0xa48] sm:$0xff]  ;;  %v429_v30 = vld [vmem:[%s3682_s21 + $0x2e0] sm:$0xff]  ;;  %v431_v31 = vld [vmem:[%s3682_s21 + $0x2f0] sm:$0xff] }
  0xaf   : > { %3213 = vmatpush3.bf16.msra.mxu1 %v3212_v37  ;;  %v761_v37 = vld [vmem:[%s4891_s1 + $0xa40] sm:$0xff] }
  0xb0   : > { %3247 = vmatprep.subr.bf16.mxu1 %v3246_v41  ;;  %1569 = vmatmul.mubr.f32.vlgmr.msra.gmra.mrb[32].mxu0 %v353_v44  ;;  %v794_v41 = vld [vmem:[%s4891_s1 + $0xb48] sm:$0xff]  ;;  %v811_v44 = vld [vmem:[%s4891_s1 + $0xbd0] sm:$0xff] }
  0xb1   : > { %3217 = vmatpush3.bf16.msra.mxu0 %v3216_v47  ;;  %1573 = vmatprep.mubr.f32.mxu0 %v378_v52  ;;  %v3232_v47 = vpack.c.bf16 %v762_v38, %v761_v37  ;;  %v3264_v49 = vpack.c.bf16 %v794_v41, %v793_v39  ;;  %v764_v52 = vld [vmem:[%s4891_s1 + $0xa58] sm:$0xff]  ;;  %v3266_v54 = vpack.c.bf16 %v812_v45, %v811_v44 }
  0xb2   : > { %1654 = vmatmul.mubr.f32.vlgmr.msra.gmra.mrb[32].mxu1 %v355_v48  ;;  %3219 = vmatprep.subr.bf16.mxu0 %v3218_v56  ;;  %v360_v48 = vld [vmem:[%s3682_s21 + $0xb8] sm:$0xff]  ;;  %v781_v56 = vld [vmem:[%s4891_s1 + $0xae0] sm:$0xff] }
  0xb3   : > { %3249 = vmatpush3.bf16.msra.mxu1 %v3248_v51  ;;  %1658 = vmatprep.mubr.f32.mxu1 %v380_v59  ;;  %v763_v51 = vld [vmem:[%s4891_s1 + $0xa50] sm:$0xff]  ;;  %v814_v59 = vld [vmem:[%s4891_s1 + $0xbe8] sm:$0xff]  ;;  %v3238_v62 = vpack.c.bf16 %v782_v57, %v781_v56 }
  0xb4   : > { %1574 = vmatmul.mubr.f32.gmra.mrb[34].mxu0 %v377_v55  ;;  %3251 = vmatprep.subr.bf16.mxu1 %v3250_v60  ;;  %v796_v55 = vld [vmem:[%s4891_s1 + $0xb58] sm:$0xff]  ;;  %v3236_v60 = vpack.c.bf16 %v764_v52, %v763_v51  ;;  %v3270_v2 = vpack.c.bf16 %v814_v59, %v813_v58 }
  0xb5   : > { %3221 = vmatpush3.bf16.msra.mxu0 %v3220_v63  ;;  %1578 = vmatprep.mubr.f32.mxu0 %v402_v4  ;;  %v3268_v61 = vpack.c.bf16 %v796_v55, %v795_v53  ;;  %v765_v63 = vld [vmem:[%s4891_s1 + $0xa60] sm:$0xff]  ;;  %v783_v4 = vld [vmem:[%s4891_s1 + $0xaf0] sm:$0xff] }
  0xb6   : > { %1659 = vmatmul.mubr.f32.gmra.mrb[34].mxu1 %v379_v0  ;;  %3223 = vmatprep.subr.bf16.mxu0 %v3222_v8  ;;  %v766_v0 = vld [vmem:[%s4891_s1 + $0xa68] sm:$0xff]  ;;  %v3242_v10 = vpack.c.bf16 %v784_v5, %v783_v4  ;;  %v1850_v4 = vld [vmem:[%s4893_s3 + $0x10] sm:$0xff]  ;;  %v1851_v5 = vld [vmem:[%s4893_s3 + $0x18] sm:$0xff] }
  0xb7   : > { %3253 = vmatpush3.bf16.msra.mxu1 %v3252_v3  ;;  %1663 = vmatprep.mubr.f32.mxu1 %v404_v9  ;;  %v798_v3 = vld [vmem:[%s4891_s1 + $0xb68] sm:$0xff]  ;;  %v3240_v8 = vpack.c.bf16 %v766_v0, %v765_v63 }
  0xb8   : > { %1579 = vmatmul.mubr.f32.gmra.mrb[36].mxu0 %v401_v7  ;;  %3255 = vmatprep.subr.bf16.mxu1 %v3254_v12  ;;  %v816_v7 = vld [vmem:[%s4891_s1 + $0xbf8] sm:$0xff]  ;;  %v3272_v9 = vpack.c.bf16 %v798_v3, %v797_v1  ;;  %v1848_v1 = vld [vmem:[%s4893_s3] sm:$0xff] }
  0xb9   : > { %3225 = vmatpush3.bf16.msra.mxu0 %v3224_v16  ;;  %1583 = vmatprep.mubr.f32.mxu0 %v426_v17  ;;  %v768_v12 = vld [vmem:[%s4891_s1 + $0xa78] sm:$0xff]  ;;  %v3276_v17 = vpack.c.bf16 %v800_v15, %v799_v14  ;;  %v1853_v14 = vld [vmem:[%s4893_s3 + $0x28] sm:$0xff] }
  0xba   : > { %1664 = vmatmul.mubr.f32.gmra.mrb[36].mxu1 %v403_v13  ;;  %3227 = vmatprep.subr.bf16.mxu0 %v3226_v24  ;;  %v3274_v13 = vpack.c.bf16 %v816_v7, %v815_v6  ;;  %v3244_v16 = vpack.c.bf16 %v768_v12, %v767_v11  ;;  %v406_v24 = vld [vmem:[%s3682_s21 + $0x228] sm:$0xff]  ;;  %v3282_v7 = vpack.c.bf16 %v1851_v5, %v1850_v4 }
  0xbb   : > { %3257 = vmatpush3.bf16.msra.mxu1 %v3256_v20  ;;  %1668 = vmatprep.mubr.f32.mxu1 %v428_v28  ;;  %v382_v20 = vld [vmem:[%s3682_s21 + $0x168] sm:$0xff] }
  0xbc   : > { %1584 = vmatmul.mubr.f32.gmra.mrb[38].mxu0 %v425_v32  ;;  %3259 = vmatprep.subr.bf16.mxu1 %v3258_v29  ;;  %v430_v28 = vld [vmem:[%s3682_s21 + $0x2e8] sm:$0xff]  ;;  %v432_v29 = vld [vmem:[%s3682_s21 + $0x2f8] sm:$0xff]  ;;  %s328_s21 = scalar_lea.vmem [#allocation2], %s2269_s24  ;;  %s3354_s24 = sshll.u32 %s3414_s13, 4  ;;  %s3355_s24 = int_to_ptr.vmem [resolvable:$false] %s3354_s24 }
  0xbd   : > { %3229 = vmatpush3.bf16.msra.mxu0 %v3228_v33  ;;  %1738 = vmatprep.mubr.f32.mxu0 %v358_v46  ;;  %v2272_v33 = vld [vmem:[%s4892_s2] ss:$0 sm:$0xff]  ;;  %s2203_s26 = sshll.u32 %s328_s21, 4  ;;  %s3356_s14 = scalar_lea.vmem %s3355_s24, 1024  ;;  %s4842_s26 = int_to_ptr.vmem [resolvable:$true] %s2203_s26 }
  0xbe   : > { %1669 = vmatmul.mubr.f32.gmra.mrb[38].mxu1 %v427_v34  ;;  %3231 = vmatprep.subr.bf16.mxu0 %v3230_v36  ;;  %s3350_s22 = scalar_lea.vmem %s4842_s26, 512  ;;  %p3357_p0 = scmp.lt.s32.totalorder %s4842_s26, %s3355_s24 }
  0xbf   : > { %3261 = vmatpush3.bf16.msra.mxu1 %v3260_v35  ;;  %1823 = vmatprep.mubr.f32.mxu1 %v360_v48  ;;  %p3351_p11 = scmp.ne.s32.totalorder %s4842_s26, %s3350_s22  ;;  %p3358_p1 = scmp.lt.s32.totalorder %s3356_s14, %s3350_s22 }
  0xc0   : > { %3263 = vmatprep.subr.bf16.mxu1 %v3262_v40 }
  0xc1   : > { %3233 = vmatpush3.bf16.msra.mxu0 %v3232_v47  ;;  %p3352_p12 = pnand %p3351_p11, %p3505_p5  ;;  %p3359_p2 = por %p3358_p1, %p3357_p0 }
  0xc2   : > { %3235 = vmatprep.subr.bf16.mxu0 %v3234_v50 }
  0xc3   : > { %3265 = vmatpush3.bf16.msra.mxu1 %v3264_v49  ;;  %p3353_p13 = pneg %p3352_p12 }
  0xc4   : > { %3267 = vmatprep.subr.bf16.mxu1 %v3266_v54 }
  0xc5   : > { %3237 = vmatpush3.bf16.msra.mxu0 %v3236_v60  ;;  %p3360_p3 = pnand %p3359_p2, %p3353_p13 }
  0xc6   : > { %3239 = vmatprep.subr.bf16.mxu0 %v3238_v62 }
  0xc7   : > { %3269 = vmatpush3.bf16.msra.mxu1 %v3268_v61 }
  0xc8   : > { %3271 = vmatprep.subr.bf16.mxu1 %v3270_v2  ;;  %v1849_v2 = vld [vmem:[%s4893_s3 + $0x8] sm:$0xff] }
  0xc9   : > { %3241 = vmatpush3.bf16.msra.mxu0 %v3240_v8  ;;  %v3278_v3 = vpack.c.bf16 %v1849_v2, %v1848_v1 }
  0xca   : > { %3243 = vmatprep.subr.bf16.mxu0 %v3242_v10 }
  0xcb   : > { %3273 = vmatpush3.bf16.msra.mxu1 %v3272_v9 }
  0xcc   : > { %3275 = vmatprep.subr.bf16.mxu1 %v3274_v13  ;;  %v1852_v13 = vld [vmem:[%s4893_s3 + $0x20] sm:$0xff] }
  0xcd   : > { %3245 = vmatpush3.bf16.msra.mxu0 %v3244_v16 }
  0xce   : > { %3279 = vmatprep.subr.bf16.mxu0 %v3278_v3 }
  0xcf   : > { %3277 = vmatpush3.bf16.msra.mxu1 %v3276_v17  ;;  %v3286_v17 = vpack.c.bf16 %v1853_v14, %v1852_v13 }
  0xd0   : > { %1739 = vmatmul.mubr.f32.vlgmr.msra.gmra.mrb[40].mxu0 %v357_v18 }
  0xd1   : > { %1743 = vmatprep.mubr.f32.mxu0 %v382_v20  ;;  %3281 = vmatpush3.bf16.msra.mxu0 %v3278_v3 }
  0xd2   : > { %1824 = vmatmul.mubr.f32.vlgmr.msra.gmra.mrb[40].mxu1 %v359_v19  ;;  %3283 = vmatprep.subr.bf16.mxu0 %v3282_v7 }
  0xd3   : > { %1828 = vmatprep.mubr.f32.mxu1 %v384_v21 }
  0xd4   : > { %1744 = vmatmul.mubr.f32.gmra.mrb[42].mxu0 %v381_v22 }
  0xd5   : > { %1748 = vmatprep.mubr.f32.mxu0 %v406_v24  ;;  %3285 = vmatpush3.bf16.msra.mxu0 %v3282_v7  ;;  %v1854_v24 = vld [vmem:[%s4893_s3 + $0x30] sm:$0xff] }
  0xd6   : > { %1829 = vmatmul.mubr.f32.gmra.mrb[42].mxu1 %v383_v23  ;;  %3287 = vmatprep.subr.bf16.mxu0 %v3286_v17 }
  0xd7   : > { %1833 = vmatprep.mubr.f32.mxu1 %v408_v25  ;;  %v1855_v25 = vld [vmem:[%s4893_s3 + $0x38] sm:$0xff] }
  0xd8   : > { %1749 = vmatmul.mubr.f32.gmra.mrb[44].mxu0 %v405_v26 }
  0xd9   : > { %1753 = vmatprep.mubr.f32.mxu0 %v430_v28  ;;  %3289 = vmatpush3.bf16.msra.mxu0 %v3286_v17  ;;  %v3290_v28 = vpack.c.bf16 %v1855_v25, %v1854_v24 }
  0xda   : > { %1834 = vmatmul.mubr.f32.gmra.mrb[44].mxu1 %v407_v27 }
  0xdb   : > { %1838 = vmatprep.mubr.f32.mxu1 %v432_v29  ;;  %3291 = vmatprep.subr.bf16.mxu0 %v3290_v28 }
  0xdc   : > { %1754 = vmatmul.mubr.f32.gmra.mrb[46].mxu0 %v429_v30 }
  0xdd   : > { %3293 = vmatpush3.bf16.msra.mxu0 %v3290_v28 }
  0xde   : > { %1839 = vmatmul.mubr.f32.gmra.mrb[46].mxu1 %v431_v31 }
 0x103   : > { %v2326_v32 = vpop.f32.mrb[0].mxu0 }
 0x104   : > { %v2327_v34 = vpop.f32.mrb[1].mxu0 }
 0x105   : > { %v2370_v35 = vpop.f32.mrb[0].mxu1  ;;  %v2328_v36 = vadd.f32 %v2327_v34, %v2326_v32 }
 0x106   : > { %v2371_v37 = vpop.f32.mrb[1].mxu1 }
 0x107   : > { %v2372_v38 = vadd.f32 %v2371_v37, %v2370_v35  ;;  %v891_v39 = vadd.f32 %v2328_v36, %v2272_v33  ;;  %v2329_v40 = vpop.f32.mrb[2].mxu0 }
 0x108   : > { %v2330_v41 = vpop.f32.mrb[3].mxu0 }
 0x109   : > { %v2373_v42 = vpop.f32.mrb[2].mxu1  ;;  %v976_v43 = vadd.f32 %v2372_v38, %v891_v39  ;;  %v2331_v44 = vadd.f32 %v2330_v41, %v2329_v40 }
 0x10a   : > { %v2374_v45 = vpop.f32.mrb[3].mxu1 }
 0x10b   : > { %v2375_v46 = vadd.f32 %v2374_v45, %v2373_v42  ;;  %v896_v47 = vadd.f32 %v2331_v44, %v2272_v33  ;;  %v2332_v48 = vpop.f32.mrb[4].mxu0  ;;  %v1965_v45 = vld [vmem:[%s4895_s5] sm:$0xff] }
 0x10c   : > { %v2333_v49 = vpop.f32.mrb[5].mxu0 }
 0x10d   : > { %v2376_v50 = vpop.f32.mrb[4].mxu1  ;;  %v981_v51 = vadd.f32 %v2375_v46, %v896_v47  ;;  %v2334_v52 = vadd.f32 %v2333_v49, %v2332_v48  ;;  %v1966_v46 = vld [vmem:[%s4895_s5 + $0x8] sm:$0xff] }
 0x10e   : > { %v2377_v53 = vpop.f32.mrb[5].mxu1  ;;  %v3294_v47 = vpack.c.bf16 %v1966_v46, %v1965_v45 }
 0x10f   : > { %v2378_v54 = vadd.f32 %v2377_v53, %v2376_v50  ;;  %v901_v55 = vadd.f32 %v2334_v52, %v2272_v33  ;;  %v2335_v56 = vpop.f32.mrb[6].mxu0 }
 0x110   : > { %v2336_v57 = vpop.f32.mrb[7].mxu0  ;;  %3295 = vmatprep.subr.bf16.mxu1 %v3294_v47 }
 0x111   : > { %v2379_v58 = vpop.f32.mrb[6].mxu1  ;;  %v986_v59 = vadd.f32 %v2378_v54, %v901_v55  ;;  %v2337_v60 = vadd.f32 %v2336_v57, %v2335_v56  ;;  %3297 = vmatpush3.bf16.msra.mxu1 %v3294_v47 }
 0x112   : > { %v2380_v61 = vpop.f32.mrb[7].mxu1 }
 0x113   : > { %v2381_v62 = vadd.f32 %v2380_v61, %v2379_v58  ;;  %v906_v63 = vadd.f32 %v2337_v60, %v2272_v33 }
 0x115   : > { %v991_v0 = vadd.f32 %v2381_v62, %v906_v63 }
 0x123   : > { %v2414_v6 = vpop.f32.mrb[8].mxu0 }
 0x124   : > { %v2415_v8 = vpop.f32.mrb[9].mxu0 }
 0x125   : > { %v2458_v9 = vpop.f32.mrb[8].mxu1  ;;  %v2416_v10 = vadd.f32 %v2415_v8, %v2414_v6 }
 0x126   : > { %v2459_v11 = vpop.f32.mrb[9].mxu1 }
 0x127   : > { %v2460_v12 = vadd.f32 %v2459_v11, %v2458_v9  ;;  %v1061_v15 = vadd.f32 %v2416_v10, %v976_v43  ;;  %v2417_v16 = vpop.f32.mrb[10].mxu0 }
 0x128   : > { %v2418_v18 = vpop.f32.mrb[11].mxu0 }
 0x129   : > { %v2461_v19 = vpop.f32.mrb[10].mxu1  ;;  %v1146_v20 = vadd.f32 %v2460_v12, %v1061_v15  ;;  %v2419_v21 = vadd.f32 %v2418_v18, %v2417_v16 }
 0x12a   : > { %v2462_v22 = vpop.f32.mrb[11].mxu1 }
 0x12b   : > { %v2463_v23 = vadd.f32 %v2462_v22, %v2461_v19  ;;  %v1066_v26 = vadd.f32 %v2419_v21, %v981_v51  ;;  %v2420_v27 = vpop.f32.mrb[12].mxu0 }
 0x12c   : > { %v2421_v29 = vpop.f32.mrb[13].mxu0 }
 0x12d   : > { %v2464_v30 = vpop.f32.mrb[12].mxu1  ;;  %v1151_v31 = vadd.f32 %v2463_v23, %v1066_v26  ;;  %v2422_v32 = vadd.f32 %v2421_v29, %v2420_v27 }
 0x12e   : > { %v2465_v33 = vpop.f32.mrb[13].mxu1 }
 0x12f   : > { %v2466_v34 = vadd.f32 %v2465_v33, %v2464_v30  ;;  %v1071_v35 = vadd.f32 %v2422_v32, %v986_v59  ;;  %v2423_v36 = vpop.f32.mrb[14].mxu0 }
 0x130   : > { %v2424_v37 = vpop.f32.mrb[15].mxu0 }
 0x131   : > { %v2467_v38 = vpop.f32.mrb[14].mxu1  ;;  %v1156_v39 = vadd.f32 %v2466_v34, %v1071_v35  ;;  %v2425_v40 = vadd.f32 %v2424_v37, %v2423_v36 }
 0x132   : > { %v2468_v41 = vpop.f32.mrb[15].mxu1 }
 0x133   : > { %v2469_v42 = vadd.f32 %v2468_v41, %v2467_v38  ;;  %v1076_v43 = vadd.f32 %v2425_v40, %v991_v0 }
 0x135   : > { %v1161_v44 = vadd.f32 %v2469_v42, %v1076_v43 }
 0x143   : > { %v2502_v48 = vpop.f32.mrb[16].mxu0 }
 0x144   : > { %v2503_v49 = vpop.f32.mrb[17].mxu0 }
 0x145   : > { %v2546_v50 = vpop.f32.mrb[16].mxu1  ;;  %v2504_v51 = vadd.f32 %v2503_v49, %v2502_v48 }
 0x146   : > { %v2547_v52 = vpop.f32.mrb[17].mxu1 }
 0x147   : > { %v2548_v53 = vadd.f32 %v2547_v52, %v2546_v50  ;;  %v1231_v54 = vadd.f32 %v2504_v51, %v1146_v20  ;;  %v2505_v55 = vpop.f32.mrb[18].mxu0 }
 0x148   : > { %v2506_v56 = vpop.f32.mrb[19].mxu0 }
 0x149   : > { %v2549_v57 = vpop.f32.mrb[18].mxu1  ;;  %v1316_v58 = vadd.f32 %v2548_v53, %v1231_v54  ;;  %v2507_v59 = vadd.f32 %v2506_v56, %v2505_v55 }
 0x14a   : > { %v2550_v60 = vpop.f32.mrb[19].mxu1 }
 0x14b   : > { %v2551_v61 = vadd.f32 %v2550_v60, %v2549_v57  ;;  %v1236_v62 = vadd.f32 %v2507_v59, %v1151_v31  ;;  %v2508_v63 = vpop.f32.mrb[20].mxu0 }
 0x14c   : > { %v2509_v0 = vpop.f32.mrb[21].mxu0 }
 0x14d   : > { %v2552_v1 = vpop.f32.mrb[20].mxu1  ;;  %v1321_v2 = vadd.f32 %v2551_v61, %v1236_v62  ;;  %v2510_v3 = vadd.f32 %v2509_v0, %v2508_v63 }
 0x14e   : > { %v2553_v4 = vpop.f32.mrb[21].mxu1 }
 0x14f   : > { %v2554_v5 = vadd.f32 %v2553_v4, %v2552_v1  ;;  %v1241_v6 = vadd.f32 %v2510_v3, %v1156_v39  ;;  %v2511_v7 = vpop.f32.mrb[22].mxu0 }
 0x150   : > { %v2512_v8 = vpop.f32.mrb[23].mxu0 }
 0x151   : > { %v2555_v9 = vpop.f32.mrb[22].mxu1  ;;  %v1326_v10 = vadd.f32 %v2554_v5, %v1241_v6  ;;  %v2513_v11 = vadd.f32 %v2512_v8, %v2511_v7 }
 0x152   : > { %v2556_v12 = vpop.f32.mrb[23].mxu1 }
 0x153   : > { %v2557_v13 = vadd.f32 %v2556_v12, %v2555_v9  ;;  %v1246_v14 = vadd.f32 %v2513_v11, %v1161_v44 }
 0x155   : > { %v1331_v15 = vadd.f32 %v2557_v13, %v1246_v14 }
 0x163   : > { %v2590_v16 = vpop.f32.mrb[24].mxu0 }
 0x164   : > { %v2591_v17 = vpop.f32.mrb[25].mxu0 }
 0x165   : > { %v2634_v18 = vpop.f32.mrb[24].mxu1  ;;  %v2592_v19 = vadd.f32 %v2591_v17, %v2590_v16 }
 0x166   : > { %v2635_v20 = vpop.f32.mrb[25].mxu1 }
 0x167   : > { %v2636_v21 = vadd.f32 %v2635_v20, %v2634_v18  ;;  %v1401_v22 = vadd.f32 %v2592_v19, %v1316_v58  ;;  %v2593_v23 = vpop.f32.mrb[26].mxu0 }
 0x168   : > { %v2594_v24 = vpop.f32.mrb[27].mxu0 }
 0x169   : > { %v2637_v25 = vpop.f32.mrb[26].mxu1  ;;  %v1486_v26 = vadd.f32 %v2636_v21, %v1401_v22  ;;  %v2595_v27 = vadd.f32 %v2594_v24, %v2593_v23 }
 0x16a   : > { %v2638_v28 = vpop.f32.mrb[27].mxu1 }
 0x16b   : > { %v2639_v29 = vadd.f32 %v2638_v28, %v2637_v25  ;;  %v1406_v30 = vadd.f32 %v2595_v27, %v1321_v2  ;;  %v2596_v31 = vpop.f32.mrb[28].mxu0 }
 0x16c   : > { %v2597_v32 = vpop.f32.mrb[29].mxu0 }
 0x16d   : > { %v2640_v33 = vpop.f32.mrb[28].mxu1  ;;  %v1491_v34 = vadd.f32 %v2639_v29, %v1406_v30  ;;  %v2598_v35 = vadd.f32 %v2597_v32, %v2596_v31 }
 0x16e   : > { %v2641_v36 = vpop.f32.mrb[29].mxu1 }
 0x16f   : > { %v2642_v37 = vadd.f32 %v2641_v36, %v2640_v33  ;;  %v1411_v38 = vadd.f32 %v2598_v35, %v1326_v10  ;;  %v2599_v39 = vpop.f32.mrb[30].mxu0 }
 0x170   : > { %v2600_v40 = vpop.f32.mrb[31].mxu0 }
 0x171   : > { %v2643_v41 = vpop.f32.mrb[30].mxu1  ;;  %v1496_v42 = vadd.f32 %v2642_v37, %v1411_v38  ;;  %v2601_v43 = vadd.f32 %v2600_v40, %v2599_v39 }
 0x172   : > { %v2644_v44 = vpop.f32.mrb[31].mxu1 }
 0x173   : > { %v2645_v45 = vadd.f32 %v2644_v44, %v2643_v41  ;;  %v1416_v46 = vadd.f32 %v2601_v43, %v1331_v15 }
 0x175   : > { %v1501_v47 = vadd.f32 %v2645_v45, %v1416_v46 }
 0x183   : > { %v2678_v48 = vpop.f32.mrb[32].mxu0 }
 0x184   : > { %v2679_v49 = vpop.f32.mrb[33].mxu0 }
 0x185   : > { %v2722_v50 = vpop.f32.mrb[32].mxu1  ;;  %v2680_v51 = vadd.f32 %v2679_v49, %v2678_v48 }
 0x186   : > { %v2723_v52 = vpop.f32.mrb[33].mxu1 }
 0x187   : > { %v2724_v53 = vadd.f32 %v2723_v52, %v2722_v50  ;;  %v1571_v54 = vadd.f32 %v2680_v51, %v1486_v26  ;;  %v2681_v55 = vpop.f32.mrb[34].mxu0  ;;  %v1967_v52 = vld [vmem:[%s4895_s5 + $0x10] sm:$0xff] }
 0x188   : > { %v2682_v56 = vpop.f32.mrb[35].mxu0 }
 0x189   : > { %v2725_v57 = vpop.f32.mrb[34].mxu1  ;;  %v1656_v58 = vadd.f32 %v2724_v53, %v1571_v54  ;;  %v2683_v59 = vadd.f32 %v2682_v56, %v2681_v55  ;;  %v1968_v53 = vld [vmem:[%s4895_s5 + $0x18] sm:$0xff]  ;;  %v2273_v55 = vld [vmem:[%s4894_s4] ss:$0 sm:$0xff] }
 0x18a   : > { %v2726_v60 = vpop.f32.mrb[35].mxu1  ;;  %v3298_v54 = vpack.c.bf16 %v1968_v53, %v1967_v52 }
 0x18b   : > { %v2727_v61 = vadd.f32 %v2726_v60, %v2725_v57  ;;  %v1576_v62 = vadd.f32 %v2683_v59, %v1491_v34  ;;  %v2684_v63 = vpop.f32.mrb[36].mxu0 }
 0x18c   : > { %v2685_v0 = vpop.f32.mrb[37].mxu0  ;;  %3299 = vmatprep.subr.bf16.mxu1 %v3298_v54 }
 0x18d   : > { %v2728_v1 = vpop.f32.mrb[36].mxu1  ;;  %v1661_v2 = vadd.f32 %v2727_v61, %v1576_v62  ;;  %v2686_v3 = vadd.f32 %v2685_v0, %v2684_v63  ;;  %3301 = vmatpush3.bf16.msra.mxu1 %v3298_v54 }
 0x18e   : > { %v2729_v4 = vpop.f32.mrb[37].mxu1 }
 0x18f   : > { %v2730_v5 = vadd.f32 %v2729_v4, %v2728_v1  ;;  %v1581_v6 = vadd.f32 %v2686_v3, %v1496_v42  ;;  %v2687_v7 = vpop.f32.mrb[38].mxu0  ;;  %v2078_v4 = vld [vmem:[%s4897_s7] sm:$0xff] }
 0x190   : > { %v2688_v8 = vpop.f32.mrb[39].mxu0 }
 0x191   : > { %v2731_v9 = vpop.f32.mrb[38].mxu1  ;;  %v1666_v10 = vadd.f32 %v2730_v5, %v1581_v6  ;;  %v2689_v11 = vadd.f32 %v2688_v8, %v2687_v7  ;;  %v2079_v5 = vld [vmem:[%s4897_s7 + $0x8] sm:$0xff]  ;;  %v2278_v7 = vld [vmem:[%s4896_s6] ss:$0 sm:$0xff] }
 0x192   : > { %v2732_v12 = vpop.f32.mrb[39].mxu1  ;;  %v3302_v6 = vpack.c.bf16 %v2079_v5, %v2078_v4 }
 0x193   : > { %v2733_v13 = vadd.f32 %v2732_v12, %v2731_v9  ;;  %v1586_v14 = vadd.f32 %v2689_v11, %v1501_v47 }
 0x194   : > { %3303 = vmatprep.subr.bf16.mxu0 %v3302_v6  ;;  %3306 = vmatprep.subr.bf16.mxu1 %v3302_v6 }
 0x195   : > { %v1671_v15 = vadd.f32 %v2733_v13, %v1586_v14 }
 0x1a3   : > { %v2766_v16 = vpop.f32.mrb[40].mxu0 }
 0x1a4   : > { %v2767_v17 = vpop.f32.mrb[41].mxu0 }
 0x1a5   : > { %v2810_v18 = vpop.f32.mrb[40].mxu1  ;;  %v2768_v19 = vadd.f32 %v2767_v17, %v2766_v16 }
 0x1a6   : > { %v2811_v20 = vpop.f32.mrb[41].mxu1 }
 0x1a7   : > { %v2812_v21 = vadd.f32 %v2811_v20, %v2810_v18  ;;  %v1741_v22 = vadd.f32 %v2768_v19, %v1656_v58  ;;  %v2769_v23 = vpop.f32.mrb[42].mxu0  ;;  %v2283_v20 = vld [vmem:[%s4898_s8] ss:$0 sm:$0xff] }
 0x1a8   : > { %v2770_v24 = vpop.f32.mrb[43].mxu0 }
 0x1a9   : > { %v2813_v25 = vpop.f32.mrb[42].mxu1  ;;  %v1826_v26 = vadd.f32 %v2812_v21, %v1741_v22  ;;  %v2771_v27 = vadd.f32 %v2770_v24, %v2769_v23 }
 0x1aa   : > { %v2814_v28 = vpop.f32.mrb[43].mxu1 }
 0x1ab   : > { %v2815_v29 = vadd.f32 %v2814_v28, %v2813_v25  ;;  %v1844_v30 = vmax.f32 %v1826_v26, 0.0  ;;  %v1746_v31 = vadd.f32 %v2771_v27, %v1661_v2  ;;  %v2772_v32 = vpop.f32.mrb[44].mxu0 }
 0x1ac   : > { %v2773_v33 = vpop.f32.mrb[45].mxu0 }
 0x1ad   : > { %v2816_v34 = vpop.f32.mrb[44].mxu1  ;;  %v1831_v35 = vadd.f32 %v2815_v29, %v1746_v31  ;;  %v2774_v36 = vadd.f32 %v2773_v33, %v2772_v32  ;;  %2864 = vmatprep.mubr.msk.f32.mxu0 %vm1863_vm0, %v1844_v30 }
 0x1ae   : > { %v2817_v37 = vpop.f32.mrb[45].mxu1 }
 0x1af   : > { %v2818_v38 = vadd.f32 %v2817_v37, %v2816_v34  ;;  %v1845_v39 = vmax.f32 %v1831_v35, 0.0  ;;  %v1751_v40 = vadd.f32 %v2774_v36, %v1666_v10  ;;  %v2775_v41 = vpop.f32.mrb[46].mxu0 }
 0x1b0   : > { %v2776_v42 = vpop.f32.mrb[47].mxu0 }
 0x1b1   : > { %v2819_v43 = vpop.f32.mrb[46].mxu1  ;;  %v1836_v44 = vadd.f32 %v2818_v38, %v1751_v40  ;;  %v2777_v45 = vadd.f32 %v2776_v42, %v2775_v41  ;;  %2865 = vmatmul.mubr.msk.f32.vlgmr.msra.gmra.mrb[48].mxu0 %vm1863_vm0, %v1845_v39 }
 0x1b2   : > { %v2820_v46 = vpop.f32.mrb[47].mxu1  ;;  %3305 = vmatpush3.bf16.msra.mxu0 %v3302_v6 }
 0x1b3   : > { %v2821_v47 = vadd.f32 %v2820_v46, %v2819_v43  ;;  %v1846_v48 = vmax.f32 %v1836_v44, 0.0  ;;  %v1756_v49 = vadd.f32 %v2777_v45, %v1671_v15 }
 0x1b5   : > { %v1841_v50 = vadd.f32 %v2821_v47, %v1756_v49  ;;  %2867 = vmatprep.mubr.msk.f32.mxu0 %vm1863_vm0, %v1846_v48 }
 0x1b7   : > { %v1847_v51 = vmax.f32 %v1841_v50, 0.0 }
 0x1b9   : > { %2868 = vmatmul.mubr.msk.f32.gmra.mrb[50].mxu0 %vm1863_vm0, %v1847_v51 }
 0x284   : > { %v2866_v56 = vpop.f32.mrb[48].mxu0 }
 0x285   : > { %v1948_v57 = vadd.f32 %v2866_v56, %v2273_v55  ;;  %v1942_v58 = vpop.f32.mrb[49].mxu0 }
 0x286   : > { %v1943_v59 = vadd.f32 %v2273_v55, %v1942_v58 }
 0x287   : > { %v1962_v61 = vmax.f32 %v1948_v57, 0.0 }
 0x288   : > { %v1961_v60 = vmax.f32 %v1943_v59, 0.0 }
 0x28a   : > { %2878 = vmatprep.mubr.msk.f32.mxu1 %vm1976_vm1, %v1961_v60 }
 0x28b   : > { %2879 = vmatmul.mubr.msk.f32.vlgmr.msra.gmra.mrb[48].mxu1 %vm1976_vm1, %v1962_v61 }
 0x28c   : > { %v2869_v62 = vpop.f32.mrb[50].mxu0  ;;  %3307 = vmatpush3.bf16.msra.mxu1 %v3302_v6 }
 0x28d   : > { %v1958_v63 = vadd.f32 %v2869_v62, %v2273_v55  ;;  %v1952_v0 = vpop.f32.mrb[51].mxu0 }
 0x28e   : > { %v1953_v1 = vadd.f32 %v2273_v55, %v1952_v0 }
 0x28f   : > { %v1964_v3 = vmax.f32 %v1958_v63, 0.0 }
 0x290   : > { %v1963_v2 = vmax.f32 %v1953_v1, 0.0 }
 0x292   : > { %2881 = vmatprep.mubr.msk.f32.mxu1 %vm1976_vm1, %v1963_v2 }
 0x293   : > { %2882 = vmatmul.mubr.msk.f32.gmra.mrb[50].mxu1 %vm1976_vm1, %v1964_v3 }
 0x35e   : > { %v2880_v8 = vpop.f32.mrb[48].mxu1 }
 0x35f   : > { %v2061_v9 = vadd.f32 %v2880_v8, %v2278_v7  ;;  %v2055_v10 = vpop.f32.mrb[49].mxu1 }
 0x360   : > { %v2056_v11 = vadd.f32 %v2278_v7, %v2055_v10 }
 0x361   : > { %v2075_v13 = vmax.f32 %v2061_v9, 0.0 }
 0x362   : > { %v2074_v12 = vmax.f32 %v2056_v11, 0.0 }
 0x364   : > { %2888 = vmatprep.mubr.msk.f32.mxu0 %vm2087_vm2, %v2074_v12 }
 0x365   : > { %2889 = vmatmul.mubr.msk.f32.vlgmr.msra.gmra.mrb[52].mxu0 %vm2087_vm2, %v2075_v13 }
 0x366   : > { %v2883_v14 = vpop.f32.mrb[50].mxu1 }
 0x367   : > { %v2071_v15 = vadd.f32 %v2883_v14, %v2278_v7  ;;  %v2065_v16 = vpop.f32.mrb[51].mxu1 }
 0x368   : > { %v2066_v17 = vadd.f32 %v2278_v7, %v2065_v16 }
 0x369   : > { %v2077_v19 = vmax.f32 %v2071_v15, 0.0 }
 0x36a   : > { %v2076_v18 = vmax.f32 %v2066_v17, 0.0 }
 0x36c   : > { %2891 = vmatprep.mubr.msk.f32.mxu1 %vm2087_vm2, %v2076_v18 }
 0x36d   : > { %2892 = vmatmul.mubr.msk.f32.vlgmr.msra.gmra.mrb[52].mxu1 %vm2087_vm2, %v2077_v19 }
 0x438   : > { %v2890_v21 = vpop.f32.mrb[52].mxu0 }
 0x439   : > { %v2172_v22 = vadd.f32 %v2890_v21, %v2283_v20  ;;  %v2166_v23 = vpop.f32.mrb[53].mxu0 }
 0x43a   : > { %v2167_v24 = vadd.f32 %v2283_v20, %v2166_v23 }
 0x43b   : > { %2186 = vst [vmem:[%s328_s21 + $0x8] sm:$0xff] %v2172_v22 }
 0x43c   : > { %2185 = vst [vmem:[%s328_s21] sm:$0xff] %v2167_v24 }
 0x440   : > { %v2893_v25 = vpop.f32.mrb[52].mxu1 }
 0x441   : > { %v2182_v26 = vadd.f32 %v2893_v25, %v2283_v20  ;;  %v2176_v27 = vpop.f32.mrb[53].mxu1 }
 0x442   : > { %v2177_v28 = vadd.f32 %v2283_v20, %v2176_v27 }
 0x443   : > { %2188 = vst [vmem:[%s328_s21 + $0x18] sm:$0xff] %v2182_v26 }
 0x444   : > { %2187 = vst [vmem:[%s328_s21 + $0x10] sm:$0xff] %v2177_v28 }
 0x445   : > { %3363 = shalt.err (!%p3360_p3)
}
 0x446   : > { %s3364_s23 = scalar_lea.hbm %s4847_s16, 512  ;;  %s3368_s27 = scalar_lea.hbm %s4899_s9, 1024 }
 0x447   : > { %p3365_p4 = scmp.ne.s32.totalorder %s4847_s16, %s3364_s23  ;;  %p3369_p9 = scmp.lt.u32.totalorder %s4847_s16, %s4899_s9 }
 0x448   : > { %p3370_p10 = scmp.lt.u32.totalorder %s3368_s27, %s3364_s23  ;;  %p3372_p12 = scmp.lt.u32.totalorder %s3364_s23, %s4847_s16 }
 0x449   : > { %p3366_p7 = pnand %p3365_p4, %p3505_p5 }
 0x44a   : > { %p3371_p11 = por %p3370_p10, %p3369_p9 }
 0x44b   : > { %p3367_p8 = pneg %p3366_p7 }
 0x44c   : > { %p3373_p13 = por %p3372_p12, %p3371_p11 }
 0x44e   : > { %p3374_p0 = pnand %p3373_p13, %p3367_p8 }
 0x450   : > { %3377 = shalt.err (!%p3374_p0)
}
 0x451   : > { %s3415_s22 = smov 128   ;;  %s3416_s13 = smov 8  }
 0x452   : > { %3309 = dma.vmem_to_hbm [thread:$0]  (%p3505_p5), %s4842_s26, 512, %s4847_s16, %s4849_s17, %s3415_s22, %s3415_s22, %s3416_s13  }
 0x453 PF: > { %p3315_p1 = scmp.ge.s32.totalorder %s3412_s12, 2  ;;  %s2218_s24 = sand.u32 1, %s3400_s30  }
 0x454   : > { %s2219_s14 = scalar_lea.sflag [#allocation3], %s2218_s24 }
 0x455   : > { %p3312_p2 = pnand %p3315_p1, %p3509_p6 }
 0x457   : > { %3395 = dma.done.wait (!%p3312_p2), %s2219_s14, 512  }
 0x458   : > { %3397 = vsyncadd (!%p3312_p2), %s2219_s14, 4294966784  ;;  %p19_p3 = scmp.ge.s32.totalorder %s3492_s15, 4   ;;  %s4903_s30 = smov %s3404_s10 }
 0x459   : > { %s4904_s10 = smov %s3408_s11  ;;  %s4905_s11 = smov %s3503_s18 }
 0x45a   : > { %s4906_s12 = smov %s3492_s15  ;;  %21 = sbr.rel (!%p19_p3) target bundleno = 3 (0x3), region = 91 }
 0x461   :  { %2224 = vsyncpa [#allocation3], 1 }
 0x462   :  { %2226 = vsyncpa [#allocation3 + $0x1], 1 }

</bundles_post_ra>
